<compile_context>
chip_gen: v6e
topology: v6e:2x2x1
jax: 0.10.0
libtpu: 0.0.40
codegen_flags: <defaults>
</compile_context>

<pallas_src>
import functools

import numpy as np

import jax
import jax.numpy as jnp
from jax import lax
from jax.experimental import pallas as pl
from jax.experimental.pallas import tpu as pltpu


# ----------------------------------------------------------------------------
# Static config + parameter init (mirrors the PyTorch Encoder Sequential)
# ----------------------------------------------------------------------------
def _conv_init(key, k, cin, cout):
    k1, k2 = jax.random.split(key)
    bound = 1.0 / float((k * k * cin) ** 0.5)
    w = jax.random.uniform(k1, (k, k, cin, cout), jnp.float32, -bound, bound)  # HWIO
    b = jax.random.uniform(k2, (cout,), jnp.float32, -bound, bound)
    return w, b


def build_encoder(key, in_channel, channel, n_res_block, n_res_channel, stride,
                  n_additional_downsample_layers):
    """Returns (layer_cfgs, params). layer_cfgs is static python metadata."""
    cfgs = []

    def add(cin, cout, k, s, p, relu_in=False, relu_out=False,
            save_residual=False, add_residual=False):
        cfgs.append(dict(cin=cin, cout=cout, k=k, stride=s, pad=p,
                         relu_in=relu_in, relu_out=relu_out,
                         save_residual=save_residual, add_residual=add_residual))

    if stride == 4:
        add(in_channel, channel // 2, 4, 2, 1, relu_out=True)
        add(channel // 2, channel, 4, 2, 1, relu_out=True)
        add(channel, channel, 3, 1, 1)
    elif stride == 2:
        add(in_channel, channel // 2, 4, 2, 1, relu_out=True)
        add(channel // 2, channel, 3, 1, 1)
    else:
        raise ValueError("stride must be 2 or 4")
    for _ in range(n_additional_downsample_layers):
        add(channel, channel, 4, 2, 1)
    for _ in range(n_res_block):
        add(channel, n_res_channel, 3, 1, 1, relu_in=True, relu_out=True,
            save_residual=True)
        add(n_res_channel, channel, 1, 1, 0, add_residual=True)
    cfgs[-1]["relu_out"] = True  # trailing nn.ReLU fused into the last conv

    keys = jax.random.split(key, len(cfgs))
    params = [_conv_init(kk, c["k"], c["cin"], c["cout"])
              for kk, c in zip(keys, cfgs)]
    return cfgs, params


# ----------------------------------------------------------------------------
# Trace-time constant operators
# ----------------------------------------------------------------------------
@functools.lru_cache(maxsize=None)
def _gather_wide(H, W, K, stride, pad):
    """Gwide[h, k*OHW + o] == 1  <=>  flat input pixel h feeds flat output
    pixel o for kernel tap k (k = kh*K + kw, implicit zero padding).
    All K*K taps live in one wide operator -> one gather matmul per layer."""
    OH = (H + 2 * pad - K) // stride + 1
    OW = (W + 2 * pad - K) // stride + 1
    g = np.zeros((H * W, K * K, OH * OW), np.float32)
    for kh in range(K):
        for kw in range(K):
            k = kh * K + kw
            for oh in range(OH):
                ih = stride * oh + kh - pad
                if ih < 0 or ih >= H:
                    continue
                for ow in range(OW):
                    iw = stride * ow + kw - pad
                    if iw < 0 or iw >= W:
                        continue
                    g[ih * W + iw, k, oh * OW + ow] = 1.0
    return g.reshape(H * W, K * K * OH * OW), OH, OW


def _roll_offsets_and_masks(H, W, K, pad, batch_block):
    """For stride-1 'same' convs: per-tap lane offsets along the flattened HW
    axis plus 0/1 validity masks, tiled over the images packed side-by-side on
    lanes (cross-image reads from the rotation only occur at masked slots)."""
    offs, masks = [], []
    for kh in range(K):
        for kw in range(K):
            dh, dw = kh - pad, kw - pad
            offs.append(dh * W + dw)
            vh = (np.arange(H) + dh >= 0) & (np.arange(H) + dh < H)
            vw = (np.arange(W) + dw >= 0) & (np.arange(W) + dw < W)
            m = (vh[:, None] & vw[None, :]).astype(np.float32).reshape(-1)
            masks.append(np.tile(m, batch_block))
    masks = np.stack(masks)[:, None, :]          # (K*K, 1, B*H*W)
    return offs, masks


def _build_operands(cfgs, params, H, W, batch_block):
    """Per-conv operands (all f32, all whole-array VMEM-resident):
      'mm'   : Gwide (HW, K^2*OHW), Wflat (Cout, K^2*Cin), bias (Cout,1)
      'roll' : masks (K^2, 1, B*HW), Wflat, bias
      '1x1'  : Wflat (Cout, Cin), bias
    Returns (static plan, operand list, (Cf, OH, OW), padded first-layer Cin)."""
    plan, operands = [], []
    sh, sw = H, W
    first = True
    for cfg, (wgt, bias) in zip(cfgs, params):
        k, s, p = cfg["k"], cfg["stride"], cfg["pad"]
        cin, cout = cfg["cin"], cfg["cout"]
        cin_eff = ((cin + 7) // 8) * 8 if first else cin   # sublane-pad tiny input depth

        if k == 1 and s == 1 and p == 0:
            mode, oh, ow, offs = "1x1", sh, sw, None
        elif s == 1 and 2 * p == k - 1:                     # stride-1 'same' conv
            mode, oh, ow = "roll", sh, sw
            offs, masks = _roll_offsets_and_masks(sh, sw, k, p, batch_block)
            operands.append(jnp.asarray(masks, jnp.float32))
        else:                                               # strided downsample conv
            mode, offs = "mm", None
            gw, oh, ow = _gather_wide(sh, sw, k, s, p)
            operands.append(jnp.asarray(gw, jnp.float32))

        w3 = jnp.reshape(wgt, (k * k, cin, cout))
        if cin_eff > cin:
            w3 = jnp.pad(w3, ((0, 0), (0, cin_eff - cin), (0, 0)))
        wflat = jnp.transpose(w3, (2, 0, 1)).reshape(cout, k * k * cin_eff)
        operands.append(wflat.astype(jnp.float32))
        operands.append(bias.reshape(cout, 1).astype(jnp.float32))

        plan.append(dict(mode=mode, k2=k * k, cin=cin_eff, cout=cout,
                         s_in=sh * sw, s_out=oh * ow, offsets=offs,
                         relu_in=cfg["relu_in"], relu_out=cfg["relu_out"],
                         save_residual=cfg["save_residual"],
                         add_residual=cfg["add_residual"]))
        sh, sw = oh, ow
        first = False
    return plan, operands, (cfgs[-1]["cout"], sh, sw), plan[0]["cin"]


# ----------------------------------------------------------------------------
# Fused whole-encoder Pallas kernel
# ----------------------------------------------------------------------------
def _lane_roll(x, shift, size):
    """Roll x along its last (lane) axis by `shift` (np.roll semantics) with a
    static shift: two lane slices + a concat (pure lane data movement, no
    MXU/VPU arithmetic; equivalently expressible with pltpu.roll)."""
    s = shift % size
    if s == 0:
        return x
    return jnp.concatenate([x[:, size - s:], x[:, :size - s]], axis=1)


def _make_encoder_kernel(plan, batch_block):
    B = batch_block

    def kernel(*refs):
        x_ref, o_ref, layer_refs = refs[0], refs[-1], refs[1:-1]
        act = x_ref[0]                       # (C, B*HW) f32, resident in VMEM/vregs
        saved = None
        i = 0
        for op in plan:
            mode, K2 = op["mode"], op["k2"]
            C, S_in, S_out = op["cin"], op["s_in"], op["s_out"]
            if mode == "1x1":
                w_ref, b_ref = layer_refs[i], layer_refs[i + 1]
                i += 2
            else:
                g_ref, w_ref, b_ref = layer_refs[i], layer_refs[i + 1], layer_refs[i + 2]
                i += 3

            if op["save_residual"]:
                saved = act                  # ResBlock input (pre-ReLU)
            src = jnp.maximum(act, 0.0) if op["relu_in"] else act

            # ---- build the (K2*C, B*S_out) im2col patch tile ---------------
            if mode == "1x1":
                patches = src
            elif mode == "roll":
                # stride-1 'same' conv: taps are lane shifts + boundary masks,
                # no gather operand / MXU gather matmul at all.
                pieces = []
                for k, off in enumerate(op["offsets"]):
                    shifted = _lane_roll(src, -off, B * S_in)
                    pieces.append(shifted * g_ref[k])          # (C, B*S)
                patches = jnp.concatenate(pieces, axis=0)
            else:  # "mm": strided conv -> ONE wide gather matmul for all taps
                if B > 1:
                    src_rows = jnp.concatenate(
                        [src[:, b * S_in:(b + 1) * S_in] for b in range(B)],
                        axis=0)                                # (B*C, S_in)
                else:
                    src_rows = src
                gathered = jnp.dot(src_rows, g_ref[...],
                                   preferred_element_type=jnp.float32)  # (B*C, K2*S_out)
                patches = jnp.concatenate(
                    [jnp.concatenate(
                        [gathered[b * C:(b + 1) * C, k * S_out:(k + 1) * S_out]
                         for b in range(B)], axis=1)
                     for k in range(K2)], axis=0)              # (K2*C, B*S_out)

            # ---- ONE deep weight matmul per layer (contraction = K2*C) -----
            out = jnp.dot(w_ref[...], patches,
                          preferred_element_type=jnp.float32) + b_ref[...]
            if op["add_residual"]:
                out = out + saved
            if op["relu_out"]:
                out = jnp.maximum(out, 0.0)
            act = out

        # Lane-dense store: flatten (Cf, B*Sf) -> (1, Cf*B*Sf)  (>=128 lanes).
        flat = jnp.concatenate([act[c:c + 1, :] for c in range(act.shape[0])],
                               axis=1)
        o_ref[0] = flat.astype(o_ref.dtype)

    return kernel


def _const_index_map(ndim):
    return lambda n: (0,) * ndim


def encoder_forward(cfgs, params, x_nchw, batch_block=None):
    N, Cin, H, W = x_nchw.shape
    B = N if batch_block is None else batch_block   # images packed per grid step
    assert N % B == 0
    nb = N // B
    plan, operands, (Cf, OHf, OWf), cin0 = _build_operands(cfgs, params, H, W, B)

    x = x_nchw.astype(jnp.float32)
    if cin0 > Cin:
        x = jnp.pad(x, ((0, 0), (0, cin0 - Cin), (0, 0), (0, 0)))
    # (N,C,H,W) -> (nb, C, B*H*W): B images of a block sit side by side on lanes.
    x_blk = (x.reshape(nb, B, cin0, H * W)
              .transpose(0, 2, 1, 3)
              .reshape(nb, cin0, B * H * W))

    lane_out = Cf * B * OHf * OWf
    in_specs = [pl.BlockSpec((1, cin0, B * H * W), lambda n: (n, 0, 0))]
    for op in operands:   # whole-array blocks, constant index maps -> VMEM-resident
        in_specs.append(pl.BlockSpec(op.shape, _const_index_map(op.ndim)))

    out = pl.pallas_call(
        _make_encoder_kernel(plan, B),
        out_shape=jax.ShapeDtypeStruct((nb, 1, lane_out), jnp.float32),
        grid=(nb,),
        in_specs=in_specs,
        out_specs=pl.BlockSpec((1, 1, lane_out), lambda n: (n, 0, 0)),
        compiler_params=pltpu.CompilerParams(
            dimension_semantics=("parallel",),      # v7x: split batch blocks over TCs
            vmem_limit_bytes=32 * 1024 * 1024),
    )(x_blk, *operands)

    # (nb, 1, Cf*B*OH*OW) -> (N, Cf, OH, OW)  (NCHW)
    out = (out.reshape(nb, Cf, B, OHf, OWf)
              .transpose(0, 2, 1, 3, 4)
              .reshape(N, Cf, OHf, OWf))
    return out


# ----------------------------------------------------------------------------
# Pure-JAX reference (direct translation of the PyTorch Sequential)
# ----------------------------------------------------------------------------
def encoder_ref(cfgs, params, x_nchw):
    x = jnp.transpose(x_nchw, (0, 2, 3, 1)).astype(jnp.float32)  # NHWC
    saved = None
    for cfg, (w, b) in zip(cfgs, params):
        if cfg["save_residual"]:
            saved = x
        h = jnp.maximum(x, 0.0) if cfg["relu_in"] else x
        h = lax.conv_general_dilated(
            h, w, (cfg["stride"], cfg["stride"]),
            [(cfg["pad"], cfg["pad"])] * 2,
            dimension_numbers=("NHWC", "HWIO", "NHWC")) + b
        if cfg["add_residual"]:
            h = h + saved
        if cfg["relu_out"]:
            h = jnp.maximum(h, 0.0)
        x = h
    return jnp.transpose(x, (0, 3, 1, 2))


if __name__ == "__main__":
    in_channel, channel = 4, 32
    n_res_block, n_res_channel = 2, 8
    stride, n_additional_downsample_layers = 4, 1

    key = jax.random.PRNGKey(0)
    kp, kx = jax.random.split(key)
    cfgs, params = build_encoder(kp, in_channel, channel, n_res_block,
                                 n_res_channel, stride,
                                 n_additional_downsample_layers)
    x = jax.random.normal(kx, (2, in_channel, 16, 16), jnp.float32)

    fwd = jax.jit(lambda xin: encoder_forward(cfgs, params, xin))
    out = jax.block_until_ready(fwd(x))
    ref = jax.block_until_ready(encoder_ref(cfgs, params, x))

    assert out.shape == ref.shape, (out.shape, ref.shape)
    max_err = float(jnp.max(jnp.abs(out - ref)))
    assert jnp.allclose(out, ref, rtol=5e-4, atol=5e-4), max_err
    print("KERNEL_OK")
</pallas_src>

<mosaic_0001>
module attributes {stable_mosaic.version = 11 : i64} {
  func.func @kernel(%arg0: i32, %arg1: memref<1x8x512xf32, #tpu.memory_space<vmem>>, %arg2: memref<256x1024xf32, #tpu.memory_space<vmem>>, %arg3: memref<16x128xf32, #tpu.memory_space<vmem>>, %arg4: memref<16x1xf32, #tpu.memory_space<vmem>>, %arg5: memref<64x256xf32, #tpu.memory_space<vmem>>, %arg6: memref<32x256xf32, #tpu.memory_space<vmem>>, %arg7: memref<32x1xf32, #tpu.memory_space<vmem>>, %arg8: memref<9x1x32xf32, #tpu.memory_space<vmem>>, %arg9: memref<32x288xf32, #tpu.memory_space<vmem>>, %arg10: memref<32x1xf32, #tpu.memory_space<vmem>>, %arg11: memref<16x64xf32, #tpu.memory_space<vmem>>, %arg12: memref<32x512xf32, #tpu.memory_space<vmem>>, %arg13: memref<32x1xf32, #tpu.memory_space<vmem>>, %arg14: memref<9x1x8xf32, #tpu.memory_space<vmem>>, %arg15: memref<8x288xf32, #tpu.memory_space<vmem>>, %arg16: memref<8x1xf32, #tpu.memory_space<vmem>>, %arg17: memref<32x8xf32, #tpu.memory_space<vmem>>, %arg18: memref<32x1xf32, #tpu.memory_space<vmem>>, %arg19: memref<9x1x8xf32, #tpu.memory_space<vmem>>, %arg20: memref<8x288xf32, #tpu.memory_space<vmem>>, %arg21: memref<8x1xf32, #tpu.memory_space<vmem>>, %arg22: memref<32x8xf32, #tpu.memory_space<vmem>>, %arg23: memref<32x1xf32, #tpu.memory_space<vmem>>, %arg24: memref<1x1x256xf32, #tpu.memory_space<vmem>>) attributes {dimension_semantics = [#tpu.dimension_semantics<parallel>], iteration_bounds = array<i64: 1>, scalar_prefetch = 0 : i64, scratch_operands = 0 : i64, tpu.core_type = #tpu.core_type<tc>, window_params = [{transform_indices = @transform_0, window_bounds = array<i64: 1, 8, 512>}, {pipeline_mode = #tpu.pipeline_mode<synchronous>, transform_indices = @transform_1, window_bounds = array<i64: 256, 1024>}, {pipeline_mode = #tpu.pipeline_mode<synchronous>, transform_indices = @transform_2, window_bounds = array<i64: 16, 128>}, {pipeline_mode = #tpu.pipeline_mode<synchronous>, transform_indices = @transform_3, window_bounds = array<i64: 16, 1>}, {pipeline_mode = #tpu.pipeline_mode<synchronous>, transform_indices = @transform_4, window_bounds = array<i64: 64, 256>}, {pipeline_mode = #tpu.pipeline_mode<synchronous>, transform_indices = @transform_5, window_bounds = array<i64: 32, 256>}, {pipeline_mode = #tpu.pipeline_mode<synchronous>, transform_indices = @transform_6, window_bounds = array<i64: 32, 1>}, {pipeline_mode = #tpu.pipeline_mode<synchronous>, transform_indices = @transform_7, window_bounds = array<i64: 9, 1, 32>}, {pipeline_mode = #tpu.pipeline_mode<synchronous>, transform_indices = @transform_8, window_bounds = array<i64: 32, 288>}, {pipeline_mode = #tpu.pipeline_mode<synchronous>, transform_indices = @transform_9, window_bounds = array<i64: 32, 1>}, {pipeline_mode = #tpu.pipeline_mode<synchronous>, transform_indices = @transform_10, window_bounds = array<i64: 16, 64>}, {pipeline_mode = #tpu.pipeline_mode<synchronous>, transform_indices = @transform_11, window_bounds = array<i64: 32, 512>}, {pipeline_mode = #tpu.pipeline_mode<synchronous>, transform_indices = @transform_12, window_bounds = array<i64: 32, 1>}, {pipeline_mode = #tpu.pipeline_mode<synchronous>, transform_indices = @transform_13, window_bounds = array<i64: 9, 1, 8>}, {pipeline_mode = #tpu.pipeline_mode<synchronous>, transform_indices = @transform_14, window_bounds = array<i64: 8, 288>}, {pipeline_mode = #tpu.pipeline_mode<synchronous>, transform_indices = @transform_15, window_bounds = array<i64: 8, 1>}, {pipeline_mode = #tpu.pipeline_mode<synchronous>, transform_indices = @transform_16, window_bounds = array<i64: 32, 8>}, {pipeline_mode = #tpu.pipeline_mode<synchronous>, transform_indices = @transform_17, window_bounds = array<i64: 32, 1>}, {pipeline_mode = #tpu.pipeline_mode<synchronous>, transform_indices = @transform_18, window_bounds = array<i64: 9, 1, 8>}, {pipeline_mode = #tpu.pipeline_mode<synchronous>, transform_indices = @transform_19, window_bounds = array<i64: 8, 288>}, {pipeline_mode = #tpu.pipeline_mode<synchronous>, transform_indices = @transform_20, window_bounds = array<i64: 8, 1>}, {pipeline_mode = #tpu.pipeline_mode<synchronous>, transform_indices = @transform_21, window_bounds = array<i64: 32, 8>}, {pipeline_mode = #tpu.pipeline_mode<synchronous>, transform_indices = @transform_22, window_bounds = array<i64: 32, 1>}, {transform_indices = @transform_23, window_bounds = array<i64: 1, 1, 256>}]} {
    %c0 = arith.constant 0 : index
    %c0_0 = arith.constant 0 : index
    %c0_1 = arith.constant 0 : index
    %0 = vector.load %arg1[%c0, %c0_0, %c0_1] : memref<1x8x512xf32, #tpu.memory_space<vmem>>, vector<1x8x512xf32>
    %1 = vector.shape_cast %0 : vector<1x8x512xf32> to vector<8x512xf32>
    %2 = vector.extract_strided_slice %1 {offsets = [0, 0], sizes = [8, 256], strides = [1, 1]} : vector<8x512xf32> to vector<8x256xf32>
    %3 = vector.extract_strided_slice %1 {offsets = [0, 256], sizes = [8, 256], strides = [1, 1]} : vector<8x512xf32> to vector<8x256xf32>
    %4 = tpu.concatenate %2, %3 in 0 : vector<8x256xf32>, vector<8x256xf32> -> vector<16x256xf32>
    %c0_2 = arith.constant 0 : index
    %c0_3 = arith.constant 0 : index
    %5 = vector.load %arg2[%c0_2, %c0_3] : memref<256x1024xf32, #tpu.memory_space<vmem>>, vector<256x1024xf32>
    %cst = arith.constant dense<0.000000e+00> : vector<16x1024xf32>
    %6 = tpu.matmul %4, %5, %cst {dimension_numbers = #tpu.dot_dimension_numbers<[1], [0], [0], [1], [0, 0, 1, 1], [], []>} : vector<16x256xf32>, vector<256x1024xf32>, vector<16x1024xf32> -> vector<16x1024xf32>
    %7 = vector.extract_strided_slice %6 {offsets = [0, 0], sizes = [8, 64], strides = [1, 1]} : vector<16x1024xf32> to vector<8x64xf32>
    %8 = vector.extract_strided_slice %6 {offsets = [8, 0], sizes = [8, 64], strides = [1, 1]} : vector<16x1024xf32> to vector<8x64xf32>
    %9 = tpu.concatenate %7, %8 in 1 : vector<8x64xf32>, vector<8x64xf32> -> vector<8x128xf32>
    %10 = vector.extract_strided_slice %6 {offsets = [0, 64], sizes = [8, 64], strides = [1, 1]} : vector<16x1024xf32> to vector<8x64xf32>
    %11 = vector.extract_strided_slice %6 {offsets = [8, 64], sizes = [8, 64], strides = [1, 1]} : vector<16x1024xf32> to vector<8x64xf32>
    %12 = tpu.concatenate %10, %11 in 1 : vector<8x64xf32>, vector<8x64xf32> -> vector<8x128xf32>
    %13 = vector.extract_strided_slice %6 {offsets = [0, 128], sizes = [8, 64], strides = [1, 1]} : vector<16x1024xf32> to vector<8x64xf32>
    %14 = vector.extract_strided_slice %6 {offsets = [8, 128], sizes = [8, 64], strides = [1, 1]} : vector<16x1024xf32> to vector<8x64xf32>
    %15 = tpu.concatenate %13, %14 in 1 : vector<8x64xf32>, vector<8x64xf32> -> vector<8x128xf32>
    %16 = vector.extract_strided_slice %6 {offsets = [0, 192], sizes = [8, 64], strides = [1, 1]} : vector<16x1024xf32> to vector<8x64xf32>
    %17 = vector.extract_strided_slice %6 {offsets = [8, 192], sizes = [8, 64], strides = [1, 1]} : vector<16x1024xf32> to vector<8x64xf32>
    %18 = tpu.concatenate %16, %17 in 1 : vector<8x64xf32>, vector<8x64xf32> -> vector<8x128xf32>
    %19 = vector.extract_strided_slice %6 {offsets = [0, 256], sizes = [8, 64], strides = [1, 1]} : vector<16x1024xf32> to vector<8x64xf32>
    %20 = vector.extract_strided_slice %6 {offsets = [8, 256], sizes = [8, 64], strides = [1, 1]} : vector<16x1024xf32> to vector<8x64xf32>
    %21 = tpu.concatenate %19, %20 in 1 : vector<8x64xf32>, vector<8x64xf32> -> vector<8x128xf32>
    %22 = vector.extract_strided_slice %6 {offsets = [0, 320], sizes = [8, 64], strides = [1, 1]} : vector<16x1024xf32> to vector<8x64xf32>
    %23 = vector.extract_strided_slice %6 {offsets = [8, 320], sizes = [8, 64], strides = [1, 1]} : vector<16x1024xf32> to vector<8x64xf32>
    %24 = tpu.concatenate %22, %23 in 1 : vector<8x64xf32>, vector<8x64xf32> -> vector<8x128xf32>
    %25 = vector.extract_strided_slice %6 {offsets = [0, 384], sizes = [8, 64], strides = [1, 1]} : vector<16x1024xf32> to vector<8x64xf32>
    %26 = vector.extract_strided_slice %6 {offsets = [8, 384], sizes = [8, 64], strides = [1, 1]} : vector<16x1024xf32> to vector<8x64xf32>
    %27 = tpu.concatenate %25, %26 in 1 : vector<8x64xf32>, vector<8x64xf32> -> vector<8x128xf32>
    %28 = vector.extract_strided_slice %6 {offsets = [0, 448], sizes = [8, 64], strides = [1, 1]} : vector<16x1024xf32> to vector<8x64xf32>
    %29 = vector.extract_strided_slice %6 {offsets = [8, 448], sizes = [8, 64], strides = [1, 1]} : vector<16x1024xf32> to vector<8x64xf32>
    %30 = tpu.concatenate %28, %29 in 1 : vector<8x64xf32>, vector<8x64xf32> -> vector<8x128xf32>
    %31 = vector.extract_strided_slice %6 {offsets = [0, 512], sizes = [8, 64], strides = [1, 1]} : vector<16x1024xf32> to vector<8x64xf32>
    %32 = vector.extract_strided_slice %6 {offsets = [8, 512], sizes = [8, 64], strides = [1, 1]} : vector<16x1024xf32> to vector<8x64xf32>
    %33 = tpu.concatenate %31, %32 in 1 : vector<8x64xf32>, vector<8x64xf32> -> vector<8x128xf32>
    %34 = vector.extract_strided_slice %6 {offsets = [0, 576], sizes = [8, 64], strides = [1, 1]} : vector<16x1024xf32> to vector<8x64xf32>
    %35 = vector.extract_strided_slice %6 {offsets = [8, 576], sizes = [8, 64], strides = [1, 1]} : vector<16x1024xf32> to vector<8x64xf32>
    %36 = tpu.concatenate %34, %35 in 1 : vector<8x64xf32>, vector<8x64xf32> -> vector<8x128xf32>
    %37 = vector.extract_strided_slice %6 {offsets = [0, 640], sizes = [8, 64], strides = [1, 1]} : vector<16x1024xf32> to vector<8x64xf32>
    %38 = vector.extract_strided_slice %6 {offsets = [8, 640], sizes = [8, 64], strides = [1, 1]} : vector<16x1024xf32> to vector<8x64xf32>
    %39 = tpu.concatenate %37, %38 in 1 : vector<8x64xf32>, vector<8x64xf32> -> vector<8x128xf32>
    %40 = vector.extract_strided_slice %6 {offsets = [0, 704], sizes = [8, 64], strides = [1, 1]} : vector<16x1024xf32> to vector<8x64xf32>
    %41 = vector.extract_strided_slice %6 {offsets = [8, 704], sizes = [8, 64], strides = [1, 1]} : vector<16x1024xf32> to vector<8x64xf32>
    %42 = tpu.concatenate %40, %41 in 1 : vector<8x64xf32>, vector<8x64xf32> -> vector<8x128xf32>
    %43 = vector.extract_strided_slice %6 {offsets = [0, 768], sizes = [8, 64], strides = [1, 1]} : vector<16x1024xf32> to vector<8x64xf32>
    %44 = vector.extract_strided_slice %6 {offsets = [8, 768], sizes = [8, 64], strides = [1, 1]} : vector<16x1024xf32> to vector<8x64xf32>
    %45 = tpu.concatenate %43, %44 in 1 : vector<8x64xf32>, vector<8x64xf32> -> vector<8x128xf32>
    %46 = vector.extract_strided_slice %6 {offsets = [0, 832], sizes = [8, 64], strides = [1, 1]} : vector<16x1024xf32> to vector<8x64xf32>
    %47 = vector.extract_strided_slice %6 {offsets = [8, 832], sizes = [8, 64], strides = [1, 1]} : vector<16x1024xf32> to vector<8x64xf32>
    %48 = tpu.concatenate %46, %47 in 1 : vector<8x64xf32>, vector<8x64xf32> -> vector<8x128xf32>
    %49 = vector.extract_strided_slice %6 {offsets = [0, 896], sizes = [8, 64], strides = [1, 1]} : vector<16x1024xf32> to vector<8x64xf32>
    %50 = vector.extract_strided_slice %6 {offsets = [8, 896], sizes = [8, 64], strides = [1, 1]} : vector<16x1024xf32> to vector<8x64xf32>
    %51 = tpu.concatenate %49, %50 in 1 : vector<8x64xf32>, vector<8x64xf32> -> vector<8x128xf32>
    %52 = vector.extract_strided_slice %6 {offsets = [0, 960], sizes = [8, 64], strides = [1, 1]} : vector<16x1024xf32> to vector<8x64xf32>
    %53 = vector.extract_strided_slice %6 {offsets = [8, 960], sizes = [8, 64], strides = [1, 1]} : vector<16x1024xf32> to vector<8x64xf32>
    %54 = tpu.concatenate %52, %53 in 1 : vector<8x64xf32>, vector<8x64xf32> -> vector<8x128xf32>
    %55 = tpu.concatenate %9, %12, %15, %18, %21, %24, %27, %30, %33, %36, %39, %42, %45, %48, %51, %54 in 0 : vector<8x128xf32>, vector<8x128xf32>, vector<8x128xf32>, vector<8x128xf32>, vector<8x128xf32>, vector<8x128xf32>, vector<8x128xf32>, vector<8x128xf32>, vector<8x128xf32>, vector<8x128xf32>, vector<8x128xf32>, vector<8x128xf32>, vector<8x128xf32>, vector<8x128xf32>, vector<8x128xf32>, vector<8x128xf32> -> vector<128x128xf32>
    %c0_4 = arith.constant 0 : index
    %c0_5 = arith.constant 0 : index
    %56 = vector.load %arg3[%c0_4, %c0_5] : memref<16x128xf32, #tpu.memory_space<vmem>>, vector<16x128xf32>
    %cst_6 = arith.constant dense<0.000000e+00> : vector<16x128xf32>
    %57 = tpu.matmul %56, %55, %cst_6 {dimension_numbers = #tpu.dot_dimension_numbers<[1], [0], [0], [1], [0, 0, 1, 1], [], []>} : vector<16x128xf32>, vector<128x128xf32>, vector<16x128xf32> -> vector<16x128xf32>
    %c0_7 = arith.constant 0 : index
    %c0_8 = arith.constant 0 : index
    %58 = vector.load %arg4[%c0_7, %c0_8] : memref<16x1xf32, #tpu.memory_space<vmem>>, vector<16x1xf32>
    %59 = vector.broadcast %58 : vector<16x1xf32> to vector<16x128xf32>
    %60 = arith.addf %57, %59 : vector<16x128xf32>
    %cst_9 = arith.constant 0.000000e+00 : f32
    %61 = vector.broadcast %cst_9 : f32 to vector<16x128xf32>
    %62 = arith.maximumf %60, %61 : vector<16x128xf32>
    %63 = vector.extract_strided_slice %62 {offsets = [0, 0], sizes = [16, 64], strides = [1, 1]} : vector<16x128xf32> to vector<16x64xf32>
    %64 = vector.extract_strided_slice %62 {offsets = [0, 64], sizes = [16, 64], strides = [1, 1]} : vector<16x128xf32> to vector<16x64xf32>
    %65 = tpu.concatenate %63, %64 in 0 : vector<16x64xf32>, vector<16x64xf32> -> vector<32x64xf32>
    %c0_10 = arith.constant 0 : index
    %c0_11 = arith.constant 0 : index
    %66 = vector.load %arg5[%c0_10, %c0_11] : memref<64x256xf32, #tpu.memory_space<vmem>>, vector<64x256xf32>
    %cst_12 = arith.constant dense<0.000000e+00> : vector<32x256xf32>
    %67 = tpu.matmul %65, %66, %cst_12 {dimension_numbers = #tpu.dot_dimension_numbers<[1], [0], [0], [1], [0, 0, 1, 1], [], []>} : vector<32x64xf32>, vector<64x256xf32>, vector<32x256xf32> -> vector<32x256xf32>
    %68 = vector.extract_strided_slice %67 {offsets = [0, 0], sizes = [16, 16], strides = [1, 1]} : vector<32x256xf32> to vector<16x16xf32>
    %69 = vector.extract_strided_slice %67 {offsets = [16, 0], sizes = [16, 16], strides = [1, 1]} : vector<32x256xf32> to vector<16x16xf32>
    %70 = tpu.concatenate %68, %69 in 1 : vector<16x16xf32>, vector<16x16xf32> -> vector<16x32xf32>
    %71 = vector.extract_strided_slice %67 {offsets = [0, 16], sizes = [16, 16], strides = [1, 1]} : vector<32x256xf32> to vector<16x16xf32>
    %72 = vector.extract_strided_slice %67 {offsets = [16, 16], sizes = [16, 16], strides = [1, 1]} : vector<32x256xf32> to vector<16x16xf32>
    %73 = tpu.concatenate %71, %72 in 1 : vector<16x16xf32>, vector<16x16xf32> -> vector<16x32xf32>
    %74 = vector.extract_strided_slice %67 {offsets = [0, 32], sizes = [16, 16], strides = [1, 1]} : vector<32x256xf32> to vector<16x16xf32>
    %75 = vector.extract_strided_slice %67 {offsets = [16, 32], sizes = [16, 16], strides = [1, 1]} : vector<32x256xf32> to vector<16x16xf32>
    %76 = tpu.concatenate %74, %75 in 1 : vector<16x16xf32>, vector<16x16xf32> -> vector<16x32xf32>
    %77 = vector.extract_strided_slice %67 {offsets = [0, 48], sizes = [16, 16], strides = [1, 1]} : vector<32x256xf32> to vector<16x16xf32>
    %78 = vector.extract_strided_slice %67 {offsets = [16, 48], sizes = [16, 16], strides = [1, 1]} : vector<32x256xf32> to vector<16x16xf32>
    %79 = tpu.concatenate %77, %78 in 1 : vector<16x16xf32>, vector<16x16xf32> -> vector<16x32xf32>
    %80 = vector.extract_strided_slice %67 {offsets = [0, 64], sizes = [16, 16], strides = [1, 1]} : vector<32x256xf32> to vector<16x16xf32>
    %81 = vector.extract_strided_slice %67 {offsets = [16, 64], sizes = [16, 16], strides = [1, 1]} : vector<32x256xf32> to vector<16x16xf32>
    %82 = tpu.concatenate %80, %81 in 1 : vector<16x16xf32>, vector<16x16xf32> -> vector<16x32xf32>
    %83 = vector.extract_strided_slice %67 {offsets = [0, 80], sizes = [16, 16], strides = [1, 1]} : vector<32x256xf32> to vector<16x16xf32>
    %84 = vector.extract_strided_slice %67 {offsets = [16, 80], sizes = [16, 16], strides = [1, 1]} : vector<32x256xf32> to vector<16x16xf32>
    %85 = tpu.concatenate %83, %84 in 1 : vector<16x16xf32>, vector<16x16xf32> -> vector<16x32xf32>
    %86 = vector.extract_strided_slice %67 {offsets = [0, 96], sizes = [16, 16], strides = [1, 1]} : vector<32x256xf32> to vector<16x16xf32>
    %87 = vector.extract_strided_slice %67 {offsets = [16, 96], sizes = [16, 16], strides = [1, 1]} : vector<32x256xf32> to vector<16x16xf32>
    %88 = tpu.concatenate %86, %87 in 1 : vector<16x16xf32>, vector<16x16xf32> -> vector<16x32xf32>
    %89 = vector.extract_strided_slice %67 {offsets = [0, 112], sizes = [16, 16], strides = [1, 1]} : vector<32x256xf32> to vector<16x16xf32>
    %90 = vector.extract_strided_slice %67 {offsets = [16, 112], sizes = [16, 16], strides = [1, 1]} : vector<32x256xf32> to vector<16x16xf32>
    %91 = tpu.concatenate %89, %90 in 1 : vector<16x16xf32>, vector<16x16xf32> -> vector<16x32xf32>
    %92 = vector.extract_strided_slice %67 {offsets = [0, 128], sizes = [16, 16], strides = [1, 1]} : vector<32x256xf32> to vector<16x16xf32>
    %93 = vector.extract_strided_slice %67 {offsets = [16, 128], sizes = [16, 16], strides = [1, 1]} : vector<32x256xf32> to vector<16x16xf32>
    %94 = tpu.concatenate %92, %93 in 1 : vector<16x16xf32>, vector<16x16xf32> -> vector<16x32xf32>
    %95 = vector.extract_strided_slice %67 {offsets = [0, 144], sizes = [16, 16], strides = [1, 1]} : vector<32x256xf32> to vector<16x16xf32>
    %96 = vector.extract_strided_slice %67 {offsets = [16, 144], sizes = [16, 16], strides = [1, 1]} : vector<32x256xf32> to vector<16x16xf32>
    %97 = tpu.concatenate %95, %96 in 1 : vector<16x16xf32>, vector<16x16xf32> -> vector<16x32xf32>
    %98 = vector.extract_strided_slice %67 {offsets = [0, 160], sizes = [16, 16], strides = [1, 1]} : vector<32x256xf32> to vector<16x16xf32>
    %99 = vector.extract_strided_slice %67 {offsets = [16, 160], sizes = [16, 16], strides = [1, 1]} : vector<32x256xf32> to vector<16x16xf32>
    %100 = tpu.concatenate %98, %99 in 1 : vector<16x16xf32>, vector<16x16xf32> -> vector<16x32xf32>
    %101 = vector.extract_strided_slice %67 {offsets = [0, 176], sizes = [16, 16], strides = [1, 1]} : vector<32x256xf32> to vector<16x16xf32>
    %102 = vector.extract_strided_slice %67 {offsets = [16, 176], sizes = [16, 16], strides = [1, 1]} : vector<32x256xf32> to vector<16x16xf32>
    %103 = tpu.concatenate %101, %102 in 1 : vector<16x16xf32>, vector<16x16xf32> -> vector<16x32xf32>
    %104 = vector.extract_strided_slice %67 {offsets = [0, 192], sizes = [16, 16], strides = [1, 1]} : vector<32x256xf32> to vector<16x16xf32>
    %105 = vector.extract_strided_slice %67 {offsets = [16, 192], sizes = [16, 16], strides = [1, 1]} : vector<32x256xf32> to vector<16x16xf32>
    %106 = tpu.concatenate %104, %105 in 1 : vector<16x16xf32>, vector<16x16xf32> -> vector<16x32xf32>
    %107 = vector.extract_strided_slice %67 {offsets = [0, 208], sizes = [16, 16], strides = [1, 1]} : vector<32x256xf32> to vector<16x16xf32>
    %108 = vector.extract_strided_slice %67 {offsets = [16, 208], sizes = [16, 16], strides = [1, 1]} : vector<32x256xf32> to vector<16x16xf32>
    %109 = tpu.concatenate %107, %108 in 1 : vector<16x16xf32>, vector<16x16xf32> -> vector<16x32xf32>
    %110 = vector.extract_strided_slice %67 {offsets = [0, 224], sizes = [16, 16], strides = [1, 1]} : vector<32x256xf32> to vector<16x16xf32>
    %111 = vector.extract_strided_slice %67 {offsets = [16, 224], sizes = [16, 16], strides = [1, 1]} : vector<32x256xf32> to vector<16x16xf32>
    %112 = tpu.concatenate %110, %111 in 1 : vector<16x16xf32>, vector<16x16xf32> -> vector<16x32xf32>
    %113 = vector.extract_strided_slice %67 {offsets = [0, 240], sizes = [16, 16], strides = [1, 1]} : vector<32x256xf32> to vector<16x16xf32>
    %114 = vector.extract_strided_slice %67 {offsets = [16, 240], sizes = [16, 16], strides = [1, 1]} : vector<32x256xf32> to vector<16x16xf32>
    %115 = tpu.concatenate %113, %114 in 1 : vector<16x16xf32>, vector<16x16xf32> -> vector<16x32xf32>
    %116 = tpu.concatenate %70, %73, %76, %79, %82, %85, %88, %91, %94, %97, %100, %103, %106, %109, %112, %115 in 0 : vector<16x32xf32>, vector<16x32xf32>, vector<16x32xf32>, vector<16x32xf32>, vector<16x32xf32>, vector<16x32xf32>, vector<16x32xf32>, vector<16x32xf32>, vector<16x32xf32>, vector<16x32xf32>, vector<16x32xf32>, vector<16x32xf32>, vector<16x32xf32>, vector<16x32xf32>, vector<16x32xf32>, vector<16x32xf32> -> vector<256x32xf32>
    %c0_13 = arith.constant 0 : index
    %c0_14 = arith.constant 0 : index
    %117 = vector.load %arg6[%c0_13, %c0_14] : memref<32x256xf32, #tpu.memory_space<vmem>>, vector<32x256xf32>
    %cst_15 = arith.constant dense<0.000000e+00> : vector<32x32xf32>
    %118 = tpu.matmul %117, %116, %cst_15 {dimension_numbers = #tpu.dot_dimension_numbers<[1], [0], [0], [1], [0, 0, 1, 1], [], []>} : vector<32x256xf32>, vector<256x32xf32>, vector<32x32xf32> -> vector<32x32xf32>
    %c0_16 = arith.constant 0 : index
    %c0_17 = arith.constant 0 : index
    %119 = vector.load %arg7[%c0_16, %c0_17] : memref<32x1xf32, #tpu.memory_space<vmem>>, vector<32x1xf32>
    %120 = vector.broadcast %119 : vector<32x1xf32> to vector<32x32xf32>
    %121 = arith.addf %118, %120 : vector<32x32xf32>
    %cst_18 = arith.constant 0.000000e+00 : f32
    %122 = vector.broadcast %cst_18 : f32 to vector<32x32xf32>
    %123 = arith.maximumf %121, %122 : vector<32x32xf32>
    %124 = vector.extract_strided_slice %123 {offsets = [0, 27], sizes = [32, 5], strides = [1, 1]} : vector<32x32xf32> to vector<32x5xf32>
    %125 = vector.extract_strided_slice %123 {offsets = [0, 0], sizes = [32, 27], strides = [1, 1]} : vector<32x32xf32> to vector<32x27xf32>
    %126 = tpu.concatenate %124, %125 in 1 : vector<32x5xf32>, vector<32x27xf32> -> vector<32x32xf32>
    %c0_19 = arith.constant 0 : index
    %c0_20 = arith.constant 0 : index
    %c0_21 = arith.constant 0 : index
    %127 = vector.load %arg8[%c0_19, %c0_20, %c0_21] : memref<9x1x32xf32, #tpu.memory_space<vmem>>, vector<1x1x32xf32>
    %128 = vector.shape_cast %127 : vector<1x1x32xf32> to vector<1x32xf32>
    %129 = vector.broadcast %128 : vector<1x32xf32> to vector<32x32xf32>
    %130 = arith.mulf %126, %129 : vector<32x32xf32>
    %131 = vector.extract_strided_slice %123 {offsets = [0, 28], sizes = [32, 4], strides = [1, 1]} : vector<32x32xf32> to vector<32x4xf32>
    %132 = vector.extract_strided_slice %123 {offsets = [0, 0], sizes = [32, 28], strides = [1, 1]} : vector<32x32xf32> to vector<32x28xf32>
    %133 = tpu.concatenate %131, %132 in 1 : vector<32x4xf32>, vector<32x28xf32> -> vector<32x32xf32>
    %c1 = arith.constant 1 : index
    %c0_22 = arith.constant 0 : index
    %c0_23 = arith.constant 0 : index
    %134 = vector.load %arg8[%c1, %c0_22, %c0_23] : memref<9x1x32xf32, #tpu.memory_space<vmem>>, vector<1x1x32xf32>
    %135 = vector.shape_cast %134 : vector<1x1x32xf32> to vector<1x32xf32>
    %136 = vector.broadcast %135 : vector<1x32xf32> to vector<32x32xf32>
    %137 = arith.mulf %133, %136 : vector<32x32xf32>
    %138 = vector.extract_strided_slice %123 {offsets = [0, 29], sizes = [32, 3], strides = [1, 1]} : vector<32x32xf32> to vector<32x3xf32>
    %139 = vector.extract_strided_slice %123 {offsets = [0, 0], sizes = [32, 29], strides = [1, 1]} : vector<32x32xf32> to vector<32x29xf32>
    %140 = tpu.concatenate %138, %139 in 1 : vector<32x3xf32>, vector<32x29xf32> -> vector<32x32xf32>
    %c2 = arith.constant 2 : index
    %c0_24 = arith.constant 0 : index
    %c0_25 = arith.constant 0 : index
    %141 = vector.load %arg8[%c2, %c0_24, %c0_25] : memref<9x1x32xf32, #tpu.memory_space<vmem>>, vector<1x1x32xf32>
    %142 = vector.shape_cast %141 : vector<1x1x32xf32> to vector<1x32xf32>
    %143 = vector.broadcast %142 : vector<1x32xf32> to vector<32x32xf32>
    %144 = arith.mulf %140, %143 : vector<32x32xf32>
    %145 = vector.extract_strided_slice %123 {offsets = [0, 31], sizes = [32, 1], strides = [1, 1]} : vector<32x32xf32> to vector<32x1xf32>
    %146 = vector.extract_strided_slice %123 {offsets = [0, 0], sizes = [32, 31], strides = [1, 1]} : vector<32x32xf32> to vector<32x31xf32>
    %147 = tpu.concatenate %145, %146 in 1 : vector<32x1xf32>, vector<32x31xf32> -> vector<32x32xf32>
    %c3 = arith.constant 3 : index
    %c0_26 = arith.constant 0 : index
    %c0_27 = arith.constant 0 : index
    %148 = vector.load %arg8[%c3, %c0_26, %c0_27] : memref<9x1x32xf32, #tpu.memory_space<vmem>>, vector<1x1x32xf32>
    %149 = vector.shape_cast %148 : vector<1x1x32xf32> to vector<1x32xf32>
    %150 = vector.broadcast %149 : vector<1x32xf32> to vector<32x32xf32>
    %151 = arith.mulf %147, %150 : vector<32x32xf32>
    %c4 = arith.constant 4 : index
    %c0_28 = arith.constant 0 : index
    %c0_29 = arith.constant 0 : index
    %152 = vector.load %arg8[%c4, %c0_28, %c0_29] : memref<9x1x32xf32, #tpu.memory_space<vmem>>, vector<1x1x32xf32>
    %153 = vector.shape_cast %152 : vector<1x1x32xf32> to vector<1x32xf32>
    %154 = vector.broadcast %153 : vector<1x32xf32> to vector<32x32xf32>
    %155 = arith.mulf %123, %154 : vector<32x32xf32>
    %156 = vector.extract_strided_slice %123 {offsets = [0, 1], sizes = [32, 31], strides = [1, 1]} : vector<32x32xf32> to vector<32x31xf32>
    %157 = vector.extract_strided_slice %123 {offsets = [0, 0], sizes = [32, 1], strides = [1, 1]} : vector<32x32xf32> to vector<32x1xf32>
    %158 = tpu.concatenate %156, %157 in 1 : vector<32x31xf32>, vector<32x1xf32> -> vector<32x32xf32>
    %c5 = arith.constant 5 : index
    %c0_30 = arith.constant 0 : index
    %c0_31 = arith.constant 0 : index
    %159 = vector.load %arg8[%c5, %c0_30, %c0_31] : memref<9x1x32xf32, #tpu.memory_space<vmem>>, vector<1x1x32xf32>
    %160 = vector.shape_cast %159 : vector<1x1x32xf32> to vector<1x32xf32>
    %161 = vector.broadcast %160 : vector<1x32xf32> to vector<32x32xf32>
    %162 = arith.mulf %158, %161 : vector<32x32xf32>
    %163 = vector.extract_strided_slice %123 {offsets = [0, 3], sizes = [32, 29], strides = [1, 1]} : vector<32x32xf32> to vector<32x29xf32>
    %164 = vector.extract_strided_slice %123 {offsets = [0, 0], sizes = [32, 3], strides = [1, 1]} : vector<32x32xf32> to vector<32x3xf32>
    %165 = tpu.concatenate %163, %164 in 1 : vector<32x29xf32>, vector<32x3xf32> -> vector<32x32xf32>
    %c6 = arith.constant 6 : index
    %c0_32 = arith.constant 0 : index
    %c0_33 = arith.constant 0 : index
    %166 = vector.load %arg8[%c6, %c0_32, %c0_33] : memref<9x1x32xf32, #tpu.memory_space<vmem>>, vector<1x1x32xf32>
    %167 = vector.shape_cast %166 : vector<1x1x32xf32> to vector<1x32xf32>
    %168 = vector.broadcast %167 : vector<1x32xf32> to vector<32x32xf32>
    %169 = arith.mulf %165, %168 : vector<32x32xf32>
    %170 = vector.extract_strided_slice %123 {offsets = [0, 4], sizes = [32, 28], strides = [1, 1]} : vector<32x32xf32> to vector<32x28xf32>
    %171 = vector.extract_strided_slice %123 {offsets = [0, 0], sizes = [32, 4], strides = [1, 1]} : vector<32x32xf32> to vector<32x4xf32>
    %172 = tpu.concatenate %170, %171 in 1 : vector<32x28xf32>, vector<32x4xf32> -> vector<32x32xf32>
    %c7 = arith.constant 7 : index
    %c0_34 = arith.constant 0 : index
    %c0_35 = arith.constant 0 : index
    %173 = vector.load %arg8[%c7, %c0_34, %c0_35] : memref<9x1x32xf32, #tpu.memory_space<vmem>>, vector<1x1x32xf32>
    %174 = vector.shape_cast %173 : vector<1x1x32xf32> to vector<1x32xf32>
    %175 = vector.broadcast %174 : vector<1x32xf32> to vector<32x32xf32>
    %176 = arith.mulf %172, %175 : vector<32x32xf32>
    %177 = vector.extract_strided_slice %123 {offsets = [0, 5], sizes = [32, 27], strides = [1, 1]} : vector<32x32xf32> to vector<32x27xf32>
    %178 = vector.extract_strided_slice %123 {offsets = [0, 0], sizes = [32, 5], strides = [1, 1]} : vector<32x32xf32> to vector<32x5xf32>
    %179 = tpu.concatenate %177, %178 in 1 : vector<32x27xf32>, vector<32x5xf32> -> vector<32x32xf32>
    %c8 = arith.constant 8 : index
    %c0_36 = arith.constant 0 : index
    %c0_37 = arith.constant 0 : index
    %180 = vector.load %arg8[%c8, %c0_36, %c0_37] : memref<9x1x32xf32, #tpu.memory_space<vmem>>, vector<1x1x32xf32>
    %181 = vector.shape_cast %180 : vector<1x1x32xf32> to vector<1x32xf32>
    %182 = vector.broadcast %181 : vector<1x32xf32> to vector<32x32xf32>
    %183 = arith.mulf %179, %182 : vector<32x32xf32>
    %184 = tpu.concatenate %130, %137, %144, %151, %155, %162, %169, %176, %183 in 0 : vector<32x32xf32>, vector<32x32xf32>, vector<32x32xf32>, vector<32x32xf32>, vector<32x32xf32>, vector<32x32xf32>, vector<32x32xf32>, vector<32x32xf32>, vector<32x32xf32> -> vector<288x32xf32>
    %c0_38 = arith.constant 0 : index
    %c0_39 = arith.constant 0 : index
    %185 = vector.load %arg9[%c0_38, %c0_39] : memref<32x288xf32, #tpu.memory_space<vmem>>, vector<32x288xf32>
    %cst_40 = arith.constant dense<0.000000e+00> : vector<32x32xf32>
    %186 = tpu.matmul %185, %184, %cst_40 {dimension_numbers = #tpu.dot_dimension_numbers<[1], [0], [0], [1], [0, 0, 1, 1], [], []>} : vector<32x288xf32>, vector<288x32xf32>, vector<32x32xf32> -> vector<32x32xf32>
    %c0_41 = arith.constant 0 : index
    %c0_42 = arith.constant 0 : index
    %187 = vector.load %arg10[%c0_41, %c0_42] : memref<32x1xf32, #tpu.memory_space<vmem>>, vector<32x1xf32>
    %188 = vector.broadcast %187 : vector<32x1xf32> to vector<32x32xf32>
    %189 = arith.addf %186, %188 : vector<32x32xf32>
    %190 = vector.extract_strided_slice %189 {offsets = [0, 0], sizes = [32, 16], strides = [1, 1]} : vector<32x32xf32> to vector<32x16xf32>
    %191 = vector.extract_strided_slice %189 {offsets = [0, 16], sizes = [32, 16], strides = [1, 1]} : vector<32x32xf32> to vector<32x16xf32>
    %192 = tpu.concatenate %190, %191 in 0 : vector<32x16xf32>, vector<32x16xf32> -> vector<64x16xf32>
    %c0_43 = arith.constant 0 : index
    %c0_44 = arith.constant 0 : index
    %193 = vector.load %arg11[%c0_43, %c0_44] : memref<16x64xf32, #tpu.memory_space<vmem>>, vector<16x64xf32>
    %cst_45 = arith.constant dense<0.000000e+00> : vector<64x64xf32>
    %194 = tpu.matmul %192, %193, %cst_45 {dimension_numbers = #tpu.dot_dimension_numbers<[1], [0], [0], [1], [0, 0, 1, 1], [], []>} : vector<64x16xf32>, vector<16x64xf32>, vector<64x64xf32> -> vector<64x64xf32>
    %195 = vector.extract_strided_slice %194 {offsets = [0, 0], sizes = [32, 4], strides = [1, 1]} : vector<64x64xf32> to vector<32x4xf32>
    %196 = vector.extract_strided_slice %194 {offsets = [32, 0], sizes = [32, 4], strides = [1, 1]} : vector<64x64xf32> to vector<32x4xf32>
    %197 = tpu.concatenate %195, %196 in 1 : vector<32x4xf32>, vector<32x4xf32> -> vector<32x8xf32>
    %198 = vector.extract_strided_slice %194 {offsets = [0, 4], sizes = [32, 4], strides = [1, 1]} : vector<64x64xf32> to vector<32x4xf32>
    %199 = vector.extract_strided_slice %194 {offsets = [32, 4], sizes = [32, 4], strides = [1, 1]} : vector<64x64xf32> to vector<32x4xf32>
    %200 = tpu.concatenate %198, %199 in 1 : vector<32x4xf32>, vector<32x4xf32> -> vector<32x8xf32>
    %201 = vector.extract_strided_slice %194 {offsets = [0, 8], sizes = [32, 4], strides = [1, 1]} : vector<64x64xf32> to vector<32x4xf32>
    %202 = vector.extract_strided_slice %194 {offsets = [32, 8], sizes = [32, 4], strides = [1, 1]} : vector<64x64xf32> to vector<32x4xf32>
    %203 = tpu.concatenate %201, %202 in 1 : vector<32x4xf32>, vector<32x4xf32> -> vector<32x8xf32>
    %204 = vector.extract_strided_slice %194 {offsets = [0, 12], sizes = [32, 4], strides = [1, 1]} : vector<64x64xf32> to vector<32x4xf32>
    %205 = vector.extract_strided_slice %194 {offsets = [32, 12], sizes = [32, 4], strides = [1, 1]} : vector<64x64xf32> to vector<32x4xf32>
    %206 = tpu.concatenate %204, %205 in 1 : vector<32x4xf32>, vector<32x4xf32> -> vector<32x8xf32>
    %207 = vector.extract_strided_slice %194 {offsets = [0, 16], sizes = [32, 4], strides = [1, 1]} : vector<64x64xf32> to vector<32x4xf32>
    %208 = vector.extract_strided_slice %194 {offsets = [32, 16], sizes = [32, 4], strides = [1, 1]} : vector<64x64xf32> to vector<32x4xf32>
    %209 = tpu.concatenate %207, %208 in 1 : vector<32x4xf32>, vector<32x4xf32> -> vector<32x8xf32>
    %210 = vector.extract_strided_slice %194 {offsets = [0, 20], sizes = [32, 4], strides = [1, 1]} : vector<64x64xf32> to vector<32x4xf32>
    %211 = vector.extract_strided_slice %194 {offsets = [32, 20], sizes = [32, 4], strides = [1, 1]} : vector<64x64xf32> to vector<32x4xf32>
    %212 = tpu.concatenate %210, %211 in 1 : vector<32x4xf32>, vector<32x4xf32> -> vector<32x8xf32>
    %213 = vector.extract_strided_slice %194 {offsets = [0, 24], sizes = [32, 4], strides = [1, 1]} : vector<64x64xf32> to vector<32x4xf32>
    %214 = vector.extract_strided_slice %194 {offsets = [32, 24], sizes = [32, 4], strides = [1, 1]} : vector<64x64xf32> to vector<32x4xf32>
    %215 = tpu.concatenate %213, %214 in 1 : vector<32x4xf32>, vector<32x4xf32> -> vector<32x8xf32>
    %216 = vector.extract_strided_slice %194 {offsets = [0, 28], sizes = [32, 4], strides = [1, 1]} : vector<64x64xf32> to vector<32x4xf32>
    %217 = vector.extract_strided_slice %194 {offsets = [32, 28], sizes = [32, 4], strides = [1, 1]} : vector<64x64xf32> to vector<32x4xf32>
    %218 = tpu.concatenate %216, %217 in 1 : vector<32x4xf32>, vector<32x4xf32> -> vector<32x8xf32>
    %219 = vector.extract_strided_slice %194 {offsets = [0, 32], sizes = [32, 4], strides = [1, 1]} : vector<64x64xf32> to vector<32x4xf32>
    %220 = vector.extract_strided_slice %194 {offsets = [32, 32], sizes = [32, 4], strides = [1, 1]} : vector<64x64xf32> to vector<32x4xf32>
    %221 = tpu.concatenate %219, %220 in 1 : vector<32x4xf32>, vector<32x4xf32> -> vector<32x8xf32>
    %222 = vector.extract_strided_slice %194 {offsets = [0, 36], sizes = [32, 4], strides = [1, 1]} : vector<64x64xf32> to vector<32x4xf32>
    %223 = vector.extract_strided_slice %194 {offsets = [32, 36], sizes = [32, 4], strides = [1, 1]} : vector<64x64xf32> to vector<32x4xf32>
    %224 = tpu.concatenate %222, %223 in 1 : vector<32x4xf32>, vector<32x4xf32> -> vector<32x8xf32>
    %225 = vector.extract_strided_slice %194 {offsets = [0, 40], sizes = [32, 4], strides = [1, 1]} : vector<64x64xf32> to vector<32x4xf32>
    %226 = vector.extract_strided_slice %194 {offsets = [32, 40], sizes = [32, 4], strides = [1, 1]} : vector<64x64xf32> to vector<32x4xf32>
    %227 = tpu.concatenate %225, %226 in 1 : vector<32x4xf32>, vector<32x4xf32> -> vector<32x8xf32>
    %228 = vector.extract_strided_slice %194 {offsets = [0, 44], sizes = [32, 4], strides = [1, 1]} : vector<64x64xf32> to vector<32x4xf32>
    %229 = vector.extract_strided_slice %194 {offsets = [32, 44], sizes = [32, 4], strides = [1, 1]} : vector<64x64xf32> to vector<32x4xf32>
    %230 = tpu.concatenate %228, %229 in 1 : vector<32x4xf32>, vector<32x4xf32> -> vector<32x8xf32>
    %231 = vector.extract_strided_slice %194 {offsets = [0, 48], sizes = [32, 4], strides = [1, 1]} : vector<64x64xf32> to vector<32x4xf32>
    %232 = vector.extract_strided_slice %194 {offsets = [32, 48], sizes = [32, 4], strides = [1, 1]} : vector<64x64xf32> to vector<32x4xf32>
    %233 = tpu.concatenate %231, %232 in 1 : vector<32x4xf32>, vector<32x4xf32> -> vector<32x8xf32>
    %234 = vector.extract_strided_slice %194 {offsets = [0, 52], sizes = [32, 4], strides = [1, 1]} : vector<64x64xf32> to vector<32x4xf32>
    %235 = vector.extract_strided_slice %194 {offsets = [32, 52], sizes = [32, 4], strides = [1, 1]} : vector<64x64xf32> to vector<32x4xf32>
    %236 = tpu.concatenate %234, %235 in 1 : vector<32x4xf32>, vector<32x4xf32> -> vector<32x8xf32>
    %237 = vector.extract_strided_slice %194 {offsets = [0, 56], sizes = [32, 4], strides = [1, 1]} : vector<64x64xf32> to vector<32x4xf32>
    %238 = vector.extract_strided_slice %194 {offsets = [32, 56], sizes = [32, 4], strides = [1, 1]} : vector<64x64xf32> to vector<32x4xf32>
    %239 = tpu.concatenate %237, %238 in 1 : vector<32x4xf32>, vector<32x4xf32> -> vector<32x8xf32>
    %240 = vector.extract_strided_slice %194 {offsets = [0, 60], sizes = [32, 4], strides = [1, 1]} : vector<64x64xf32> to vector<32x4xf32>
    %241 = vector.extract_strided_slice %194 {offsets = [32, 60], sizes = [32, 4], strides = [1, 1]} : vector<64x64xf32> to vector<32x4xf32>
    %242 = tpu.concatenate %240, %241 in 1 : vector<32x4xf32>, vector<32x4xf32> -> vector<32x8xf32>
    %243 = tpu.concatenate %197, %200, %203, %206, %209, %212, %215, %218, %221, %224, %227, %230, %233, %236, %239, %242 in 0 : vector<32x8xf32>, vector<32x8xf32>, vector<32x8xf32>, vector<32x8xf32>, vector<32x8xf32>, vector<32x8xf32>, vector<32x8xf32>, vector<32x8xf32>, vector<32x8xf32>, vector<32x8xf32>, vector<32x8xf32>, vector<32x8xf32>, vector<32x8xf32>, vector<32x8xf32>, vector<32x8xf32>, vector<32x8xf32> -> vector<512x8xf32>
    %c0_46 = arith.constant 0 : index
    %c0_47 = arith.constant 0 : index
    %244 = vector.load %arg12[%c0_46, %c0_47] : memref<32x512xf32, #tpu.memory_space<vmem>>, vector<32x512xf32>
    %cst_48 = arith.constant dense<0.000000e+00> : vector<32x8xf32>
    %245 = tpu.matmul %244, %243, %cst_48 {dimension_numbers = #tpu.dot_dimension_numbers<[1], [0], [0], [1], [0, 0, 1, 1], [], []>} : vector<32x512xf32>, vector<512x8xf32>, vector<32x8xf32> -> vector<32x8xf32>
    %c0_49 = arith.constant 0 : index
    %c0_50 = arith.constant 0 : index
    %246 = vector.load %arg13[%c0_49, %c0_50] : memref<32x1xf32, #tpu.memory_space<vmem>>, vector<32x1xf32>
    %247 = vector.broadcast %246 : vector<32x1xf32> to vector<32x8xf32>
    %248 = arith.addf %245, %247 : vector<32x8xf32>
    %cst_51 = arith.constant 0.000000e+00 : f32
    %249 = vector.broadcast %cst_51 : f32 to vector<32x8xf32>
    %250 = arith.maximumf %248, %249 : vector<32x8xf32>
    %251 = vector.extract_strided_slice %250 {offsets = [0, 5], sizes = [32, 3], strides = [1, 1]} : vector<32x8xf32> to vector<32x3xf32>
    %252 = vector.extract_strided_slice %250 {offsets = [0, 0], sizes = [32, 5], strides = [1, 1]} : vector<32x8xf32> to vector<32x5xf32>
    %253 = tpu.concatenate %251, %252 in 1 : vector<32x3xf32>, vector<32x5xf32> -> vector<32x8xf32>
    %c0_52 = arith.constant 0 : index
    %c0_53 = arith.constant 0 : index
    %c0_54 = arith.constant 0 : index
    %254 = vector.load %arg14[%c0_52, %c0_53, %c0_54] : memref<9x1x8xf32, #tpu.memory_space<vmem>>, vector<1x1x8xf32>
    %255 = vector.shape_cast %254 : vector<1x1x8xf32> to vector<1x8xf32>
    %256 = vector.broadcast %255 : vector<1x8xf32> to vector<32x8xf32>
    %257 = arith.mulf %253, %256 : vector<32x8xf32>
    %258 = vector.extract_strided_slice %250 {offsets = [0, 6], sizes = [32, 2], strides = [1, 1]} : vector<32x8xf32> to vector<32x2xf32>
    %259 = vector.extract_strided_slice %250 {offsets = [0, 0], sizes = [32, 6], strides = [1, 1]} : vector<32x8xf32> to vector<32x6xf32>
    %260 = tpu.concatenate %258, %259 in 1 : vector<32x2xf32>, vector<32x6xf32> -> vector<32x8xf32>
    %c1_55 = arith.constant 1 : index
    %c0_56 = arith.constant 0 : index
    %c0_57 = arith.constant 0 : index
    %261 = vector.load %arg14[%c1_55, %c0_56, %c0_57] : memref<9x1x8xf32, #tpu.memory_space<vmem>>, vector<1x1x8xf32>
    %262 = vector.shape_cast %261 : vector<1x1x8xf32> to vector<1x8xf32>
    %263 = vector.broadcast %262 : vector<1x8xf32> to vector<32x8xf32>
    %264 = arith.mulf %260, %263 : vector<32x8xf32>
    %265 = vector.extract_strided_slice %250 {offsets = [0, 7], sizes = [32, 1], strides = [1, 1]} : vector<32x8xf32> to vector<32x1xf32>
    %266 = vector.extract_strided_slice %250 {offsets = [0, 0], sizes = [32, 7], strides = [1, 1]} : vector<32x8xf32> to vector<32x7xf32>
    %267 = tpu.concatenate %265, %266 in 1 : vector<32x1xf32>, vector<32x7xf32> -> vector<32x8xf32>
    %c2_58 = arith.constant 2 : index
    %c0_59 = arith.constant 0 : index
    %c0_60 = arith.constant 0 : index
    %268 = vector.load %arg14[%c2_58, %c0_59, %c0_60] : memref<9x1x8xf32, #tpu.memory_space<vmem>>, vector<1x1x8xf32>
    %269 = vector.shape_cast %268 : vector<1x1x8xf32> to vector<1x8xf32>
    %270 = vector.broadcast %269 : vector<1x8xf32> to vector<32x8xf32>
    %271 = arith.mulf %267, %270 : vector<32x8xf32>
    %272 = vector.extract_strided_slice %250 {offsets = [0, 7], sizes = [32, 1], strides = [1, 1]} : vector<32x8xf32> to vector<32x1xf32>
    %273 = vector.extract_strided_slice %250 {offsets = [0, 0], sizes = [32, 7], strides = [1, 1]} : vector<32x8xf32> to vector<32x7xf32>
    %274 = tpu.concatenate %272, %273 in 1 : vector<32x1xf32>, vector<32x7xf32> -> vector<32x8xf32>
    %c3_61 = arith.constant 3 : index
    %c0_62 = arith.constant 0 : index
    %c0_63 = arith.constant 0 : index
    %275 = vector.load %arg14[%c3_61, %c0_62, %c0_63] : memref<9x1x8xf32, #tpu.memory_space<vmem>>, vector<1x1x8xf32>
    %276 = vector.shape_cast %275 : vector<1x1x8xf32> to vector<1x8xf32>
    %277 = vector.broadcast %276 : vector<1x8xf32> to vector<32x8xf32>
    %278 = arith.mulf %274, %277 : vector<32x8xf32>
    %c4_64 = arith.constant 4 : index
    %c0_65 = arith.constant 0 : index
    %c0_66 = arith.constant 0 : index
    %279 = vector.load %arg14[%c4_64, %c0_65, %c0_66] : memref<9x1x8xf32, #tpu.memory_space<vmem>>, vector<1x1x8xf32>
    %280 = vector.shape_cast %279 : vector<1x1x8xf32> to vector<1x8xf32>
    %281 = vector.broadcast %280 : vector<1x8xf32> to vector<32x8xf32>
    %282 = arith.mulf %250, %281 : vector<32x8xf32>
    %283 = vector.extract_strided_slice %250 {offsets = [0, 1], sizes = [32, 7], strides = [1, 1]} : vector<32x8xf32> to vector<32x7xf32>
    %284 = vector.extract_strided_slice %250 {offsets = [0, 0], sizes = [32, 1], strides = [1, 1]} : vector<32x8xf32> to vector<32x1xf32>
    %285 = tpu.concatenate %283, %284 in 1 : vector<32x7xf32>, vector<32x1xf32> -> vector<32x8xf32>
    %c5_67 = arith.constant 5 : index
    %c0_68 = arith.constant 0 : index
    %c0_69 = arith.constant 0 : index
    %286 = vector.load %arg14[%c5_67, %c0_68, %c0_69] : memref<9x1x8xf32, #tpu.memory_space<vmem>>, vector<1x1x8xf32>
    %287 = vector.shape_cast %286 : vector<1x1x8xf32> to vector<1x8xf32>
    %288 = vector.broadcast %287 : vector<1x8xf32> to vector<32x8xf32>
    %289 = arith.mulf %285, %288 : vector<32x8xf32>
    %290 = vector.extract_strided_slice %250 {offsets = [0, 1], sizes = [32, 7], strides = [1, 1]} : vector<32x8xf32> to vector<32x7xf32>
    %291 = vector.extract_strided_slice %250 {offsets = [0, 0], sizes = [32, 1], strides = [1, 1]} : vector<32x8xf32> to vector<32x1xf32>
    %292 = tpu.concatenate %290, %291 in 1 : vector<32x7xf32>, vector<32x1xf32> -> vector<32x8xf32>
    %c6_70 = arith.constant 6 : index
    %c0_71 = arith.constant 0 : index
    %c0_72 = arith.constant 0 : index
    %293 = vector.load %arg14[%c6_70, %c0_71, %c0_72] : memref<9x1x8xf32, #tpu.memory_space<vmem>>, vector<1x1x8xf32>
    %294 = vector.shape_cast %293 : vector<1x1x8xf32> to vector<1x8xf32>
    %295 = vector.broadcast %294 : vector<1x8xf32> to vector<32x8xf32>
    %296 = arith.mulf %292, %295 : vector<32x8xf32>
    %297 = vector.extract_strided_slice %250 {offsets = [0, 2], sizes = [32, 6], strides = [1, 1]} : vector<32x8xf32> to vector<32x6xf32>
    %298 = vector.extract_strided_slice %250 {offsets = [0, 0], sizes = [32, 2], strides = [1, 1]} : vector<32x8xf32> to vector<32x2xf32>
    %299 = tpu.concatenate %297, %298 in 1 : vector<32x6xf32>, vector<32x2xf32> -> vector<32x8xf32>
    %c7_73 = arith.constant 7 : index
    %c0_74 = arith.constant 0 : index
    %c0_75 = arith.constant 0 : index
    %300 = vector.load %arg14[%c7_73, %c0_74, %c0_75] : memref<9x1x8xf32, #tpu.memory_space<vmem>>, vector<1x1x8xf32>
    %301 = vector.shape_cast %300 : vector<1x1x8xf32> to vector<1x8xf32>
    %302 = vector.broadcast %301 : vector<1x8xf32> to vector<32x8xf32>
    %303 = arith.mulf %299, %302 : vector<32x8xf32>
    %304 = vector.extract_strided_slice %250 {offsets = [0, 3], sizes = [32, 5], strides = [1, 1]} : vector<32x8xf32> to vector<32x5xf32>
    %305 = vector.extract_strided_slice %250 {offsets = [0, 0], sizes = [32, 3], strides = [1, 1]} : vector<32x8xf32> to vector<32x3xf32>
    %306 = tpu.concatenate %304, %305 in 1 : vector<32x5xf32>, vector<32x3xf32> -> vector<32x8xf32>
    %c8_76 = arith.constant 8 : index
    %c0_77 = arith.constant 0 : index
    %c0_78 = arith.constant 0 : index
    %307 = vector.load %arg14[%c8_76, %c0_77, %c0_78] : memref<9x1x8xf32, #tpu.memory_space<vmem>>, vector<1x1x8xf32>
    %308 = vector.shape_cast %307 : vector<1x1x8xf32> to vector<1x8xf32>
    %309 = vector.broadcast %308 : vector<1x8xf32> to vector<32x8xf32>
    %310 = arith.mulf %306, %309 : vector<32x8xf32>
    %311 = tpu.concatenate %257, %264, %271, %278, %282, %289, %296, %303, %310 in 0 : vector<32x8xf32>, vector<32x8xf32>, vector<32x8xf32>, vector<32x8xf32>, vector<32x8xf32>, vector<32x8xf32>, vector<32x8xf32>, vector<32x8xf32>, vector<32x8xf32> -> vector<288x8xf32>
    %c0_79 = arith.constant 0 : index
    %c0_80 = arith.constant 0 : index
    %312 = vector.load %arg15[%c0_79, %c0_80] : memref<8x288xf32, #tpu.memory_space<vmem>>, vector<8x288xf32>
    %cst_81 = arith.constant dense<0.000000e+00> : vector<8x8xf32>
    %313 = tpu.matmul %312, %311, %cst_81 {dimension_numbers = #tpu.dot_dimension_numbers<[1], [0], [0], [1], [0, 0, 1, 1], [], []>} : vector<8x288xf32>, vector<288x8xf32>, vector<8x8xf32> -> vector<8x8xf32>
    %c0_82 = arith.constant 0 : index
    %c0_83 = arith.constant 0 : index
    %314 = vector.load %arg16[%c0_82, %c0_83] : memref<8x1xf32, #tpu.memory_space<vmem>>, vector<8x1xf32>
    %315 = vector.broadcast %314 : vector<8x1xf32> to vector<8x8xf32>
    %316 = arith.addf %313, %315 : vector<8x8xf32>
    %cst_84 = arith.constant 0.000000e+00 : f32
    %317 = vector.broadcast %cst_84 : f32 to vector<8x8xf32>
    %318 = arith.maximumf %316, %317 : vector<8x8xf32>
    %c0_85 = arith.constant 0 : index
    %c0_86 = arith.constant 0 : index
    %319 = vector.load %arg17[%c0_85, %c0_86] : memref<32x8xf32, #tpu.memory_space<vmem>>, vector<32x8xf32>
    %cst_87 = arith.constant dense<0.000000e+00> : vector<32x8xf32>
    %320 = tpu.matmul %319, %318, %cst_87 {dimension_numbers = #tpu.dot_dimension_numbers<[1], [0], [0], [1], [0, 0, 1, 1], [], []>} : vector<32x8xf32>, vector<8x8xf32>, vector<32x8xf32> -> vector<32x8xf32>
    %c0_88 = arith.constant 0 : index
    %c0_89 = arith.constant 0 : index
    %321 = vector.load %arg18[%c0_88, %c0_89] : memref<32x1xf32, #tpu.memory_space<vmem>>, vector<32x1xf32>
    %322 = vector.broadcast %321 : vector<32x1xf32> to vector<32x8xf32>
    %323 = arith.addf %320, %322 : vector<32x8xf32>
    %324 = arith.addf %323, %248 : vector<32x8xf32>
    %cst_90 = arith.constant 0.000000e+00 : f32
    %325 = vector.broadcast %cst_90 : f32 to vector<32x8xf32>
    %326 = arith.maximumf %324, %325 : vector<32x8xf32>
    %327 = vector.extract_strided_slice %326 {offsets = [0, 5], sizes = [32, 3], strides = [1, 1]} : vector<32x8xf32> to vector<32x3xf32>
    %328 = vector.extract_strided_slice %326 {offsets = [0, 0], sizes = [32, 5], strides = [1, 1]} : vector<32x8xf32> to vector<32x5xf32>
    %329 = tpu.concatenate %327, %328 in 1 : vector<32x3xf32>, vector<32x5xf32> -> vector<32x8xf32>
    %c0_91 = arith.constant 0 : index
    %c0_92 = arith.constant 0 : index
    %c0_93 = arith.constant 0 : index
    %330 = vector.load %arg19[%c0_91, %c0_92, %c0_93] : memref<9x1x8xf32, #tpu.memory_space<vmem>>, vector<1x1x8xf32>
    %331 = vector.shape_cast %330 : vector<1x1x8xf32> to vector<1x8xf32>
    %332 = vector.broadcast %331 : vector<1x8xf32> to vector<32x8xf32>
    %333 = arith.mulf %329, %332 : vector<32x8xf32>
    %334 = vector.extract_strided_slice %326 {offsets = [0, 6], sizes = [32, 2], strides = [1, 1]} : vector<32x8xf32> to vector<32x2xf32>
    %335 = vector.extract_strided_slice %326 {offsets = [0, 0], sizes = [32, 6], strides = [1, 1]} : vector<32x8xf32> to vector<32x6xf32>
    %336 = tpu.concatenate %334, %335 in 1 : vector<32x2xf32>, vector<32x6xf32> -> vector<32x8xf32>
    %c1_94 = arith.constant 1 : index
    %c0_95 = arith.constant 0 : index
    %c0_96 = arith.constant 0 : index
    %337 = vector.load %arg19[%c1_94, %c0_95, %c0_96] : memref<9x1x8xf32, #tpu.memory_space<vmem>>, vector<1x1x8xf32>
    %338 = vector.shape_cast %337 : vector<1x1x8xf32> to vector<1x8xf32>
    %339 = vector.broadcast %338 : vector<1x8xf32> to vector<32x8xf32>
    %340 = arith.mulf %336, %339 : vector<32x8xf32>
    %341 = vector.extract_strided_slice %326 {offsets = [0, 7], sizes = [32, 1], strides = [1, 1]} : vector<32x8xf32> to vector<32x1xf32>
    %342 = vector.extract_strided_slice %326 {offsets = [0, 0], sizes = [32, 7], strides = [1, 1]} : vector<32x8xf32> to vector<32x7xf32>
    %343 = tpu.concatenate %341, %342 in 1 : vector<32x1xf32>, vector<32x7xf32> -> vector<32x8xf32>
    %c2_97 = arith.constant 2 : index
    %c0_98 = arith.constant 0 : index
    %c0_99 = arith.constant 0 : index
    %344 = vector.load %arg19[%c2_97, %c0_98, %c0_99] : memref<9x1x8xf32, #tpu.memory_space<vmem>>, vector<1x1x8xf32>
    %345 = vector.shape_cast %344 : vector<1x1x8xf32> to vector<1x8xf32>
    %346 = vector.broadcast %345 : vector<1x8xf32> to vector<32x8xf32>
    %347 = arith.mulf %343, %346 : vector<32x8xf32>
    %348 = vector.extract_strided_slice %326 {offsets = [0, 7], sizes = [32, 1], strides = [1, 1]} : vector<32x8xf32> to vector<32x1xf32>
    %349 = vector.extract_strided_slice %326 {offsets = [0, 0], sizes = [32, 7], strides = [1, 1]} : vector<32x8xf32> to vector<32x7xf32>
    %350 = tpu.concatenate %348, %349 in 1 : vector<32x1xf32>, vector<32x7xf32> -> vector<32x8xf32>
    %c3_100 = arith.constant 3 : index
    %c0_101 = arith.constant 0 : index
    %c0_102 = arith.constant 0 : index
    %351 = vector.load %arg19[%c3_100, %c0_101, %c0_102] : memref<9x1x8xf32, #tpu.memory_space<vmem>>, vector<1x1x8xf32>
    %352 = vector.shape_cast %351 : vector<1x1x8xf32> to vector<1x8xf32>
    %353 = vector.broadcast %352 : vector<1x8xf32> to vector<32x8xf32>
    %354 = arith.mulf %350, %353 : vector<32x8xf32>
    %c4_103 = arith.constant 4 : index
    %c0_104 = arith.constant 0 : index
    %c0_105 = arith.constant 0 : index
    %355 = vector.load %arg19[%c4_103, %c0_104, %c0_105] : memref<9x1x8xf32, #tpu.memory_space<vmem>>, vector<1x1x8xf32>
    %356 = vector.shape_cast %355 : vector<1x1x8xf32> to vector<1x8xf32>
    %357 = vector.broadcast %356 : vector<1x8xf32> to vector<32x8xf32>
    %358 = arith.mulf %326, %357 : vector<32x8xf32>
    %359 = vector.extract_strided_slice %326 {offsets = [0, 1], sizes = [32, 7], strides = [1, 1]} : vector<32x8xf32> to vector<32x7xf32>
    %360 = vector.extract_strided_slice %326 {offsets = [0, 0], sizes = [32, 1], strides = [1, 1]} : vector<32x8xf32> to vector<32x1xf32>
    %361 = tpu.concatenate %359, %360 in 1 : vector<32x7xf32>, vector<32x1xf32> -> vector<32x8xf32>
    %c5_106 = arith.constant 5 : index
    %c0_107 = arith.constant 0 : index
    %c0_108 = arith.constant 0 : index
    %362 = vector.load %arg19[%c5_106, %c0_107, %c0_108] : memref<9x1x8xf32, #tpu.memory_space<vmem>>, vector<1x1x8xf32>
    %363 = vector.shape_cast %362 : vector<1x1x8xf32> to vector<1x8xf32>
    %364 = vector.broadcast %363 : vector<1x8xf32> to vector<32x8xf32>
    %365 = arith.mulf %361, %364 : vector<32x8xf32>
    %366 = vector.extract_strided_slice %326 {offsets = [0, 1], sizes = [32, 7], strides = [1, 1]} : vector<32x8xf32> to vector<32x7xf32>
    %367 = vector.extract_strided_slice %326 {offsets = [0, 0], sizes = [32, 1], strides = [1, 1]} : vector<32x8xf32> to vector<32x1xf32>
    %368 = tpu.concatenate %366, %367 in 1 : vector<32x7xf32>, vector<32x1xf32> -> vector<32x8xf32>
    %c6_109 = arith.constant 6 : index
    %c0_110 = arith.constant 0 : index
    %c0_111 = arith.constant 0 : index
    %369 = vector.load %arg19[%c6_109, %c0_110, %c0_111] : memref<9x1x8xf32, #tpu.memory_space<vmem>>, vector<1x1x8xf32>
    %370 = vector.shape_cast %369 : vector<1x1x8xf32> to vector<1x8xf32>
    %371 = vector.broadcast %370 : vector<1x8xf32> to vector<32x8xf32>
    %372 = arith.mulf %368, %371 : vector<32x8xf32>
    %373 = vector.extract_strided_slice %326 {offsets = [0, 2], sizes = [32, 6], strides = [1, 1]} : vector<32x8xf32> to vector<32x6xf32>
    %374 = vector.extract_strided_slice %326 {offsets = [0, 0], sizes = [32, 2], strides = [1, 1]} : vector<32x8xf32> to vector<32x2xf32>
    %375 = tpu.concatenate %373, %374 in 1 : vector<32x6xf32>, vector<32x2xf32> -> vector<32x8xf32>
    %c7_112 = arith.constant 7 : index
    %c0_113 = arith.constant 0 : index
    %c0_114 = arith.constant 0 : index
    %376 = vector.load %arg19[%c7_112, %c0_113, %c0_114] : memref<9x1x8xf32, #tpu.memory_space<vmem>>, vector<1x1x8xf32>
    %377 = vector.shape_cast %376 : vector<1x1x8xf32> to vector<1x8xf32>
    %378 = vector.broadcast %377 : vector<1x8xf32> to vector<32x8xf32>
    %379 = arith.mulf %375, %378 : vector<32x8xf32>
    %380 = vector.extract_strided_slice %326 {offsets = [0, 3], sizes = [32, 5], strides = [1, 1]} : vector<32x8xf32> to vector<32x5xf32>
    %381 = vector.extract_strided_slice %326 {offsets = [0, 0], sizes = [32, 3], strides = [1, 1]} : vector<32x8xf32> to vector<32x3xf32>
    %382 = tpu.concatenate %380, %381 in 1 : vector<32x5xf32>, vector<32x3xf32> -> vector<32x8xf32>
    %c8_115 = arith.constant 8 : index
    %c0_116 = arith.constant 0 : index
    %c0_117 = arith.constant 0 : index
    %383 = vector.load %arg19[%c8_115, %c0_116, %c0_117] : memref<9x1x8xf32, #tpu.memory_space<vmem>>, vector<1x1x8xf32>
    %384 = vector.shape_cast %383 : vector<1x1x8xf32> to vector<1x8xf32>
    %385 = vector.broadcast %384 : vector<1x8xf32> to vector<32x8xf32>
    %386 = arith.mulf %382, %385 : vector<32x8xf32>
    %387 = tpu.concatenate %333, %340, %347, %354, %358, %365, %372, %379, %386 in 0 : vector<32x8xf32>, vector<32x8xf32>, vector<32x8xf32>, vector<32x8xf32>, vector<32x8xf32>, vector<32x8xf32>, vector<32x8xf32>, vector<32x8xf32>, vector<32x8xf32> -> vector<288x8xf32>
    %c0_118 = arith.constant 0 : index
    %c0_119 = arith.constant 0 : index
    %388 = vector.load %arg20[%c0_118, %c0_119] : memref<8x288xf32, #tpu.memory_space<vmem>>, vector<8x288xf32>
    %cst_120 = arith.constant dense<0.000000e+00> : vector<8x8xf32>
    %389 = tpu.matmul %388, %387, %cst_120 {dimension_numbers = #tpu.dot_dimension_numbers<[1], [0], [0], [1], [0, 0, 1, 1], [], []>} : vector<8x288xf32>, vector<288x8xf32>, vector<8x8xf32> -> vector<8x8xf32>
    %c0_121 = arith.constant 0 : index
    %c0_122 = arith.constant 0 : index
    %390 = vector.load %arg21[%c0_121, %c0_122] : memref<8x1xf32, #tpu.memory_space<vmem>>, vector<8x1xf32>
    %391 = vector.broadcast %390 : vector<8x1xf32> to vector<8x8xf32>
    %392 = arith.addf %389, %391 : vector<8x8xf32>
    %cst_123 = arith.constant 0.000000e+00 : f32
    %393 = vector.broadcast %cst_123 : f32 to vector<8x8xf32>
    %394 = arith.maximumf %392, %393 : vector<8x8xf32>
    %c0_124 = arith.constant 0 : index
    %c0_125 = arith.constant 0 : index
    %395 = vector.load %arg22[%c0_124, %c0_125] : memref<32x8xf32, #tpu.memory_space<vmem>>, vector<32x8xf32>
    %cst_126 = arith.constant dense<0.000000e+00> : vector<32x8xf32>
    %396 = tpu.matmul %395, %394, %cst_126 {dimension_numbers = #tpu.dot_dimension_numbers<[1], [0], [0], [1], [0, 0, 1, 1], [], []>} : vector<32x8xf32>, vector<8x8xf32>, vector<32x8xf32> -> vector<32x8xf32>
    %c0_127 = arith.constant 0 : index
    %c0_128 = arith.constant 0 : index
    %397 = vector.load %arg23[%c0_127, %c0_128] : memref<32x1xf32, #tpu.memory_space<vmem>>, vector<32x1xf32>
    %398 = vector.broadcast %397 : vector<32x1xf32> to vector<32x8xf32>
    %399 = arith.addf %396, %398 : vector<32x8xf32>
    %400 = arith.addf %399, %324 : vector<32x8xf32>
    %cst_129 = arith.constant 0.000000e+00 : f32
    %401 = vector.broadcast %cst_129 : f32 to vector<32x8xf32>
    %402 = arith.maximumf %400, %401 : vector<32x8xf32>
    %403 = vector.extract_strided_slice %402 {offsets = [0, 0], sizes = [1, 8], strides = [1, 1]} : vector<32x8xf32> to vector<1x8xf32>
    %404 = vector.extract_strided_slice %402 {offsets = [1, 0], sizes = [1, 8], strides = [1, 1]} : vector<32x8xf32> to vector<1x8xf32>
    %405 = vector.extract_strided_slice %402 {offsets = [2, 0], sizes = [1, 8], strides = [1, 1]} : vector<32x8xf32> to vector<1x8xf32>
    %406 = vector.extract_strided_slice %402 {offsets = [3, 0], sizes = [1, 8], strides = [1, 1]} : vector<32x8xf32> to vector<1x8xf32>
    %407 = vector.extract_strided_slice %402 {offsets = [4, 0], sizes = [1, 8], strides = [1, 1]} : vector<32x8xf32> to vector<1x8xf32>
    %408 = vector.extract_strided_slice %402 {offsets = [5, 0], sizes = [1, 8], strides = [1, 1]} : vector<32x8xf32> to vector<1x8xf32>
    %409 = vector.extract_strided_slice %402 {offsets = [6, 0], sizes = [1, 8], strides = [1, 1]} : vector<32x8xf32> to vector<1x8xf32>
    %410 = vector.extract_strided_slice %402 {offsets = [7, 0], sizes = [1, 8], strides = [1, 1]} : vector<32x8xf32> to vector<1x8xf32>
    %411 = vector.extract_strided_slice %402 {offsets = [8, 0], sizes = [1, 8], strides = [1, 1]} : vector<32x8xf32> to vector<1x8xf32>
    %412 = vector.extract_strided_slice %402 {offsets = [9, 0], sizes = [1, 8], strides = [1, 1]} : vector<32x8xf32> to vector<1x8xf32>
    %413 = vector.extract_strided_slice %402 {offsets = [10, 0], sizes = [1, 8], strides = [1, 1]} : vector<32x8xf32> to vector<1x8xf32>
    %414 = vector.extract_strided_slice %402 {offsets = [11, 0], sizes = [1, 8], strides = [1, 1]} : vector<32x8xf32> to vector<1x8xf32>
    %415 = vector.extract_strided_slice %402 {offsets = [12, 0], sizes = [1, 8], strides = [1, 1]} : vector<32x8xf32> to vector<1x8xf32>
    %416 = vector.extract_strided_slice %402 {offsets = [13, 0], sizes = [1, 8], strides = [1, 1]} : vector<32x8xf32> to vector<1x8xf32>
    %417 = vector.extract_strided_slice %402 {offsets = [14, 0], sizes = [1, 8], strides = [1, 1]} : vector<32x8xf32> to vector<1x8xf32>
    %418 = vector.extract_strided_slice %402 {offsets = [15, 0], sizes = [1, 8], strides = [1, 1]} : vector<32x8xf32> to vector<1x8xf32>
    %419 = vector.extract_strided_slice %402 {offsets = [16, 0], sizes = [1, 8], strides = [1, 1]} : vector<32x8xf32> to vector<1x8xf32>
    %420 = vector.extract_strided_slice %402 {offsets = [17, 0], sizes = [1, 8], strides = [1, 1]} : vector<32x8xf32> to vector<1x8xf32>
    %421 = vector.extract_strided_slice %402 {offsets = [18, 0], sizes = [1, 8], strides = [1, 1]} : vector<32x8xf32> to vector<1x8xf32>
    %422 = vector.extract_strided_slice %402 {offsets = [19, 0], sizes = [1, 8], strides = [1, 1]} : vector<32x8xf32> to vector<1x8xf32>
    %423 = vector.extract_strided_slice %402 {offsets = [20, 0], sizes = [1, 8], strides = [1, 1]} : vector<32x8xf32> to vector<1x8xf32>
    %424 = vector.extract_strided_slice %402 {offsets = [21, 0], sizes = [1, 8], strides = [1, 1]} : vector<32x8xf32> to vector<1x8xf32>
    %425 = vector.extract_strided_slice %402 {offsets = [22, 0], sizes = [1, 8], strides = [1, 1]} : vector<32x8xf32> to vector<1x8xf32>
    %426 = vector.extract_strided_slice %402 {offsets = [23, 0], sizes = [1, 8], strides = [1, 1]} : vector<32x8xf32> to vector<1x8xf32>
    %427 = vector.extract_strided_slice %402 {offsets = [24, 0], sizes = [1, 8], strides = [1, 1]} : vector<32x8xf32> to vector<1x8xf32>
    %428 = vector.extract_strided_slice %402 {offsets = [25, 0], sizes = [1, 8], strides = [1, 1]} : vector<32x8xf32> to vector<1x8xf32>
    %429 = vector.extract_strided_slice %402 {offsets = [26, 0], sizes = [1, 8], strides = [1, 1]} : vector<32x8xf32> to vector<1x8xf32>
    %430 = vector.extract_strided_slice %402 {offsets = [27, 0], sizes = [1, 8], strides = [1, 1]} : vector<32x8xf32> to vector<1x8xf32>
    %431 = vector.extract_strided_slice %402 {offsets = [28, 0], sizes = [1, 8], strides = [1, 1]} : vector<32x8xf32> to vector<1x8xf32>
    %432 = vector.extract_strided_slice %402 {offsets = [29, 0], sizes = [1, 8], strides = [1, 1]} : vector<32x8xf32> to vector<1x8xf32>
    %433 = vector.extract_strided_slice %402 {offsets = [30, 0], sizes = [1, 8], strides = [1, 1]} : vector<32x8xf32> to vector<1x8xf32>
    %434 = vector.extract_strided_slice %402 {offsets = [31, 0], sizes = [1, 8], strides = [1, 1]} : vector<32x8xf32> to vector<1x8xf32>
    %435 = tpu.concatenate %403, %404, %405, %406, %407, %408, %409, %410, %411, %412, %413, %414, %415, %416, %417, %418 in 1 : vector<1x8xf32>, vector<1x8xf32>, vector<1x8xf32>, vector<1x8xf32>, vector<1x8xf32>, vector<1x8xf32>, vector<1x8xf32>, vector<1x8xf32>, vector<1x8xf32>, vector<1x8xf32>, vector<1x8xf32>, vector<1x8xf32>, vector<1x8xf32>, vector<1x8xf32>, vector<1x8xf32>, vector<1x8xf32> -> vector<1x128xf32>
    %436 = tpu.concatenate %419, %420, %421, %422, %423, %424, %425, %426, %427, %428, %429, %430, %431, %432, %433, %434 in 1 : vector<1x8xf32>, vector<1x8xf32>, vector<1x8xf32>, vector<1x8xf32>, vector<1x8xf32>, vector<1x8xf32>, vector<1x8xf32>, vector<1x8xf32>, vector<1x8xf32>, vector<1x8xf32>, vector<1x8xf32>, vector<1x8xf32>, vector<1x8xf32>, vector<1x8xf32>, vector<1x8xf32>, vector<1x8xf32> -> vector<1x128xf32>
    %437 = tpu.concatenate %435, %436 in 1 : vector<1x128xf32>, vector<1x128xf32> -> vector<1x256xf32>
    %c0_130 = arith.constant 0 : index
    %c0_131 = arith.constant 0 : index
    %c0_132 = arith.constant 0 : index
    %438 = vector.load %arg24[%c0_130, %c0_131, %c0_132] : memref<1x1x256xf32, #tpu.memory_space<vmem>>, vector<1x1x256xf32>
    %439 = vector.shape_cast %438 : vector<1x1x256xf32> to vector<1x256xf32>
    %440 = vector.shape_cast %437 : vector<1x256xf32> to vector<1x1x256xf32>
    tpu.vector_store %arg24[%c0_130, %c0_131, %c0_132], %440 {strides = array<i32>} : memref<1x1x256xf32, #tpu.memory_space<vmem>>, vector<1x1x256xf32>,
    return
  }
  func.func @transform_0(%arg0: i32) -> (i32, i32, i32) {
    %c0_i32 = arith.constant 0 : i32
    %c0_i32_0 = arith.constant 0 : i32
    %c0_i32_1 = arith.constant 0 : i32
    return %arg0, %c0_i32, %c0_i32_0 : i32, i32, i32
  }
  func.func @transform_1(%arg0: i32) -> (i32, i32) {
    %c0_i32 = arith.constant 0 : i32
    %c0_i32_0 = arith.constant 0 : i32
    %c0_i32_1 = arith.constant 0 : i32
    return %c0_i32, %c0_i32_0 : i32, i32
  }
  func.func @transform_2(%arg0: i32) -> (i32, i32) {
    %c0_i32 = arith.constant 0 : i32
    %c0_i32_0 = arith.constant 0 : i32
    %c0_i32_1 = arith.constant 0 : i32
    return %c0_i32, %c0_i32_0 : i32, i32
  }
  func.func @transform_3(%arg0: i32) -> (i32, i32) {
    %c0_i32 = arith.constant 0 : i32
    %c0_i32_0 = arith.constant 0 : i32
    %c0_i32_1 = arith.constant 0 : i32
    return %c0_i32, %c0_i32_0 : i32, i32
  }
  func.func @transform_4(%arg0: i32) -> (i32, i32) {
    %c0_i32 = arith.constant 0 : i32
    %c0_i32_0 = arith.constant 0 : i32
    %c0_i32_1 = arith.constant 0 : i32
    return %c0_i32, %c0_i32_0 : i32, i32
  }
  func.func @transform_5(%arg0: i32) -> (i32, i32) {
    %c0_i32 = arith.constant 0 : i32
    %c0_i32_0 = arith.constant 0 : i32
    %c0_i32_1 = arith.constant 0 : i32
    return %c0_i32, %c0_i32_0 : i32, i32
  }
  func.func @transform_6(%arg0: i32) -> (i32, i32) {
    %c0_i32 = arith.constant 0 : i32
    %c0_i32_0 = arith.constant 0 : i32
    %c0_i32_1 = arith.constant 0 : i32
    return %c0_i32, %c0_i32_0 : i32, i32
  }
  func.func @transform_7(%arg0: i32) -> (i32, i32, i32) {
    %c0_i32 = arith.constant 0 : i32
    %c0_i32_0 = arith.constant 0 : i32
    %c0_i32_1 = arith.constant 0 : i32
    %c0_i32_2 = arith.constant 0 : i32
    return %c0_i32, %c0_i32_0, %c0_i32_1 : i32, i32, i32
  }
  func.func @transform_8(%arg0: i32) -> (i32, i32) {
    %c0_i32 = arith.constant 0 : i32
    %c0_i32_0 = arith.constant 0 : i32
    %c0_i32_1 = arith.constant 0 : i32
    return %c0_i32, %c0_i32_0 : i32, i32
  }
  func.func @transform_9(%arg0: i32) -> (i32, i32) {
    %c0_i32 = arith.constant 0 : i32
    %c0_i32_0 = arith.constant 0 : i32
    %c0_i32_1 = arith.constant 0 : i32
    return %c0_i32, %c0_i32_0 : i32, i32
  }
  func.func @transform_10(%arg0: i32) -> (i32, i32) {
    %c0_i32 = arith.constant 0 : i32
    %c0_i32_0 = arith.constant 0 : i32
    %c0_i32_1 = arith.constant 0 : i32
    return %c0_i32, %c0_i32_0 : i32, i32
  }
  func.func @transform_11(%arg0: i32) -> (i32, i32) {
    %c0_i32 = arith.constant 0 : i32
    %c0_i32_0 = arith.constant 0 : i32
    %c0_i32_1 = arith.constant 0 : i32
    return %c0_i32, %c0_i32_0 : i32, i32
  }
  func.func @transform_12(%arg0: i32) -> (i32, i32) {
    %c0_i32 = arith.constant 0 : i32
    %c0_i32_0 = arith.constant 0 : i32
    %c0_i32_1 = arith.constant 0 : i32
    return %c0_i32, %c0_i32_0 : i32, i32
  }
  func.func @transform_13(%arg0: i32) -> (i32, i32, i32) {
    %c0_i32 = arith.constant 0 : i32
    %c0_i32_0 = arith.constant 0 : i32
    %c0_i32_1 = arith.constant 0 : i32
    %c0_i32_2 = arith.constant 0 : i32
    return %c0_i32, %c0_i32_0, %c0_i32_1 : i32, i32, i32
  }
  func.func @transform_14(%arg0: i32) -> (i32, i32) {
    %c0_i32 = arith.constant 0 : i32
    %c0_i32_0 = arith.constant 0 : i32
    %c0_i32_1 = arith.constant 0 : i32
    return %c0_i32, %c0_i32_0 : i32, i32
  }
  func.func @transform_15(%arg0: i32) -> (i32, i32) {
    %c0_i32 = arith.constant 0 : i32
    %c0_i32_0 = arith.constant 0 : i32
    %c0_i32_1 = arith.constant 0 : i32
    return %c0_i32, %c0_i32_0 : i32, i32
  }
  func.func @transform_16(%arg0: i32) -> (i32, i32) {
    %c0_i32 = arith.constant 0 : i32
    %c0_i32_0 = arith.constant 0 : i32
    %c0_i32_1 = arith.constant 0 : i32
    return %c0_i32, %c0_i32_0 : i32, i32
  }
  func.func @transform_17(%arg0: i32) -> (i32, i32) {
    %c0_i32 = arith.constant 0 : i32
    %c0_i32_0 = arith.constant 0 : i32
    %c0_i32_1 = arith.constant 0 : i32
    return %c0_i32, %c0_i32_0 : i32, i32
  }
  func.func @transform_18(%arg0: i32) -> (i32, i32, i32) {
    %c0_i32 = arith.constant 0 : i32
    %c0_i32_0 = arith.constant 0 : i32
    %c0_i32_1 = arith.constant 0 : i32
    %c0_i32_2 = arith.constant 0 : i32
    return %c0_i32, %c0_i32_0, %c0_i32_1 : i32, i32, i32
  }
  func.func @transform_19(%arg0: i32) -> (i32, i32) {
    %c0_i32 = arith.constant 0 : i32
    %c0_i32_0 = arith.constant 0 : i32
    %c0_i32_1 = arith.constant 0 : i32
    return %c0_i32, %c0_i32_0 : i32, i32
  }
  func.func @transform_20(%arg0: i32) -> (i32, i32) {
    %c0_i32 = arith.constant 0 : i32
    %c0_i32_0 = arith.constant 0 : i32
    %c0_i32_1 = arith.constant 0 : i32
    return %c0_i32, %c0_i32_0 : i32, i32
  }
  func.func @transform_21(%arg0: i32) -> (i32, i32) {
    %c0_i32 = arith.constant 0 : i32
    %c0_i32_0 = arith.constant 0 : i32
    %c0_i32_1 = arith.constant 0 : i32
    return %c0_i32, %c0_i32_0 : i32, i32
  }
  func.func @transform_22(%arg0: i32) -> (i32, i32) {
    %c0_i32 = arith.constant 0 : i32
    %c0_i32_0 = arith.constant 0 : i32
    %c0_i32_1 = arith.constant 0 : i32
    return %c0_i32, %c0_i32_0 : i32, i32
  }
  func.func @transform_23(%arg0: i32) -> (i32, i32, i32) {
    %c0_i32 = arith.constant 0 : i32
    %c0_i32_0 = arith.constant 0 : i32
    %c0_i32_1 = arith.constant 0 : i32
    return %arg0, %c0_i32, %c0_i32_0 : i32, i32, i32
  }
}

</mosaic_0001>

<bundles_post_ra>
// kernel: _lambda_.1
= control target key start
LH: loop header
LB: loop body
LE: loop exit
PB: predicated region body
PF: predicated region fallthrough
CT: control target
= control target key end

     0   :  { %s6859_s0 = inlined_call_operand.vmem [shape: f32[1,8,512], index: 0, kind: input, shape index: {}]   ;;  %s6860_s1 = inlined_call_operand.hbm [shape: f32[256,1024], index: 1, kind: input, shape index: {}]   ;;  %s6861_s2 = inlined_call_operand.vmem [shape: f32[16,128], index: 2, kind: input, shape index: {}]   ;;  %s6862_s3 = inlined_call_operand.hbm [shape: f32[16,1], index: 3, kind: input, shape index: {}]   ;;  %s6863_s4 = inlined_call_operand.vmem [shape: f32[64,256], index: 4, kind: input, shape index: {}]   ;;  %s6864_s5 = inlined_call_operand.vmem [shape: f32[32,256], index: 5, kind: input, shape index: {}]   ;;  %s6865_s6 = inlined_call_operand.vmem [shape: f32[32,1], index: 6, kind: input, shape index: {}]   ;;  %s6866_s7 = inlined_call_operand.hbm [shape: f32[9,1,32], index: 7, kind: input, shape index: {}]   ;;  %s6867_s8 = inlined_call_operand.vmem [shape: f32[32,288], index: 8, kind: input, shape index: {}]   ;;  %s6868_s9 = inlined_call_operand.vmem [shape: f32[32,1], index: 9, kind: input, shape index: {}]   ;;  %s6869_s10 = inlined_call_operand.hbm [shape: f32[16,64], index: 10, kind: input, shape index: {}]   ;;  %s6870_s11 = inlined_call_operand.vmem [shape: f32[32,512], index: 11, kind: input, shape index: {}]   ;;  %s6871_s12 = inlined_call_operand.vmem [shape: f32[32,1], index: 12, kind: input, shape index: {}]   ;;  %s6872_s13 = inlined_call_operand.vmem [shape: f32[9,1,8], index: 13, kind: input, shape index: {}, may-alias: {13,18}]   ;;  %s6873_s14 = inlined_call_operand.hbm [shape: f32[8,288], index: 14, kind: input, shape index: {}]   ;;  %s6874_s15 = inlined_call_operand.hbm [shape: f32[8,1], index: 15, kind: input, shape index: {}]   ;;  %s6875_s16 = inlined_call_operand.vmem [shape: f32[32,8], index: 16, kind: input, shape index: {}]   ;;  %s6876_s17 = inlined_call_operand.vmem [shape: f32[32,1], index: 17, kind: input, shape index: {}]   ;;  %s6877_s18 = inlined_call_operand.vmem [shape: f32[9,1,8], index: 18, kind: input, shape index: {}, may-alias: {13,18}]   ;;  %s6878_s19 = inlined_call_operand.vmem [shape: f32[8,288], index: 19, kind: input, shape index: {}]   ;;  %s6879_s20 = inlined_call_operand.vmem [shape: f32[8,1], index: 20, kind: input, shape index: {}]   ;;  %s6880_s21 = inlined_call_operand.vmem [shape: f32[32,8], index: 21, kind: input, shape index: {}]   ;;  %s6881_s22 = inlined_call_operand.vmem [shape: f32[32,1], index: 22, kind: input, shape index: {}]   ;;  %s6882_s23 = inlined_call_operand.vmem [shape: f32[1,1,256], index: 23, kind: output, shape index: {}]  }
   0x1   :  { %6923 = sst [smem:[#allocation59_spill]] %s6859_s0 }
   0x2   :  { %6924 = sst [smem:[#allocation60_spill]] %s6860_s1 }
   0x3   :  { %6925 = sst [smem:[#allocation61_spill]] %s6861_s2 }
   0x4   :  { %6926 = sst [smem:[#allocation62_spill]] %s6862_s3 }
   0x5   :  { %6927 = sst [smem:[#allocation63_spill]] %s6863_s4 }
   0x6   :  { %6928 = sst [smem:[#allocation64_spill]] %s6864_s5 }
   0x7   :  { %6929 = sst [smem:[#allocation65_spill]] %s6865_s6 }
   0x8   :  { %6930 = sst [smem:[#allocation66_spill]] %s6866_s7 }
   0x9   :  { %28 = vsyncpa [#allocation3], 0 }
   0xa   :  { %29 = vsyncpa [#allocation5], 0 }
   0xb   :  { %30 = vsyncpa [#allocation8], 0 }
   0xc   :  { %31 = vsyncpa [#allocation11], 0  ;;  %s4671_s4 = smov [#allocation4]  }
   0xd   :  { %s53_s30 = sshll.u32 %s4671_s4, 4  ;;  %s54_s30 = int_to_ptr.vmem [resolvable:$true] %s53_s30 }
   0xe   :  { %s4551_s24 = scalar_lea.vmem %s54_s30, 256  ;;  %p4556_p1 = scmp.lt.s32.totalorder %s54_s30, %s54_s30 }
   0xf   :  { %p4552_p0 = scmp.ne.s32.totalorder %s54_s30, %s4551_s24  ;;  %p4557_p2 = scmp.lt.s32.totalorder %s4551_s24, %s4551_s24 }
  0x11   :  { %p4558_p3 = por %p4557_p2, %p4556_p1 }
  0x13   :  { %p4559_p4 = pnand %p4558_p3, %p4552_p0 }
  0x15   :  { %4562 = shalt.err (!%p4559_p4)
}
  0x16   :  { %s4672_s25 = smov 128   ;;  %s6894_s5 = smov 8  }
  0x17   :  { %s6931_s2 = sld [smem:[#allocation62_spill]]  ;;  %s4674_s6 = smov [#allocation7]  }
  0x18   :  { %s87_s27 = sshll.u32 %s4674_s6, 4  ;;  %s4675_s7 = smov [#allocation2]   ;;  %s88_s27 = int_to_ptr.vmem [resolvable:$true] %s87_s27 }
  0x19   :  { %s39_s28 = sshll.u32 %s4675_s7, 4  ;;  %s4571_s29 = scalar_lea.vmem %s88_s27, 256  ;;  %s40_s28 = int_to_ptr.vmem [resolvable:$true] %s39_s28 }
  0x1a   :  { %p4572_p5 = scmp.ne.s32.totalorder %s88_s27, %s4571_s29  ;;  %p4576_p6 = scmp.lt.s32.totalorder %s88_s27, %s88_s27 }
  0x1b   :  { %p4577_p7 = scmp.lt.s32.totalorder %s4571_s29, %s4571_s29 }
  0x1d   :  { %59 = dma.hbm_to_vmem [thread:$0]  %s6931_s2, 256, %s54_s30, [#allocation5], %s4672_s25, %s4672_s25, %s6894_s5  }
  0x1e   :  { %p4578_p8 = por %p4577_p7, %p4576_p6 }
  0x20   :  { %p4579_p9 = pnand %p4578_p8, %p4572_p5 }
  0x22   :  { %4582 = shalt.err (!%p4579_p9)
}
  0x23   :  { %93 = dma.hbm_to_vmem [thread:$0]  %s6869_s10, 256, %s88_s27, [#allocation8], %s4672_s25, %s4672_s25, %s6894_s5  }
  0x24   :  { %s4591_s4 = scalar_lea.vmem %s40_s28, 32768  ;;  %p4596_p11 = scmp.lt.s32.totalorder %s40_s28, %s40_s28 }
  0x25   :  { %p4592_p10 = scmp.ne.s32.totalorder %s40_s28, %s4591_s4  ;;  %p4597_p12 = scmp.lt.s32.totalorder %s4591_s4, %s4591_s4 }
  0x27   :  { %p4598_p13 = por %p4597_p12, %p4596_p11 }
  0x29   :  { %p4599_p0 = pnand %p4598_p13, %p4592_p10 }
  0x2b   :  { %4602 = shalt.err (!%p4599_p0)
}
  0x2c   :  { %s4676_s30 = smov 1024   ;;  %s6896_s24 = smov 64  }
  0x2d   :  { %s6932_s2 = sld [smem:[#allocation60_spill]]  ;;  %s4678_s6 = smov [#allocation6]  }
  0x2e   :  { %s71_s7 = sshll.u32 %s4678_s6, 4  ;;  %s72_s7 = int_to_ptr.vmem [resolvable:$true] %s71_s7 }
  0x2f   :  { %s4611_s29 = scalar_lea.vmem %s72_s7, 144  ;;  %s4615_s10 = scalar_lea.vmem %s72_s7, 160 }
  0x30   :  { %p4612_p1 = scmp.ne.s32.totalorder %s72_s7, %s4611_s29  ;;  %p4616_p2 = scmp.lt.s32.totalorder %s72_s7, %s72_s7 }
  0x31   :  { %p4617_p3 = scmp.lt.s32.totalorder %s4615_s10, %s4611_s29 }
  0x33   :  { %45 = dma.hbm_to_vmem [thread:$0]  %s6932_s2, 32768, %s40_s28, [#allocation3], %s4676_s30, %s4676_s30, %s6896_s24  }
  0x34   :  { %p4618_p4 = por %p4617_p3, %p4616_p2 }
  0x36   :  { %p4619_p5 = pnand %p4618_p4, %p4612_p1 }
  0x38   :  { %4622 = shalt.err (!%p4619_p5)
}
  0x39   :  { %s6892_s25 = smov 16   ;;  %s4680_s27 = smov 1  }
  0x3a   :  { %s6933_s4 = sld [smem:[#allocation66_spill]]  ;;  %s4681_s28 = smov [#allocation9]  }
  0x3b   :  { %s106_s30 = sshll.u32 %s4681_s28, 4  ;;  %s4682_s1 = smov [#allocation10]   ;;  %s107_s30 = int_to_ptr.vmem [resolvable:$true] %s106_s30 }
  0x3c   :  { %s116_s26 = sshll.u32 %s4682_s1, 4  ;;  %s4631_s2 = scalar_lea.vmem %s107_s30, 384  ;;  %s117_s26 = int_to_ptr.vmem [resolvable:$true] %s116_s26 }
  0x3d   :  { %p4632_p6 = scmp.ne.s32.totalorder %s107_s30, %s4631_s2  ;;  %p4636_p7 = scmp.lt.s32.totalorder %s107_s30, %s107_s30 }
  0x3e   :  { %p4637_p8 = scmp.lt.s32.totalorder %s4631_s2, %s4631_s2 }
  0x40   :  { %77 = dma.hbm_to_vmem [thread:$0]  %s6933_s4, 144, %s72_s7, [#allocation5], %s6892_s25, %s6892_s25, %s4680_s27  }
  0x41   :  { %p4638_p9 = por %p4637_p8, %p4636_p7 }
  0x43   :  { %p4639_p10 = pnand %p4638_p9, %p4632_p6 }
  0x45   :  { %4642 = shalt.err (!%p4639_p10)
}
  0x46   :  { %109 = dma.hbm_to_vmem [thread:$0]  %s6873_s14, 384, %s107_s30, [#allocation8]  }
  0x47   :  { %s4651_s10 = scalar_lea.vmem %s117_s26, 128  ;;  %p4656_p12 = scmp.lt.s32.totalorder %s117_s26, %s117_s26 }
  0x48   :  { %p4652_p11 = scmp.ne.s32.totalorder %s117_s26, %s4651_s10  ;;  %p4657_p13 = scmp.lt.s32.totalorder %s4651_s10, %s4651_s10 }
  0x4a   :  { %p4658_p0 = por %p4657_p13, %p4656_p12 }
  0x4c   :  { %p4659_p1 = pnand %p4658_p0, %p4652_p11 }
  0x4e   :  { %4662 = shalt.err (!%p4659_p1)
}
  0x4f   :  { %119 = dma.hbm_to_vmem [thread:$0]  %s6874_s15, 128, %s117_s26, [#allocation11]  }
  0x50   :  { %4663 = dma.done.wait [#allocation3], 32768  }
  0x51   :  { %4664 = vsyncadd [#allocation3], 4294934528 }
  0x52   :  { %4665 = dma.done.wait [#allocation5], 400  }
  0x53   :  { %4666 = vsyncadd [#allocation5], 4294966896 }
  0x54   :  { %4667 = dma.done.wait [#allocation8], 640  }
  0x55   :  { %4668 = vsyncadd [#allocation8], 4294966656 }
  0x56   :  { %4669 = dma.done.wait [#allocation11], 128  }
  0x57   :  { %4670 = vsyncadd [#allocation11], 4294967168  ;;  %v279_v0 = vld [vmem:[#allocation2 + $0x3d8] sm:$0xff]  ;;  %v278_v1 = vld [vmem:[#allocation2 + $0x3d0] sm:$0xff]  ;;  %s6934_s0 = sld [smem:[#allocation59_spill]]  ;;  %vm724_vm0 = vcmask 523264  }
  0x58   :  { %v277_v2 = vld [vmem:[#allocation2 + $0x3c8] sm:$0xff]  ;;  %489 = vmatprep.subr.mxu1 %v279_v0  ;;  %v271_v3 = vld [vmem:[#allocation2 + $0x398] sm:$0xff]  ;;  %v276_v4 = vld [vmem:[#allocation2 + $0x3c0] sm:$0xff]  ;;  %s6935_s10 = sld [smem:[#allocation61_spill]]  ;;  %s6904_s2 = smov 112   ;;  %vm1019_vm1 = vcmask 130048  }
  0x59   :  { %412 = vmatprep.subr.mxu0 %v277_v2  ;;  %v270_v5 = vld [vmem:[#allocation2 + $0x390] sm:$0xff]  ;;  %490 = vmatpush1.msra.mxu1 %v278_v1  ;;  %v269_v6 = vld [vmem:[#allocation2 + $0x388] sm:$0xff]  ;;  %v263_v7 = vld [vmem:[#allocation2 + $0x358] sm:$0xff]  ;;  %s6936_s14 = sld [smem:[#allocation63_spill]]  ;;  %s6888_s6 = smov 48   ;;  %vm1720_vm2 = vcmask 261120  }
  0x5a   :  { %413 = vmatpush1.msra.mxu0 %v276_v4  ;;  %v268_v8 = vld [vmem:[#allocation2 + $0x380] sm:$0xff]  ;;  %491 = vmatprep.subr.mxu1 %v271_v3  ;;  %v262_v9 = vld [vmem:[#allocation2 + $0x350] sm:$0xff]  ;;  %v261_v10 = vld [vmem:[#allocation2 + $0x348] sm:$0xff]  ;;  %s4688_s29 = smov 80   ;;  %s6919_s7 = smov 96   ;;  %vm1626_vm3 = vcmask 228352  }
  0x5b   :  { %414 = vmatprep.subr.mxu0 %v269_v6  ;;  %492 = vmatpush1.msra.mxu1 %v270_v5  ;;  %v255_v11 = vld [vmem:[#allocation2 + $0x318] sm:$0xff]  ;;  %v260_v12 = vld [vmem:[#allocation2 + $0x340] sm:$0xff]  ;;  %v253_v13 = vld [vmem:[#allocation2 + $0x308] sm:$0xff]  ;;  %s6938_s1 = sld [smem:[#allocation64_spill]]  ;;  %s4690_s26 = smov 28   ;;  %vm1491_vm4 = vcmask 7168  }
  0x5c   :  { %415 = vmatpush1.msra.mxu0 %v268_v8  ;;  %493 = vmatprep.subr.mxu1 %v263_v7  ;;  %v254_v14 = vld [vmem:[#allocation2 + $0x310] sm:$0xff]  ;;  %v252_v15 = vld [vmem:[#allocation2 + $0x300] sm:$0xff]  ;;  %v247_v16 = vld [vmem:[#allocation2 + $0x2d8] sm:$0xff]  ;;  %s6898_s3 = smov 125   ;;  %s6906_s15 = smov 3   ;;  %vm1585_vm5 = vcmask 236544  }
  0x5d   :  { %416 = vmatprep.subr.mxu0 %v261_v10  ;;  %494 = vmatpush1.msra.mxu1 %v262_v9  ;;  %v245_v17 = vld [vmem:[#allocation2 + $0x2c8] sm:$0xff]  ;;  %v246_v18 = vld [vmem:[#allocation2 + $0x2d0] sm:$0xff]  ;;  %v244_v19 = vld [vmem:[#allocation2 + $0x2c0] sm:$0xff]  ;;  %s4696_s4 = smov 99   ;;  %s4699_s28 = smov 4   ;;  %vm1450_vm6 = vcmask 23552  }
  0x5e   :  { %417 = vmatpush1.msra.mxu0 %v260_v12  ;;  %495 = vmatprep.subr.mxu1 %v255_v11  ;;  %v239_v20 = vld [vmem:[#allocation2 + $0x298] sm:$0xff]  ;;  %v237_v21 = vld [vmem:[#allocation2 + $0x288] sm:$0xff]  ;;  %v238_v22 = vld [vmem:[#allocation2 + $0x290] sm:$0xff]  ;;  %s4700_s30 = smov 100   ;;  %s4702_s5 = smov 101   ;;  %vm1544_vm7 = vcmask 252928  }
  0x5f   :  { %418 = vmatprep.subr.mxu0 %v253_v13  ;;  %496 = vmatpush1.msra.mxu1 %v254_v14  ;;  %v236_v23 = vld [vmem:[#allocation2 + $0x280] sm:$0xff]  ;;  %v231_v24 = vld [vmem:[#allocation2 + $0x258] sm:$0xff]  ;;  %v229_v25 = vld [vmem:[#allocation2 + $0x248] sm:$0xff]  ;;  %vm1409_vm8 = vcmask 31744   ;;  %vm1369_vm9 = vcmask 39936   ;;  %vm1667_vm10 = vcmask 220160  }
  0x60   :  { %419 = vmatpush1.msra.mxu0 %v252_v15  ;;  %497 = vmatprep.subr.mxu1 %v247_v16  ;;  %v230_v26 = vld [vmem:[#allocation2 + $0x250] sm:$0xff]  ;;  %v228_v27 = vld [vmem:[#allocation2 + $0x240] sm:$0xff]  ;;  %v223_v28 = vld [vmem:[#allocation2 + $0x218] sm:$0xff]  ;;  %vm2909_vm11 = vcmask 48128   ;;  %vm2856_vm12 = vcmask 56320   ;;  %vm2751_vm13 = vcmask 15360  }
  0x61   :  { %420 = vmatprep.subr.mxu0 %v245_v17  ;;  %498 = vmatpush1.msra.mxu1 %v246_v18  ;;  %v221_v29 = vld [vmem:[#allocation2 + $0x208] sm:$0xff]  ;;  %v222_v30 = vld [vmem:[#allocation2 + $0x210] sm:$0xff]  ;;  %v220_v31 = vld [vmem:[#allocation2 + $0x200] sm:$0xff]  ;;  %vm4721_vm14 = vmmov 0   ;;  %vm3147_vm15 = vcmask 64512  }
  0x62   :  { %421 = vmatpush1.msra.mxu0 %v244_v19  ;;  %499 = vmatprep.subr.mxu1 %v239_v20  ;;  %v215_v32 = vld [vmem:[#allocation2 + $0x1d8] sm:$0xff]  ;;  %v213_v33 = vld [vmem:[#allocation2 + $0x1c8] sm:$0xff]  ;;  %v214_v34 = vld [vmem:[#allocation2 + $0x1d0] sm:$0xff] }
  0x63   :  { %422 = vmatprep.subr.mxu0 %v237_v21  ;;  %500 = vmatpush1.msra.mxu1 %v238_v22  ;;  %v212_v35 = vld [vmem:[#allocation2 + $0x1c0] sm:$0xff]  ;;  %v207_v36 = vld [vmem:[#allocation2 + $0x198] sm:$0xff]  ;;  %v205_v37 = vld [vmem:[#allocation2 + $0x188] sm:$0xff] }
  0x64   :  { %423 = vmatpush1.msra.mxu0 %v236_v23  ;;  %501 = vmatprep.subr.mxu1 %v231_v24  ;;  %v206_v38 = vld [vmem:[#allocation2 + $0x190] sm:$0xff]  ;;  %v204_v39 = vld [vmem:[#allocation2 + $0x180] sm:$0xff]  ;;  %v199_v40 = vld [vmem:[#allocation2 + $0x158] sm:$0xff] }
  0x65   :  { %424 = vmatprep.subr.mxu0 %v229_v25  ;;  %502 = vmatpush1.msra.mxu1 %v230_v26  ;;  %v197_v41 = vld [vmem:[#allocation2 + $0x148] sm:$0xff]  ;;  %v198_v42 = vld [vmem:[#allocation2 + $0x150] sm:$0xff]  ;;  %v196_v43 = vld [vmem:[#allocation2 + $0x140] sm:$0xff] }
  0x66   :  { %425 = vmatpush1.msra.mxu0 %v228_v27  ;;  %503 = vmatprep.subr.mxu1 %v223_v28  ;;  %v191_v44 = vld [vmem:[#allocation2 + $0x118] sm:$0xff]  ;;  %v189_v45 = vld [vmem:[#allocation2 + $0x108] sm:$0xff]  ;;  %v190_v46 = vld [vmem:[#allocation2 + $0x110] sm:$0xff] }
  0x67   :  { %426 = vmatprep.subr.mxu0 %v221_v29  ;;  %504 = vmatpush1.msra.mxu1 %v222_v30  ;;  %v188_v47 = vld [vmem:[#allocation2 + $0x100] sm:$0xff]  ;;  %v183_v48 = vld [vmem:[#allocation2 + $0xd8] sm:$0xff]  ;;  %v181_v49 = vld [vmem:[#allocation2 + $0xc8] sm:$0xff] }
  0x68   :  { %427 = vmatpush1.msra.mxu0 %v220_v31  ;;  %505 = vmatprep.subr.mxu1 %v215_v32  ;;  %v182_v50 = vld [vmem:[#allocation2 + $0xd0] sm:$0xff]  ;;  %v180_v51 = vld [vmem:[#allocation2 + $0xc0] sm:$0xff]  ;;  %v175_v52 = vld [vmem:[#allocation2 + $0x98] sm:$0xff] }
  0x69   :  { %428 = vmatprep.subr.mxu0 %v213_v33  ;;  %506 = vmatpush1.msra.mxu1 %v214_v34  ;;  %v173_v53 = vld [vmem:[#allocation2 + $0x88] sm:$0xff]  ;;  %v174_v54 = vld [vmem:[#allocation2 + $0x90] sm:$0xff]  ;;  %v172_v55 = vld [vmem:[#allocation2 + $0x80] sm:$0xff] }
  0x6a   :  { %429 = vmatpush1.msra.mxu0 %v212_v35  ;;  %507 = vmatprep.subr.mxu1 %v207_v36  ;;  %v167_v56 = vld [vmem:[#allocation2 + $0x58] sm:$0xff]  ;;  %v165_v57 = vld [vmem:[#allocation2 + $0x48] sm:$0xff]  ;;  %v166_v58 = vld [vmem:[#allocation2 + $0x50] sm:$0xff] }
  0x6b   :  { %430 = vmatprep.subr.mxu0 %v205_v37  ;;  %508 = vmatpush1.msra.mxu1 %v206_v38  ;;  %v164_v59 = vld [vmem:[#allocation2 + $0x40] sm:$0xff]  ;;  %v159_v60 = vld [vmem:[#allocation2 + $0x18] sm:$0xff]  ;;  %v157_v61 = vld [vmem:[#allocation2 + $0x8] sm:$0xff] }
  0x6c   :  { %431 = vmatpush1.msra.mxu0 %v204_v39  ;;  %509 = vmatprep.subr.mxu1 %v199_v40  ;;  %v158_v62 = vld [vmem:[#allocation2 + $0x10] sm:$0xff]  ;;  %v156_v63 = vld [vmem:[#allocation2] sm:$0xff]  ;;  %v407_v0 = vld [vmem:[#allocation2 + $0x7d8] sm:$0xff] }
  0x6d   :  { %432 = vmatprep.subr.mxu0 %v197_v41  ;;  %510 = vmatpush1.msra.mxu1 %v198_v42  ;;  %v405_v1 = vld [vmem:[#allocation2 + $0x7c8] sm:$0xff]  ;;  %v406_v2 = vld [vmem:[#allocation2 + $0x7d0] sm:$0xff]  ;;  %v404_v3 = vld [vmem:[#allocation2 + $0x7c0] sm:$0xff] }
  0x6e   :  { %433 = vmatpush1.msra.mxu0 %v196_v43  ;;  %511 = vmatprep.subr.mxu1 %v191_v44  ;;  %v399_v4 = vld [vmem:[#allocation2 + $0x798] sm:$0xff]  ;;  %v397_v5 = vld [vmem:[#allocation2 + $0x788] sm:$0xff]  ;;  %v398_v6 = vld [vmem:[#allocation2 + $0x790] sm:$0xff] }
  0x6f   :  { %434 = vmatprep.subr.mxu0 %v189_v45  ;;  %512 = vmatpush1.msra.mxu1 %v190_v46  ;;  %v396_v7 = vld [vmem:[#allocation2 + $0x780] sm:$0xff]  ;;  %v391_v8 = vld [vmem:[#allocation2 + $0x758] sm:$0xff]  ;;  %v389_v9 = vld [vmem:[#allocation2 + $0x748] sm:$0xff] }
  0x70   :  { %435 = vmatpush1.msra.mxu0 %v188_v47  ;;  %513 = vmatprep.subr.mxu1 %v183_v48  ;;  %v390_v10 = vld [vmem:[#allocation2 + $0x750] sm:$0xff]  ;;  %v388_v11 = vld [vmem:[#allocation2 + $0x740] sm:$0xff]  ;;  %v383_v12 = vld [vmem:[#allocation2 + $0x718] sm:$0xff] }
  0x71   :  { %436 = vmatprep.subr.mxu0 %v181_v49  ;;  %514 = vmatpush1.msra.mxu1 %v182_v50  ;;  %v381_v13 = vld [vmem:[#allocation2 + $0x708] sm:$0xff]  ;;  %v382_v14 = vld [vmem:[#allocation2 + $0x710] sm:$0xff]  ;;  %v380_v15 = vld [vmem:[#allocation2 + $0x700] sm:$0xff] }
  0x72   :  { %437 = vmatpush1.msra.mxu0 %v180_v51  ;;  %515 = vmatprep.subr.mxu1 %v175_v52  ;;  %v375_v16 = vld [vmem:[#allocation2 + $0x6d8] sm:$0xff]  ;;  %v373_v17 = vld [vmem:[#allocation2 + $0x6c8] sm:$0xff]  ;;  %v374_v18 = vld [vmem:[#allocation2 + $0x6d0] sm:$0xff] }
  0x73   :  { %438 = vmatprep.subr.mxu0 %v173_v53  ;;  %516 = vmatpush1.msra.mxu1 %v174_v54  ;;  %v372_v19 = vld [vmem:[#allocation2 + $0x6c0] sm:$0xff]  ;;  %v367_v20 = vld [vmem:[#allocation2 + $0x698] sm:$0xff]  ;;  %v365_v21 = vld [vmem:[#allocation2 + $0x688] sm:$0xff] }
  0x74   :  { %439 = vmatpush1.msra.mxu0 %v172_v55  ;;  %517 = vmatprep.subr.mxu1 %v167_v56  ;;  %v366_v22 = vld [vmem:[#allocation2 + $0x690] sm:$0xff]  ;;  %v364_v23 = vld [vmem:[#allocation2 + $0x680] sm:$0xff]  ;;  %v359_v24 = vld [vmem:[#allocation2 + $0x658] sm:$0xff] }
  0x75   :  { %440 = vmatprep.subr.mxu0 %v165_v57  ;;  %518 = vmatpush1.msra.mxu1 %v166_v58  ;;  %v357_v25 = vld [vmem:[#allocation2 + $0x648] sm:$0xff]  ;;  %v358_v26 = vld [vmem:[#allocation2 + $0x650] sm:$0xff]  ;;  %v356_v27 = vld [vmem:[#allocation2 + $0x640] sm:$0xff] }
  0x76   :  { %441 = vmatpush1.msra.mxu0 %v164_v59  ;;  %519 = vmatprep.subr.mxu1 %v159_v60  ;;  %v351_v28 = vld [vmem:[#allocation2 + $0x618] sm:$0xff]  ;;  %v349_v29 = vld [vmem:[#allocation2 + $0x608] sm:$0xff]  ;;  %v350_v30 = vld [vmem:[#allocation2 + $0x610] sm:$0xff] }
  0x77   :  { %442 = vmatprep.subr.mxu0 %v157_v61  ;;  %520 = vmatpush1.msra.mxu1 %v158_v62  ;;  %v348_v31 = vld [vmem:[#allocation2 + $0x600] sm:$0xff]  ;;  %v343_v32 = vld [vmem:[#allocation2 + $0x5d8] sm:$0xff]  ;;  %v341_v33 = vld [vmem:[#allocation2 + $0x5c8] sm:$0xff] }
  0x78   :  { %443 = vmatpush1.msra.mxu0 %v156_v63  ;;  %521 = vmatprep.subr.mxu1 %v407_v0  ;;  %v342_v34 = vld [vmem:[#allocation2 + $0x5d0] sm:$0xff]  ;;  %v340_v35 = vld [vmem:[#allocation2 + $0x5c0] sm:$0xff]  ;;  %v335_v36 = vld [vmem:[#allocation2 + $0x598] sm:$0xff] }
  0x79   :  { %444 = vmatprep.subr.mxu0 %v405_v1  ;;  %522 = vmatpush2.msra.mxu1 %v406_v2  ;;  %v333_v37 = vld [vmem:[#allocation2 + $0x588] sm:$0xff]  ;;  %v334_v38 = vld [vmem:[#allocation2 + $0x590] sm:$0xff]  ;;  %v332_v39 = vld [vmem:[#allocation2 + $0x580] sm:$0xff] }
  0x7a   :  { %445 = vmatpush2.msra.mxu0 %v404_v3  ;;  %523 = vmatprep.subr.mxu1 %v399_v4  ;;  %v327_v40 = vld [vmem:[#allocation2 + $0x558] sm:$0xff]  ;;  %v325_v41 = vld [vmem:[#allocation2 + $0x548] sm:$0xff]  ;;  %v326_v42 = vld [vmem:[#allocation2 + $0x550] sm:$0xff] }
  0x7b   :  { %446 = vmatprep.subr.mxu0 %v397_v5  ;;  %524 = vmatpush2.msra.mxu1 %v398_v6  ;;  %v324_v43 = vld [vmem:[#allocation2 + $0x540] sm:$0xff]  ;;  %v319_v44 = vld [vmem:[#allocation2 + $0x518] sm:$0xff]  ;;  %v317_v45 = vld [vmem:[#allocation2 + $0x508] sm:$0xff] }
  0x7c   :  { %447 = vmatpush2.msra.mxu0 %v396_v7  ;;  %525 = vmatprep.subr.mxu1 %v391_v8  ;;  %v318_v46 = vld [vmem:[#allocation2 + $0x510] sm:$0xff]  ;;  %v316_v47 = vld [vmem:[#allocation2 + $0x500] sm:$0xff]  ;;  %v311_v48 = vld [vmem:[#allocation2 + $0x4d8] sm:$0xff] }
  0x7d   :  { %448 = vmatprep.subr.mxu0 %v389_v9  ;;  %526 = vmatpush2.msra.mxu1 %v390_v10  ;;  %v309_v49 = vld [vmem:[#allocation2 + $0x4c8] sm:$0xff]  ;;  %v310_v50 = vld [vmem:[#allocation2 + $0x4d0] sm:$0xff]  ;;  %v308_v51 = vld [vmem:[#allocation2 + $0x4c0] sm:$0xff] }
  0x7e   :  { %449 = vmatpush2.msra.mxu0 %v388_v11  ;;  %527 = vmatprep.subr.mxu1 %v383_v12  ;;  %v303_v52 = vld [vmem:[#allocation2 + $0x498] sm:$0xff]  ;;  %v301_v53 = vld [vmem:[#allocation2 + $0x488] sm:$0xff]  ;;  %v302_v54 = vld [vmem:[#allocation2 + $0x490] sm:$0xff] }
  0x7f   :  { %450 = vmatprep.subr.mxu0 %v381_v13  ;;  %528 = vmatpush2.msra.mxu1 %v382_v14  ;;  %v300_v55 = vld [vmem:[#allocation2 + $0x480] sm:$0xff]  ;;  %v295_v56 = vld [vmem:[#allocation2 + $0x458] sm:$0xff]  ;;  %v293_v57 = vld [vmem:[#allocation2 + $0x448] sm:$0xff] }
  0x80   :  { %451 = vmatpush2.msra.mxu0 %v380_v15  ;;  %529 = vmatprep.subr.mxu1 %v375_v16  ;;  %v294_v58 = vld [vmem:[#allocation2 + $0x450] sm:$0xff]  ;;  %v292_v59 = vld [vmem:[#allocation2 + $0x440] sm:$0xff]  ;;  %v287_v60 = vld [vmem:[#allocation2 + $0x418] sm:$0xff] }
  0x81   :  { %452 = vmatprep.subr.mxu0 %v373_v17  ;;  %530 = vmatpush2.msra.mxu1 %v374_v18  ;;  %v4873_v61 = vld [vmem:[%s6934_s0 + $0x8] sm:$0xff]  ;;  %v286_v62 = vld [vmem:[#allocation2 + $0x410] sm:$0xff]  ;;  %v4878_v0 = vld [vmem:[%s6934_s0] sm:$0xff] }
  0x82   :  { %453 = vmatpush2.msra.mxu0 %v372_v19  ;;  %531 = vmatprep.subr.mxu1 %v367_v20  ;;  %v285_v63 = vld [vmem:[#allocation2 + $0x408] sm:$0xff]  ;;  %v283_v1 = vld [vmem:[#allocation2 + $0x3f8] sm:$0xff]  ;;  %v284_v2 = vld [vmem:[#allocation2 + $0x400] sm:$0xff] }
  0x83   :  { %454 = vmatprep.subr.mxu0 %v365_v21  ;;  %532 = vmatpush2.msra.mxu1 %v366_v22  ;;  %v282_v3 = vld [vmem:[#allocation2 + $0x3f0] sm:$0xff]  ;;  %v281_v4 = vld [vmem:[#allocation2 + $0x3e8] sm:$0xff]  ;;  %v275_v5 = vld [vmem:[#allocation2 + $0x3b8] sm:$0xff] }
  0x84   :  { %455 = vmatpush2.msra.mxu0 %v364_v23  ;;  %533 = vmatprep.subr.mxu1 %v359_v24  ;;  %v280_v6 = vld [vmem:[#allocation2 + $0x3e0] sm:$0xff]  ;;  %v274_v7 = vld [vmem:[#allocation2 + $0x3b0] sm:$0xff]  ;;  %v273_v8 = vld [vmem:[#allocation2 + $0x3a8] sm:$0xff] }
  0x85   :  { %456 = vmatprep.subr.mxu0 %v357_v25  ;;  %534 = vmatpush2.msra.mxu1 %v358_v26  ;;  %v267_v9 = vld [vmem:[#allocation2 + $0x378] sm:$0xff]  ;;  %v272_v10 = vld [vmem:[#allocation2 + $0x3a0] sm:$0xff]  ;;  %v266_v11 = vld [vmem:[#allocation2 + $0x370] sm:$0xff] }
  0x86   :  { %457 = vmatpush2.msra.mxu0 %v356_v27  ;;  %535 = vmatprep.subr.mxu1 %v351_v28  ;;  %v265_v12 = vld [vmem:[#allocation2 + $0x368] sm:$0xff]  ;;  %v259_v13 = vld [vmem:[#allocation2 + $0x338] sm:$0xff]  ;;  %v264_v14 = vld [vmem:[#allocation2 + $0x360] sm:$0xff] }
  0x87   :  { %458 = vmatprep.subr.mxu0 %v349_v29  ;;  %536 = vmatpush2.msra.mxu1 %v350_v30  ;;  %v258_v15 = vld [vmem:[#allocation2 + $0x330] sm:$0xff]  ;;  %v257_v16 = vld [vmem:[#allocation2 + $0x328] sm:$0xff]  ;;  %v251_v17 = vld [vmem:[#allocation2 + $0x2f8] sm:$0xff] }
  0x88   :  { %459 = vmatpush2.msra.mxu0 %v348_v31  ;;  %537 = vmatprep.subr.mxu1 %v343_v32  ;;  %v256_v18 = vld [vmem:[#allocation2 + $0x320] sm:$0xff]  ;;  %v250_v19 = vld [vmem:[#allocation2 + $0x2f0] sm:$0xff]  ;;  %v249_v20 = vld [vmem:[#allocation2 + $0x2e8] sm:$0xff] }
  0x89   :  { %460 = vmatprep.subr.mxu0 %v341_v33  ;;  %538 = vmatpush2.msra.mxu1 %v342_v34  ;;  %v243_v21 = vld [vmem:[#allocation2 + $0x2b8] sm:$0xff]  ;;  %v248_v22 = vld [vmem:[#allocation2 + $0x2e0] sm:$0xff]  ;;  %v242_v23 = vld [vmem:[#allocation2 + $0x2b0] sm:$0xff] }
  0x8a   :  { %461 = vmatpush2.msra.mxu0 %v340_v35  ;;  %539 = vmatprep.subr.mxu1 %v335_v36  ;;  %v241_v24 = vld [vmem:[#allocation2 + $0x2a8] sm:$0xff]  ;;  %v235_v25 = vld [vmem:[#allocation2 + $0x278] sm:$0xff]  ;;  %v240_v26 = vld [vmem:[#allocation2 + $0x2a0] sm:$0xff] }
  0x8b   :  { %462 = vmatprep.subr.mxu0 %v333_v37  ;;  %540 = vmatpush2.msra.mxu1 %v334_v38  ;;  %v234_v27 = vld [vmem:[#allocation2 + $0x270] sm:$0xff]  ;;  %v233_v28 = vld [vmem:[#allocation2 + $0x268] sm:$0xff]  ;;  %v227_v29 = vld [vmem:[#allocation2 + $0x238] sm:$0xff] }
  0x8c   :  { %463 = vmatpush2.msra.mxu0 %v332_v39  ;;  %541 = vmatprep.subr.mxu1 %v327_v40  ;;  %v232_v30 = vld [vmem:[#allocation2 + $0x260] sm:$0xff]  ;;  %v226_v31 = vld [vmem:[#allocation2 + $0x230] sm:$0xff]  ;;  %v225_v32 = vld [vmem:[#allocation2 + $0x228] sm:$0xff] }
  0x8d   :  { %464 = vmatprep.subr.mxu0 %v325_v41  ;;  %542 = vmatpush2.msra.mxu1 %v326_v42  ;;  %v219_v33 = vld [vmem:[#allocation2 + $0x1f8] sm:$0xff]  ;;  %v224_v34 = vld [vmem:[#allocation2 + $0x220] sm:$0xff]  ;;  %v218_v35 = vld [vmem:[#allocation2 + $0x1f0] sm:$0xff] }
  0x8e   :  { %465 = vmatpush2.msra.mxu0 %v324_v43  ;;  %543 = vmatprep.subr.mxu1 %v319_v44  ;;  %v217_v36 = vld [vmem:[#allocation2 + $0x1e8] sm:$0xff]  ;;  %v211_v37 = vld [vmem:[#allocation2 + $0x1b8] sm:$0xff]  ;;  %v216_v38 = vld [vmem:[#allocation2 + $0x1e0] sm:$0xff] }
  0x8f   :  { %466 = vmatprep.subr.mxu0 %v317_v45  ;;  %544 = vmatpush2.msra.mxu1 %v318_v46  ;;  %v210_v39 = vld [vmem:[#allocation2 + $0x1b0] sm:$0xff]  ;;  %v209_v40 = vld [vmem:[#allocation2 + $0x1a8] sm:$0xff]  ;;  %v203_v41 = vld [vmem:[#allocation2 + $0x178] sm:$0xff] }
  0x90   :  { %467 = vmatpush2.msra.mxu0 %v316_v47  ;;  %545 = vmatprep.subr.mxu1 %v311_v48  ;;  %v208_v42 = vld [vmem:[#allocation2 + $0x1a0] sm:$0xff]  ;;  %v202_v43 = vld [vmem:[#allocation2 + $0x170] sm:$0xff]  ;;  %v201_v44 = vld [vmem:[#allocation2 + $0x168] sm:$0xff] }
  0x91   :  { %468 = vmatprep.subr.mxu0 %v309_v49  ;;  %546 = vmatpush2.msra.mxu1 %v310_v50  ;;  %v195_v45 = vld [vmem:[#allocation2 + $0x138] sm:$0xff]  ;;  %v200_v46 = vld [vmem:[#allocation2 + $0x160] sm:$0xff]  ;;  %v194_v47 = vld [vmem:[#allocation2 + $0x130] sm:$0xff] }
  0x92   :  { %469 = vmatpush2.msra.mxu0 %v308_v51  ;;  %547 = vmatprep.subr.mxu1 %v303_v52  ;;  %v193_v48 = vld [vmem:[#allocation2 + $0x128] sm:$0xff]  ;;  %v187_v49 = vld [vmem:[#allocation2 + $0xf8] sm:$0xff]  ;;  %v192_v50 = vld [vmem:[#allocation2 + $0x120] sm:$0xff] }
  0x93   :  { %470 = vmatprep.subr.mxu0 %v301_v53  ;;  %548 = vmatpush2.msra.mxu1 %v302_v54  ;;  %v186_v51 = vld [vmem:[#allocation2 + $0xf0] sm:$0xff]  ;;  %v185_v52 = vld [vmem:[#allocation2 + $0xe8] sm:$0xff]  ;;  %v179_v53 = vld [vmem:[#allocation2 + $0xb8] sm:$0xff] }
  0x94   :  { %471 = vmatpush2.msra.mxu0 %v300_v55  ;;  %549 = vmatprep.subr.mxu1 %v295_v56  ;;  %v184_v54 = vld [vmem:[#allocation2 + $0xe0] sm:$0xff]  ;;  %v178_v55 = vld [vmem:[#allocation2 + $0xb0] sm:$0xff]  ;;  %v177_v56 = vld [vmem:[#allocation2 + $0xa8] sm:$0xff] }
  0x95   :  { %472 = vmatprep.subr.mxu0 %v293_v57  ;;  %550 = vmatpush2.msra.mxu1 %v294_v58  ;;  %v171_v57 = vld [vmem:[#allocation2 + $0x78] sm:$0xff]  ;;  %v176_v58 = vld [vmem:[#allocation2 + $0xa0] sm:$0xff] }
  0x96   :  { %473 = vmatpush2.msra.mxu0 %v292_v59  ;;  %551 = vmatprep.subr.mxu1 %v287_v60  ;;  %v170_v59 = vld [vmem:[#allocation2 + $0x70] sm:$0xff]  ;;  %v169_v60 = vld [vmem:[#allocation2 + $0x68] sm:$0xff] }
  0x97   :  { %553 = vmatprep.mubr.f32.mxu1 %v4873_v61  ;;  %552 = vmatpush2.msra.mxu1 %v286_v62  ;;  %v163_v62 = vld [vmem:[#allocation2 + $0x38] sm:$0xff] }
  0x98   :  { %474 = vmatprep.subr.mxu0 %v285_v63  ;;  %554 = vmatmul.mubr.f32.vlgmr.msra.gmra.mxu1 %v4878_v0  ;;  %v168_v63 = vld [vmem:[#allocation2 + $0x60] sm:$0xff] }
  0x99   :  { %643 = vmatprep.subr.mxu1 %v283_v1  ;;  %475 = vmatpush2.msra.mxu0 %v284_v2  ;;  %v162_v1 = vld [vmem:[#allocation2 + $0x30] sm:$0xff]  ;;  %v161_v2 = vld [vmem:[#allocation2 + $0x28] sm:$0xff] }
  0x9a   :  { %644 = vmatpush1.msra.mxu1 %v282_v3  ;;  %476 = vmatprep.mubr.f32.mxu0 %v4873_v61  ;;  %v411_v3 = vld [vmem:[#allocation2 + $0x7f8] sm:$0xff] }
  0x9b   :  { %566 = vmatprep.subr.mxu0 %v281_v4  ;;  %645 = vmatprep.subr.mxu1 %v275_v5  ;;  %v160_v4 = vld [vmem:[#allocation2 + $0x20] sm:$0xff]  ;;  %v410_v5 = vld [vmem:[#allocation2 + $0x7f0] sm:$0xff] }
  0x9c   :  { %477 = vmatmul.mubr.f32.vlgmr.msra.gmra.mxu0 %v4878_v0  ;;  %646 = vmatpush1.msra.mxu1 %v274_v7  ;;  %v403_v7 = vld [vmem:[#allocation2 + $0x7b8] sm:$0xff] }
  0x9d   :  { %567 = vmatpush1.msra.mxu0 %v280_v6  ;;  %647 = vmatprep.subr.mxu1 %v267_v9  ;;  %v409_v6 = vld [vmem:[#allocation2 + $0x7e8] sm:$0xff]  ;;  %v402_v9 = vld [vmem:[#allocation2 + $0x7b0] sm:$0xff] }
  0x9e   :  { %568 = vmatprep.subr.mxu0 %v273_v8  ;;  %648 = vmatpush1.msra.mxu1 %v266_v11  ;;  %v408_v8 = vld [vmem:[#allocation2 + $0x7e0] sm:$0xff]  ;;  %v395_v11 = vld [vmem:[#allocation2 + $0x778] sm:$0xff] }
  0x9f   :  { %569 = vmatpush1.msra.mxu0 %v272_v10  ;;  %649 = vmatprep.subr.mxu1 %v259_v13  ;;  %v401_v10 = vld [vmem:[#allocation2 + $0x7a8] sm:$0xff]  ;;  %v394_v13 = vld [vmem:[#allocation2 + $0x770] sm:$0xff] }
  0xa0   :  { %570 = vmatprep.subr.mxu0 %v265_v12  ;;  %650 = vmatpush1.msra.mxu1 %v258_v15  ;;  %v400_v12 = vld [vmem:[#allocation2 + $0x7a0] sm:$0xff]  ;;  %v387_v15 = vld [vmem:[#allocation2 + $0x738] sm:$0xff] }
  0xa1   :  { %571 = vmatpush1.msra.mxu0 %v264_v14  ;;  %651 = vmatprep.subr.mxu1 %v251_v17  ;;  %v393_v14 = vld [vmem:[#allocation2 + $0x768] sm:$0xff]  ;;  %v386_v17 = vld [vmem:[#allocation2 + $0x730] sm:$0xff] }
  0xa2   :  { %572 = vmatprep.subr.mxu0 %v257_v16  ;;  %652 = vmatpush1.msra.mxu1 %v250_v19  ;;  %v392_v16 = vld [vmem:[#allocation2 + $0x760] sm:$0xff]  ;;  %v379_v19 = vld [vmem:[#allocation2 + $0x6f8] sm:$0xff] }
  0xa3   :  { %573 = vmatpush1.msra.mxu0 %v256_v18  ;;  %653 = vmatprep.subr.mxu1 %v243_v21  ;;  %v385_v18 = vld [vmem:[#allocation2 + $0x728] sm:$0xff]  ;;  %v378_v21 = vld [vmem:[#allocation2 + $0x6f0] sm:$0xff] }
  0xa4   :  { %574 = vmatprep.subr.mxu0 %v249_v20  ;;  %654 = vmatpush1.msra.mxu1 %v242_v23  ;;  %v384_v20 = vld [vmem:[#allocation2 + $0x720] sm:$0xff]  ;;  %v371_v23 = vld [vmem:[#allocation2 + $0x6b8] sm:$0xff] }
  0xa5   :  { %575 = vmatpush1.msra.mxu0 %v248_v22  ;;  %655 = vmatprep.subr.mxu1 %v235_v25  ;;  %v377_v22 = vld [vmem:[#allocation2 + $0x6e8] sm:$0xff]  ;;  %v370_v25 = vld [vmem:[#allocation2 + $0x6b0] sm:$0xff] }
  0xa6   :  { %576 = vmatprep.subr.mxu0 %v241_v24  ;;  %656 = vmatpush1.msra.mxu1 %v234_v27  ;;  %v376_v24 = vld [vmem:[#allocation2 + $0x6e0] sm:$0xff]  ;;  %v363_v27 = vld [vmem:[#allocation2 + $0x678] sm:$0xff] }
  0xa7   :  { %577 = vmatpush1.msra.mxu0 %v240_v26  ;;  %657 = vmatprep.subr.mxu1 %v227_v29  ;;  %v369_v26 = vld [vmem:[#allocation2 + $0x6a8] sm:$0xff]  ;;  %v362_v29 = vld [vmem:[#allocation2 + $0x670] sm:$0xff] }
  0xa8   :  { %578 = vmatprep.subr.mxu0 %v233_v28  ;;  %658 = vmatpush1.msra.mxu1 %v226_v31  ;;  %v368_v28 = vld [vmem:[#allocation2 + $0x6a0] sm:$0xff]  ;;  %v355_v31 = vld [vmem:[#allocation2 + $0x638] sm:$0xff] }
  0xa9   :  { %579 = vmatpush1.msra.mxu0 %v232_v30  ;;  %659 = vmatprep.subr.mxu1 %v219_v33  ;;  %v361_v30 = vld [vmem:[#allocation2 + $0x668] sm:$0xff]  ;;  %v354_v33 = vld [vmem:[#allocation2 + $0x630] sm:$0xff] }
  0xaa   :  { %580 = vmatprep.subr.mxu0 %v225_v32  ;;  %660 = vmatpush1.msra.mxu1 %v218_v35  ;;  %v360_v32 = vld [vmem:[#allocation2 + $0x660] sm:$0xff]  ;;  %v347_v35 = vld [vmem:[#allocation2 + $0x5f8] sm:$0xff] }
  0xab   :  { %581 = vmatpush1.msra.mxu0 %v224_v34  ;;  %661 = vmatprep.subr.mxu1 %v211_v37  ;;  %v353_v34 = vld [vmem:[#allocation2 + $0x628] sm:$0xff]  ;;  %v346_v37 = vld [vmem:[#allocation2 + $0x5f0] sm:$0xff] }
  0xac   :  { %582 = vmatprep.subr.mxu0 %v217_v36  ;;  %662 = vmatpush1.msra.mxu1 %v210_v39  ;;  %v352_v36 = vld [vmem:[#allocation2 + $0x620] sm:$0xff]  ;;  %v339_v39 = vld [vmem:[#allocation2 + $0x5b8] sm:$0xff] }
  0xad   :  { %583 = vmatpush1.msra.mxu0 %v216_v38  ;;  %663 = vmatprep.subr.mxu1 %v203_v41  ;;  %v345_v38 = vld [vmem:[#allocation2 + $0x5e8] sm:$0xff]  ;;  %v338_v41 = vld [vmem:[#allocation2 + $0x5b0] sm:$0xff] }
  0xae   :  { %584 = vmatprep.subr.mxu0 %v209_v40  ;;  %664 = vmatpush1.msra.mxu1 %v202_v43  ;;  %v344_v40 = vld [vmem:[#allocation2 + $0x5e0] sm:$0xff]  ;;  %v331_v43 = vld [vmem:[#allocation2 + $0x578] sm:$0xff] }
  0xaf   :  { %585 = vmatpush1.msra.mxu0 %v208_v42  ;;  %665 = vmatprep.subr.mxu1 %v195_v45  ;;  %v337_v42 = vld [vmem:[#allocation2 + $0x5a8] sm:$0xff]  ;;  %v330_v45 = vld [vmem:[#allocation2 + $0x570] sm:$0xff] }
  0xb0   :  { %586 = vmatprep.subr.mxu0 %v201_v44  ;;  %666 = vmatpush1.msra.mxu1 %v194_v47  ;;  %v336_v44 = vld [vmem:[#allocation2 + $0x5a0] sm:$0xff]  ;;  %v323_v47 = vld [vmem:[#allocation2 + $0x538] sm:$0xff] }
  0xb1   :  { %587 = vmatpush1.msra.mxu0 %v200_v46  ;;  %667 = vmatprep.subr.mxu1 %v187_v49  ;;  %v329_v46 = vld [vmem:[#allocation2 + $0x568] sm:$0xff]  ;;  %v322_v49 = vld [vmem:[#allocation2 + $0x530] sm:$0xff] }
  0xb2   :  { %588 = vmatprep.subr.mxu0 %v193_v48  ;;  %668 = vmatpush1.msra.mxu1 %v186_v51  ;;  %v328_v48 = vld [vmem:[#allocation2 + $0x560] sm:$0xff]  ;;  %v315_v51 = vld [vmem:[#allocation2 + $0x4f8] sm:$0xff] }
  0xb3   :  { %589 = vmatpush1.msra.mxu0 %v192_v50  ;;  %669 = vmatprep.subr.mxu1 %v179_v53  ;;  %v321_v50 = vld [vmem:[#allocation2 + $0x528] sm:$0xff]  ;;  %v320_v53 = vld [vmem:[#allocation2 + $0x520] sm:$0xff] }
  0xb4   :  { %590 = vmatprep.subr.mxu0 %v185_v52  ;;  %670 = vmatpush1.msra.mxu1 %v178_v55  ;;  %v155_v52 = vld [vmem:[%s6934_s0 + $0x18] sm:$0xff]  ;;  %v313_v55 = vld [vmem:[#allocation2 + $0x4e8] sm:$0xff] }
  0xb5   :  { %591 = vmatpush1.msra.mxu0 %v184_v54  ;;  %671 = vmatprep.subr.mxu1 %v171_v57  ;;  %v314_v54 = vld [vmem:[#allocation2 + $0x4f0] sm:$0xff]  ;;  %v307_v57 = vld [vmem:[#allocation2 + $0x4b8] sm:$0xff] }
  0xb6   :  { %592 = vmatprep.subr.mxu0 %v177_v56  ;;  %672 = vmatpush1.msra.mxu1 %v170_v59  ;;  %v154_v56 = vld [vmem:[%s6934_s0 + $0x10] sm:$0xff]  ;;  %s6937_s0 = sld [smem:[#allocation65_spill]] }
  0xb7   :  { %593 = vmatpush1.msra.mxu0 %v176_v58  ;;  %673 = vmatprep.subr.mxu1 %v163_v62  ;;  %v312_v58 = vld [vmem:[#allocation2 + $0x4e0] sm:$0xff]  ;;  %v306_v59 = vld [vmem:[#allocation2 + $0x4b0] sm:$0xff]  ;;  %v299_v62 = vld [vmem:[#allocation2 + $0x478] sm:$0xff] }
  0xb8   :  { %594 = vmatprep.subr.mxu0 %v169_v60  ;;  %674 = vmatpush1.msra.mxu1 %v162_v1  ;;  %v305_v60 = vld [vmem:[#allocation2 + $0x4a8] sm:$0xff]  ;;  %v298_v1 = vld [vmem:[#allocation2 + $0x470] sm:$0xff] }
  0xb9   :  { %595 = vmatpush1.msra.mxu0 %v168_v63  ;;  %675 = vmatprep.subr.mxu1 %v411_v3  ;;  %v304_v63 = vld [vmem:[#allocation2 + $0x4a0] sm:$0xff]  ;;  %v291_v3 = vld [vmem:[#allocation2 + $0x438] sm:$0xff] }
  0xba   :  { %596 = vmatprep.subr.mxu0 %v161_v2  ;;  %676 = vmatpush2.msra.mxu1 %v410_v5  ;;  %v297_v2 = vld [vmem:[#allocation2 + $0x468] sm:$0xff]  ;;  %v290_v5 = vld [vmem:[#allocation2 + $0x430] sm:$0xff] }
  0xbb   :  { %597 = vmatpush1.msra.mxu0 %v160_v4  ;;  %677 = vmatprep.subr.mxu1 %v403_v7  ;;  %v296_v4 = vld [vmem:[#allocation2 + $0x460] sm:$0xff] }
  0xbc   :  { %598 = vmatprep.subr.mxu0 %v409_v6  ;;  %678 = vmatpush2.msra.mxu1 %v402_v9  ;;  %v289_v6 = vld [vmem:[#allocation2 + $0x428] sm:$0xff]  ;;  %v288_v7 = vld [vmem:[#allocation2 + $0x420] sm:$0xff] }
  0xbd   :  { %599 = vmatpush2.msra.mxu0 %v408_v8  ;;  %679 = vmatprep.subr.mxu1 %v395_v11 }
  0xbe   :  { %600 = vmatprep.subr.mxu0 %v401_v10  ;;  %680 = vmatpush2.msra.mxu1 %v394_v13 }
  0xbf   :  { %601 = vmatpush2.msra.mxu0 %v400_v12  ;;  %681 = vmatprep.subr.mxu1 %v387_v15 }
  0xc0   :  { %602 = vmatprep.subr.mxu0 %v393_v14  ;;  %682 = vmatpush2.msra.mxu1 %v386_v17 }
  0xc1   :  { %603 = vmatpush2.msra.mxu0 %v392_v16  ;;  %683 = vmatprep.subr.mxu1 %v379_v19 }
  0xc2   :  { %604 = vmatprep.subr.mxu0 %v385_v18  ;;  %684 = vmatpush2.msra.mxu1 %v378_v21 }
  0xc3   :  { %605 = vmatpush2.msra.mxu0 %v384_v20  ;;  %685 = vmatprep.subr.mxu1 %v371_v23  ;;  %v913_v23 = vld [vmem:[%s6936_s14 + $0x78] sm:$0xff] }
  0xc4   :  { %606 = vmatprep.subr.mxu0 %v377_v22  ;;  %686 = vmatpush2.msra.mxu1 %v370_v25  ;;  %v801_v22 = vld [vmem:[%s6935_s10] sm:$0xff]  ;;  %v912_v25 = vld [vmem:[%s6936_s14 + $0x70] sm:$0xff] }
  0xc5   :  { %607 = vmatpush2.msra.mxu0 %v376_v24  ;;  %687 = vmatprep.subr.mxu1 %v363_v27  ;;  %v4683_v24 = vmov 0   ;;  %v910_v27 = vld [vmem:[%s6936_s14 + $0x60] sm:$0xff] }
  0xc6   :  { %608 = vmatprep.subr.mxu0 %v369_v26  ;;  %688 = vmatpush2.msra.mxu1 %v362_v29  ;;  %v911_v26 = vld [vmem:[%s6936_s14 + $0x68] sm:$0xff]  ;;  %v908_v29 = vld [vmem:[%s6936_s14 + $0x50] sm:$0xff] }
  0xc7   :  { %609 = vmatpush2.msra.mxu0 %v368_v28  ;;  %689 = vmatprep.subr.mxu1 %v355_v31  ;;  %v909_v28 = vld [vmem:[%s6936_s14 + $0x58] sm:$0xff]  ;;  %v907_v31 = vld [vmem:[%s6936_s14 + $0x48] sm:$0xff] }
  0xc8   :  { %610 = vmatprep.subr.mxu0 %v361_v30  ;;  %690 = vmatpush2.msra.mxu1 %v354_v33  ;;  %v804_v30 = vld [vmem:[#allocation4 + $0x8] sm:$0xff]  ;;  %v803_v33 = vld [vmem:[#allocation4] sm:$0xff] }
  0xc9   :  { %611 = vmatpush2.msra.mxu0 %v360_v32  ;;  %691 = vmatprep.subr.mxu1 %v347_v35  ;;  %v906_v32 = vld [vmem:[%s6936_s14 + $0x40] sm:$0xff]  ;;  %v904_v35 = vld [vmem:[%s6936_s14 + $0x30] sm:$0xff] }
  0xca   :  { %612 = vmatprep.subr.mxu0 %v353_v34  ;;  %692 = vmatpush2.msra.mxu1 %v346_v37  ;;  %v905_v34 = vld [vmem:[%s6936_s14 + $0x38] sm:$0xff] }
  0xcb   :  { %613 = vmatpush2.msra.mxu0 %v352_v36  ;;  %693 = vmatprep.subr.mxu1 %v339_v39 }
  0xcc   :  { %614 = vmatprep.subr.mxu0 %v345_v38  ;;  %694 = vmatpush2.msra.mxu1 %v338_v41 }
  0xcd   :  { %615 = vmatpush2.msra.mxu0 %v344_v40  ;;  %695 = vmatprep.subr.mxu1 %v331_v43 }
  0xce   :  { %616 = vmatprep.subr.mxu0 %v337_v42  ;;  %696 = vmatpush2.msra.mxu1 %v330_v45 }
  0xcf   :  { %617 = vmatpush2.msra.mxu0 %v336_v44  ;;  %697 = vmatprep.subr.mxu1 %v323_v47 }
  0xd0   :  { %618 = vmatprep.subr.mxu0 %v329_v46  ;;  %698 = vmatpush2.msra.mxu1 %v322_v49 }
  0xd1   :  { %619 = vmatpush2.msra.mxu0 %v328_v48  ;;  %699 = vmatprep.subr.mxu1 %v315_v51 }
  0xd2   :  { %620 = vmatprep.subr.mxu0 %v321_v50  ;;  %559 = vmatprep.mubr.f32.mxu1 %v155_v52 }
  0xd3   :  { %621 = vmatpush2.msra.mxu0 %v320_v53  ;;  %700 = vmatpush2.msra.mxu1 %v314_v54 }
  0xd4   :  { %622 = vmatprep.subr.mxu0 %v313_v55  ;;  %560 = vmatmul.mubr.f32.gmra.mxu1 %v154_v56 }
  0xd5   :  { %701 = vmatprep.subr.mxu1 %v307_v57  ;;  %623 = vmatpush2.msra.mxu0 %v312_v58 }
  0xd6   :  { %702 = vmatpush2.msra.mxu1 %v306_v59  ;;  %624 = vmatprep.subr.mxu0 %v305_v60 }
  0xd7   :  { %703 = vmatprep.subr.mxu1 %v299_v62  ;;  %482 = vmatprep.mubr.f32.mxu0 %v155_v52 }
  0xd8   :  { %625 = vmatpush2.msra.mxu0 %v304_v63  ;;  %704 = vmatpush2.msra.mxu1 %v298_v1 }
  0xd9   :  { %483 = vmatmul.mubr.f32.gmra.mxu0 %v154_v56  ;;  %626 = vmatprep.subr.mxu0 %v297_v2 }
  0xda   :  { %705 = vmatprep.subr.mxu1 %v291_v3  ;;  %627 = vmatpush2.msra.mxu0 %v296_v4 }
  0xdb   :  { %706 = vmatpush2.msra.mxu1 %v290_v5  ;;  %707 = vmatprep.mubr.f32.mxu1 %v4873_v61 }
  0xdc   :  { %628 = vmatprep.subr.mxu0 %v289_v6  ;;  %708 = vmatmul.mubr.f32.vlgmr.msra.gmra.mxu1 %v4878_v0  ;;  %v802_v6 = vld [vmem:[%s6935_s10 + $0x8] sm:$0xff]  ;;  %s4698_s10 = smov 127  }
  0xdd   :  { %629 = vmatpush2.msra.mxu0 %v288_v7  ;;  %630 = vmatprep.mubr.f32.mxu0 %v4873_v61  ;;  %v903_v7 = vld [vmem:[%s6936_s14 + $0x28] sm:$0xff] }
  0xde   :  { %713 = vmatprep.mubr.f32.mxu1 %v155_v52  ;;  %631 = vmatmul.mubr.f32.vlgmr.msra.gmra.mxu0 %v4878_v0 }
  0xdf   :  { %636 = vmatprep.mubr.f32.mxu0 %v155_v52  ;;  %4542 = vset.pattern.permute.xlu1 %v4683_v24 }
  0xe0   :  { %714 = vmatmul.mubr.f32.gmra.mxu1 %v154_v56  ;;  %4541 = vset.pattern.permute.xlu0 %v4683_v24 }
  0xe1   :  { %938 = vmatprep.subr.mxu1 %v913_v23 }
  0xe2   :  { %637 = vmatmul.mubr.f32.gmra.mxu0 %v154_v56  ;;  %939 = vmatpush1.msra.mxu1 %v912_v25 }
  0xe3   :  { %4415 = vmatprep.mubr.f32.mxu0 %v801_v22  ;;  %940 = vmatprep.subr.mxu1 %v911_v26 }
  0xe4   :  { %941 = vmatpush1.msra.mxu1 %v910_v27 }
  0xe5   :  { %942 = vmatprep.subr.mxu1 %v909_v28 }
  0xe6   :  { %943 = vmatpush1.msra.mxu1 %v908_v29 }
  0xe7   :  { %944 = vmatprep.subr.mxu1 %v907_v31  ;;  %v1229_v31 = vld [vmem:[%s6937_s0 + $0x8] sm:$0xff] }
  0xe8   :  { %945 = vmatpush1.msra.mxu1 %v906_v32 }
  0xe9   :  { %946 = vmatprep.subr.mxu1 %v905_v34 }
  0xea   :  { %947 = vmatpush1.msra.mxu1 %v904_v35 }
  0xeb   :  { %948 = vmatprep.subr.mxu1 %v903_v7 }
 0x158   :  { %v4894_v8 = vpop.f32.mrf.mxu1 }
 0x15a   :  { %v4898_v10 = vpop.f32.mrf.mxu1 }
 0x15c   :  { %v4896_v9 = vpop.f32.mrf.mxu0 }
 0x15e   :  { %v4900_v11 = vpop.f32.mrf.mxu0 }
 0x194   :  { %v4902_v12 = vpop.f32.mrf.mxu1 }
 0x196   :  { %v4906_v14 = vpop.f32.mrf.mxu1 }
 0x199   :  { %v4904_v13 = vpop.f32.mrf.mxu0 }
 0x19b   :  { %v4908_v61 = vpop.f32.mrf.mxu0 }
 0x19c   :  { %v4910_v0 = vpop.f32.mrf.mxu1 }
 0x19d   :  { %787 = vrot.lane.b32.xlu1 %v4910_v0, %s6896_s24 }
 0x19e   :  { %v4914_v15 = vpop.f32.mrf.mxu0  ;;  %v711_v16 = vpop.f32.mrf.mxu1 }
 0x19f   :  { %797 = vrot.lane.b32.xlu0 %v711_v16, %s6896_s24 }
 0x1a0   :  { %v4917_v17 = vpop.f32.mrf.mxu0  ;;  %v715_v18 = vpop.f32.mrf.mxu1 }
 0x1a1   :  { %782 = vrot.lane.b32.xlu1 %v715_v18, %s6896_s24 }
 0x1a2   :  { %v4920_v19 = vpop.f32.mrf.mxu0  ;;  %v717_v20 = vpop.f32.mrf.mxu1 }
 0x1a3   :  { %792 = vrot.lane.b32.xlu0 %v717_v20, %s6896_s24 }
 0x1a4   :  { %v4923_v21 = vpop.f32.mrf.mxu0 }
 0x1a5   :  { %772 = vrot.lane.b32.xlu1 %v4923_v21, %s6896_s24 }
 0x1a7   :  { %777 = vrot.lane.b32.xlu0 %v4917_v17, %s6896_s24 }
 0x1a9   :  { %762 = vrot.lane.b32.xlu1 %v4920_v19, %s6896_s24 }
 0x1ab   :  { %767 = vrot.lane.b32.xlu0 %v4914_v15, %s6896_s24 }
 0x1ad   :  { %752 = vrot.lane.b32.xlu1 %v4906_v14, %s6896_s24 }
 0x1af   :  { %757 = vrot.lane.b32.xlu0 %v4898_v10, %s6896_s24 }
 0x1b1   :  { %742 = vrot.lane.b32.xlu1 %v4902_v12, %s6896_s24 }
 0x1b3   :  { %747 = vrot.lane.b32.xlu0 %v4894_v8, %s6896_s24 }
 0x1b5   :  { %732 = vrot.lane.b32.xlu1 %v4908_v61, %s6896_s24 }
 0x1b7   :  { %737 = vrot.lane.b32.xlu0 %v4900_v11, %s6896_s24 }
 0x1b9   :  { %721 = vrot.lane.b32.xlu1 %v4904_v13, %s6896_s24 }
 0x1bb   :  { %727 = vrot.lane.b32.xlu0 %v4896_v9, %s6896_s24 }
 0x1bd   :  { %812 = vperm.xlu1 %4542, %v804_v30   ;;  %v1231_v30 = vld [vmem:[%s6937_s0 + $0x18] sm:$0xff] }
 0x1bf   :  { %807 = vperm.xlu0 %4541, %v803_v33  }
 0x20f   :  { %v788_v36 = vpop.permute.xlu1 %787 }
 0x210   :  { %v790_v43 = vsel %vm724_vm0, %v788_v36, %v715_v18 }
 0x211   :  { %v798_v37 = vpop.permute.xlu0 %797 }
 0x212   :  { %v800_v38 = vsel %vm724_vm0, %v798_v37, %v717_v20 }
 0x213   :  { %v783_v39 = vpop.permute.xlu1 %782  ;;  %4383 = vmatprep.subr.mxu0 %v800_v38 }
 0x214   :  { %4384 = vmatpush3.msra.mxu0 %v800_v38  ;;  %v785_v45 = vsel %vm724_vm0, %v4910_v0, %v783_v39  ;;  %v1221_v39 = vld [vmem:[%s6938_s1 + $0x8] sm:$0xff] }
 0x215   :  { %v793_v40 = vpop.permute.xlu0 %792 }
 0x216   :  { %v795_v41 = vsel %vm724_vm0, %v711_v16, %v793_v40 }
 0x217   :  { %4385 = vmatprep.subr.mxu0 %v795_v41  ;;  %v773_v42 = vpop.permute.xlu1 %772 }
 0x218   :  { %4386 = vmatpush3.msra.mxu0 %v795_v41  ;;  %v775_v49 = vsel %vm724_vm0, %v4917_v17, %v773_v42  ;;  %v1230_v42 = vld [vmem:[%s6937_s0 + $0x10] sm:$0xff] }
 0x219   :  { %4387 = vmatprep.subr.mxu0 %v790_v43  ;;  %v778_v44 = vpop.permute.xlu0 %777 }
 0x21a   :  { %4388 = vmatpush3.msra.mxu0 %v790_v43  ;;  %v780_v47 = vsel %vm724_vm0, %v778_v44, %v4923_v21  ;;  %v1228_v44 = vld [vmem:[%s6937_s0] sm:$0xff]  ;;  %s4697_s0 = smov 31  }
 0x21b   :  { %4389 = vmatprep.subr.mxu0 %v785_v45  ;;  %v763_v46 = vpop.permute.xlu1 %762 }
 0x21c   :  { %4390 = vmatpush3.msra.mxu0 %v785_v45  ;;  %v765_v53 = vsel %vm724_vm0, %v4914_v15, %v763_v46 }
 0x21d   :  { %v768_v48 = vpop.permute.xlu0 %767  ;;  %4391 = vmatprep.subr.mxu0 %v780_v47 }
 0x21e   :  { %4392 = vmatpush3.msra.mxu0 %v780_v47  ;;  %v770_v51 = vsel %vm724_vm0, %v768_v48, %v4920_v19 }
 0x21f   :  { %v753_v50 = vpop.permute.xlu1 %752  ;;  %4393 = vmatprep.subr.mxu0 %v775_v49 }
 0x220   :  { %4394 = vmatpush3.msra.mxu0 %v775_v49  ;;  %v755_v57 = vsel %vm724_vm0, %v4898_v10, %v753_v50  ;;  %v900_v10 = vld [vmem:[%s6936_s14 + $0x10] sm:$0xff] }
 0x221   :  { %v758_v52 = vpop.permute.xlu0 %757  ;;  %4395 = vmatprep.subr.mxu0 %v770_v51 }
 0x222   :  { %4396 = vmatpush3.msra.mxu0 %v770_v51  ;;  %v760_v55 = vsel %vm724_vm0, %v758_v52, %v4906_v14 }
 0x223   :  { %v743_v54 = vpop.permute.xlu1 %742  ;;  %4397 = vmatprep.subr.mxu0 %v765_v53 }
 0x224   :  { %4398 = vmatpush3.msra.mxu0 %v765_v53  ;;  %v745_v62 = vsel %vm724_vm0, %v4894_v8, %v743_v54  ;;  %v902_v8 = vld [vmem:[%s6936_s14 + $0x20] sm:$0xff] }
 0x225   :  { %v748_v56 = vpop.permute.xlu0 %747  ;;  %4399 = vmatprep.subr.mxu0 %v760_v55  ;;  %949 = vmatpush1.msra.mxu1 %v902_v8 }
 0x226   :  { %4400 = vmatpush3.msra.mxu0 %v760_v55  ;;  %v750_v58 = vsel %vm724_vm0, %v748_v56, %v4902_v12  ;;  %v898_v12 = vld [vmem:[%s6936_s14] sm:$0xff] }
 0x227   :  { %4401 = vmatprep.subr.mxu0 %v755_v57  ;;  %v733_v59 = vpop.permute.xlu1 %732 }
 0x228   :  { %4402 = vmatpush3.msra.mxu0 %v755_v57  ;;  %v735_v2 = vsel %vm724_vm0, %v4900_v11, %v733_v59  ;;  %v899_v11 = vld [vmem:[%s6936_s14 + $0x8] sm:$0xff] }
 0x229   :  { %v738_v60 = vpop.permute.xlu0 %737  ;;  %4403 = vmatprep.subr.mxu0 %v750_v58 }
 0x22a   :  { %4404 = vmatpush3.msra.mxu0 %v750_v58  ;;  %v740_v63 = vsel %vm724_vm0, %v738_v60, %v4908_v61 }
 0x22b   :  { %4405 = vmatprep.subr.mxu0 %v745_v62  ;;  %v722_v3 = vpop.permute.xlu1 %721 }
 0x22c   :  { %4406 = vmatpush3.msra.mxu0 %v745_v62  ;;  %v725_v5 = vsel %vm724_vm0, %v4896_v9, %v722_v3  ;;  %v901_v9 = vld [vmem:[%s6936_s14 + $0x18] sm:$0xff]  ;;  %s6890_s14 = smov 32  }
 0x22d   :  { %v728_v1 = vpop.permute.xlu0 %727  ;;  %4407 = vmatprep.subr.mxu0 %v740_v63  ;;  %950 = vmatprep.subr.mxu1 %v901_v9 }
 0x22e   :  { %4408 = vmatpush3.msra.mxu0 %v740_v63  ;;  %v730_v4 = vsel %vm724_vm0, %v728_v1, %v4904_v13  ;;  %951 = vmatpush1.msra.mxu1 %v900_v10  ;;  %v6908_v13 = vmov 0.0  }
 0x22f   :  { %4409 = vmatprep.subr.mxu0 %v735_v2  ;;  %952 = vmatprep.subr.mxu1 %v899_v11 }
 0x230   :  { %4410 = vmatpush3.msra.mxu0 %v735_v2  ;;  %953 = vmatpush1.msra.mxu1 %v898_v12 }
 0x231   :  { %4411 = vmatprep.subr.mxu0 %v730_v4  ;;  %986 = vmatprep.mubr.f32.mxu1 %v6908_v13 }
 0x232   :  { %4412 = vmatpush3.msra.mxu0 %v730_v4 }
 0x233   :  { %4413 = vmatprep.subr.mxu0 %v725_v5 }
 0x234   :  { %4414 = vmatpush3.msra.mxu0 %v725_v5 }
 0x235   :  { %4416 = vmatmul.mubr.f32.vlgmr.msra.gmra.mxu0 %v802_v6 }
 0x238   :  { %v813_v14 = vpop.permute.xlu1 %812 }
 0x23a   :  { %v808_v0 = vpop.permute.xlu0 %807 }
 0x2f5   :  { %v4417_v61 = vpop.f32.mrf.mxu0 }
 0x2f6   :  { %v887_v15 = vadd.f32 %v4417_v61, %v813_v14 }
 0x2f7   :  { %v881_v16 = vpop.f32.mrf.mxu0 }
 0x2f8   :  { %v891_v17 = vmax.f32 %v887_v15, 0.0  ;;  %v882_v18 = vadd.f32 %v881_v16, %v808_v0 }
 0x2fa   :  { %v890_v19 = vmax.f32 %v882_v18, 0.0  ;;  %896 = vrot.lane.b32.xlu0 %v891_v17, %s6896_s24 }
 0x2fc   :  { %894 = vrot.lane.b32.xlu1 %v890_v19, %s6896_s24  ;;  %4012 = vmatmul.mubr.msk.f32.vlgmr.msra.gmra.mxu1 %vm724_vm0, %v890_v19 }
 0x2fd   :  { %992 = vmatprep.mubr.f32.mxu1 %v6908_v13 }
 0x300   :  { %4013 = vmatmul.mubr.msk.f32.gmra.mxu1 %vm724_vm0, %v891_v17 }
 0x301   :  { %998 = vmatprep.mubr.f32.mxu1 %v6908_v13 }
 0x36c   :  { %v897_v21 = vpop.permute.xlu0 %896 }
 0x36e   :  { %v895_v20 = vpop.permute.xlu1 %894 }
 0x36f   :  { %4014 = vmatmul.mubr.msk.f32.gmra.mxu1 %vm724_vm0, %v895_v20 }
 0x370   :  { %1004 = vmatprep.mubr.f32.mxu1 %v6908_v13 }
 0x373   :  { %4015 = vmatmul.mubr.msk.f32.gmra.mxu1 %vm724_vm0, %v897_v21 }
 0x374   :  { %1316 = vmatprep.mubr.f32.mxu1 %v1221_v39 }
 0x3bc   :  { %v5042_v22 = vpop.f32.mrf.mxu1 }
 0x3bd   :  { %1102 = vrot.lane.b32.xlu1 %v5042_v22, %s6892_s25 }
 0x3be   :  { %v5046_v23 = vpop.f32.mrf.mxu1 }
 0x3c0   :  { %v5048_v24 = vpop.f32.mrf.mxu1 }
 0x3c1   :  { %1088 = vrot.lane.b32.xlu1 %v5042_v22, %s6890_s14  ;;  %1026 = vrot.lane.b32.xlu0 %v5048_v24, %s6904_s2 }
 0x3c2   :  { %v5088_v25 = vpop.f32.mrf.mxu1 }
 0x3c5   :  { %1074 = vrot.lane.b32.xlu1 %v5042_v22, %s6888_s6 }
 0x3c9   :  { %1060 = vrot.lane.b32.xlu1 %v5042_v22, %s6896_s24 }
 0x3cd   :  { %1046 = vrot.lane.b32.xlu1 %v5042_v22, %s4688_s29 }
 0x3d1   :  { %1032 = vrot.lane.b32.xlu1 %v5042_v22, %s6919_s7 }
 0x3d5   :  { %1206 = vrot.lane.b32.xlu1 %v5046_v23, %s6892_s25 }
 0x3d9   :  { %1192 = vrot.lane.b32.xlu1 %v5046_v23, %s6890_s14 }
 0x3dd   :  { %1178 = vrot.lane.b32.xlu1 %v5046_v23, %s6888_s6 }
 0x3e1   :  { %1164 = vrot.lane.b32.xlu1 %v5046_v23, %s6896_s24 }
 0x3e5   :  { %1150 = vrot.lane.b32.xlu1 %v5046_v23, %s4688_s29 }
 0x3e9   :  { %1136 = vrot.lane.b32.xlu1 %v5046_v23, %s6919_s7 }
 0x3ed   :  { %1128 = vrot.lane.b32.xlu1 %v5046_v23, %s6904_s2 }
 0x3f1   :  { %1104 = vrot.lane.b32.xlu1 %v5048_v24, %s6892_s25 }
 0x3f5   :  { %1090 = vrot.lane.b32.xlu1 %v5048_v24, %s6890_s14 }
 0x3f9   :  { %1076 = vrot.lane.b32.xlu1 %v5048_v24, %s6888_s6 }
 0x3fd   :  { %1062 = vrot.lane.b32.xlu1 %v5048_v24, %s6896_s24 }
 0x401   :  { %1048 = vrot.lane.b32.xlu1 %v5048_v24, %s4688_s29 }
 0x405   :  { %1034 = vrot.lane.b32.xlu1 %v5048_v24, %s6919_s7 }
 0x409   :  { %1208 = vrot.lane.b32.xlu1 %v5088_v25, %s6892_s25 }
 0x40d   :  { %1194 = vrot.lane.b32.xlu1 %v5088_v25, %s6890_s14 }
 0x411   :  { %1180 = vrot.lane.b32.xlu1 %v5088_v25, %s6888_s6 }
 0x415   :  { %1166 = vrot.lane.b32.xlu1 %v5088_v25, %s6896_s24 }
 0x419   :  { %1152 = vrot.lane.b32.xlu1 %v5088_v25, %s4688_s29 }
 0x41d   :  { %1138 = vrot.lane.b32.xlu1 %v5088_v25, %s6919_s7 }
 0x421   :  { %1130 = vrot.lane.b32.xlu1 %v5088_v25, %s6904_s2 }
 0x42f   :  { %v5104_v26 = vpop.f32.mrf.mxu1  ;;  %v5150_v32 = vpop.permute.xlu1 %1102 }
 0x430   :  { %1108 = vrot.lane.b32.xlu0 %v5104_v26, %s6890_s14 }
 0x431   :  { %v5108_v27 = vpop.f32.mrf.mxu1 }
 0x433   :  { %v5110_v28 = vpop.f32.mrf.mxu1  ;;  %v5154_v33 = vpop.permute.xlu1 %1088 }
 0x434   :  { %1094 = vrot.lane.b32.xlu0 %v5104_v26, %s6888_s6  ;;  %v5201_v45 = vpop.permute.xlu0 %1026 }
 0x435   :  { %v5114_v29 = vpop.f32.mrf.mxu1 }
 0x436   :  { %1120 = vrot.lane.b32.xlu1 %v5114_v29, %s6892_s25 }
 0x437   :  { %v5160_v34 = vpop.permute.xlu1 %1074 }
 0x438   :  { %1080 = vrot.lane.b32.xlu0 %v5104_v26, %s6896_s24 }
 0x43a   :  { %1118 = vrot.lane.b32.xlu1 %v5108_v27, %s6892_s25 }
 0x43b   :  { %v5164_v35 = vpop.permute.xlu1 %1060 }
 0x43c   :  { %1066 = vrot.lane.b32.xlu0 %v5104_v26, %s4688_s29 }
 0x43e   :  { %1249 = vperm.xlu1 %4542, %v1231_v30  }
 0x43f   :  { %v5170_v36 = vpop.permute.xlu1 %1046 }
 0x440   :  { %1052 = vrot.lane.b32.xlu0 %v5104_v26, %s6919_s7 }
 0x442   :  { %1239 = vperm.xlu1 %4542, %v1229_v31  }
 0x443   :  { %v5174_v37 = vpop.permute.xlu1 %1032 }
 0x444   :  { %1038 = vrot.lane.b32.xlu0 %v5104_v26, %s6904_s2 }
 0x447   :  { %v1207_v38 = vpop.permute.xlu1 %1206 }
 0x448   :  { %1212 = vrot.lane.b32.xlu0 %v5108_v27, %s6890_s14 }
 0x44b   :  { %v1193_v40 = vpop.permute.xlu1 %1192 }
 0x44c   :  { %1198 = vrot.lane.b32.xlu0 %v5108_v27, %s6888_s6 }
 0x44f   :  { %v5189_v41 = vpop.permute.xlu1 %1178 }
 0x450   :  { %1184 = vrot.lane.b32.xlu0 %v5108_v27, %s6896_s24 }
 0x453   :  { %v5196_v43 = vpop.permute.xlu1 %1164 }
 0x454   :  { %1170 = vrot.lane.b32.xlu0 %v5108_v27, %s4688_s29 }
 0x457   :  { %v5203_v46 = vpop.permute.xlu1 %1150 }
 0x458   :  { %1156 = vrot.lane.b32.xlu0 %v5108_v27, %s6919_s7 }
 0x45b   :  { %v5205_v49 = vpop.permute.xlu1 %1136 }
 0x45c   :  { %1142 = vrot.lane.b32.xlu0 %v5108_v27, %s6904_s2 }
 0x45f   :  { %v5207_v51 = vpop.permute.xlu1 %1128 }
 0x460   :  { %1110 = vrot.lane.b32.xlu0 %v5110_v28, %s6890_s14 }
 0x463   :  { %v1105_v54 = vpop.permute.xlu1 %1104 }
 0x464   :  { %1096 = vrot.lane.b32.xlu0 %v5110_v28, %s6888_s6 }
 0x467   :  { %v1091_v56 = vpop.permute.xlu1 %1090 }
 0x468   :  { %1082 = vrot.lane.b32.xlu0 %v5110_v28, %s6896_s24 }
 0x46b   :  { %v1077_v59 = vpop.permute.xlu1 %1076 }
 0x46c   :  { %1068 = vrot.lane.b32.xlu0 %v5110_v28, %s4688_s29 }
 0x46f   :  { %v1063_v62 = vpop.permute.xlu1 %1062 }
 0x470   :  { %1054 = vrot.lane.b32.xlu0 %v5110_v28, %s6919_s7 }
 0x473   :  { %v1049_v2 = vpop.permute.xlu1 %1048 }
 0x474   :  { %1040 = vrot.lane.b32.xlu0 %v5110_v28, %s6904_s2 }
 0x477   :  { %v5215_v4 = vpop.permute.xlu1 %1034 }
 0x478   :  { %1214 = vrot.lane.b32.xlu0 %v5114_v29, %s6890_s14  ;;  %s4692_s14 = smov 97  }
 0x47b   :  { %v1209_v7 = vpop.permute.xlu1 %1208 }
 0x47c   :  { %1200 = vrot.lane.b32.xlu0 %v5114_v29, %s6888_s6  ;;  %s4691_s6 = smov 124  }
 0x47f   :  { %v1195_v9 = vpop.permute.xlu1 %1194 }
 0x480   :  { %1186 = vrot.lane.b32.xlu0 %v5114_v29, %s6896_s24  ;;  %s4714_s24 = smov 72  }
 0x483   :  { %v1181_v12 = vpop.permute.xlu1 %1180 }
 0x484   :  { %1172 = vrot.lane.b32.xlu0 %v5114_v29, %s4688_s29 }
 0x487   :  { %v1167_v61 = vpop.permute.xlu1 %1166 }
 0x488   :  { %1158 = vrot.lane.b32.xlu0 %v5114_v29, %s6919_s7 }
 0x48b   :  { %v1153_v21 = vpop.permute.xlu1 %1152 }
 0x48c   :  { %1144 = vrot.lane.b32.xlu0 %v5114_v29, %s6904_s2 }
 0x490   :  { %1024 = vrot.lane.b32.xlu0 %v5042_v22, %s6904_s2 }
 0x494   :  { %1015 = vrot.lane.b32.xlu0 %v5110_v28, %s6892_s25 }
 0x498   :  { %1013 = vrot.lane.b32.xlu0 %v5104_v26, %s6892_s25  ;;  %s6900_s25 = smov 5  }
 0x49c   :  { %1244 = vperm.xlu0 %4541, %v1230_v42  }
 0x4a0   :  { %1234 = vperm.xlu0 %4541, %v1228_v44  }
 0x4a2   :  { %v1109_v47 = vpop.permute.xlu0 %1108 }
 0x4a3   :  { %v1114_v18 = vsel %vm1019_vm1, %v5150_v32, %v1109_v47  ;;  %v1139_v47 = vpop.permute.xlu1 %1138 }
 0x4a6   :  { %v1095_v48 = vpop.permute.xlu0 %1094 }
 0x4a7   :  { %v1100_v39 = vsel %vm1019_vm1, %v5154_v33, %v1095_v48 }
 0x4aa   :  { %v1081_v50 = vpop.permute.xlu0 %1080 }
 0x4ae   :  { %v1067_v52 = vpop.permute.xlu0 %1066 }
 0x4b2   :  { %v5209_v53 = vpop.permute.xlu0 %1052 }
 0x4b6   :  { %v5211_v55 = vpop.permute.xlu0 %1038 }
 0x4ba   :  { %v1213_v57 = vpop.permute.xlu0 %1212 }
 0x4bb   :  { %v1218_v17 = vsel %vm1019_vm1, %v1207_v38, %v1213_v57  ;;  %v1072_v57 = vsel %vm1019_vm1, %v5164_v35, %v1067_v52 }
 0x4be   :  { %v1199_v58 = vpop.permute.xlu0 %1198 }
 0x4bf   :  { %v1204_v31 = vsel %vm1019_vm1, %v1193_v40, %v1199_v58 }
 0x4c2   :  { %v1185_v60 = vpop.permute.xlu0 %1184 }
 0x4c3   :  { %v1190_v44 = vsel %vm1019_vm1, %v5189_v41, %v1185_v60 }
 0x4c6   :  { %v1171_v63 = vpop.permute.xlu0 %1170 }
 0x4ca   :  { %v1157_v1 = vpop.permute.xlu0 %1156 }
 0x4ce   :  { %v5213_v3 = vpop.permute.xlu0 %1142 }
 0x4d2   :  { %v1111_v5 = vpop.permute.xlu0 %1110 }
 0x4d3   :  { %v1115_v16 = vsel %vm1019_vm1, %v1105_v54, %v1111_v5  ;;  %v1086_v54 = vsel %vm1019_vm1, %v5160_v34, %v1081_v50  ;;  %v1131_v50 = vpop.permute.xlu1 %1130 }
 0x4d6   :  { %v1097_v6 = vpop.permute.xlu0 %1096 }
 0x4d7   :  { %v1101_v30 = vsel %vm1019_vm1, %v1091_v56, %v1097_v6  ;;  %v1176_v56 = vsel %vm1019_vm1, %v5196_v43, %v1171_v63  ;;  %v1058_v43 = vsel %vm1019_vm1, %v5170_v36, %v5209_v53  ;;  %v1121_v52 = vpop.permute.xlu1 %1120  ;;  %v1148_v63 = vsel %vm1019_vm1, %v5205_v49, %v5213_v3 }
 0x4d8   :  { %v1135_v53 = vsel %vm1019_vm1, %v1131_v50, %v5114_v29  ;;  %v1134_v49 = vsel %vm1019_vm1, %v5207_v51, %v5108_v27  ;;  %v1125_v29 = vsel %vm1019_vm1, %v5088_v25, %v1121_v52  ;;  %v1225_v25 = vld [vmem:[%s6938_s1 + $0x28] sm:$0xff]  ;;  %v1227_v51 = vld [vmem:[%s6938_s1 + $0x38] sm:$0xff] }
 0x4da   :  { %v1083_v8 = vpop.permute.xlu0 %1082 }
 0x4db   :  { %v1087_v42 = vsel %vm1019_vm1, %v1077_v59, %v1083_v8  ;;  %v1162_v59 = vsel %vm1019_vm1, %v5203_v46, %v1157_v1  ;;  %v1044_v46 = vsel %vm1019_vm1, %v5174_v37, %v5211_v55  ;;  %v1031_v1 = vsel %vm1019_vm1, %v5201_v45, %v5110_v28 }
 0x4de   :  { %v1069_v10 = vpop.permute.xlu0 %1068 }
 0x4df   :  { %v1073_v48 = vsel %vm1019_vm1, %v1063_v62, %v1069_v10 }
 0x4e2   :  { %v1055_v11 = vpop.permute.xlu0 %1054 }
 0x4e3   :  { %v1059_v58 = vsel %vm1019_vm1, %v1049_v2, %v1055_v11  ;;  %v1119_v2 = vpop.permute.xlu1 %1118 }
 0x4e4   :  { %v1124_v28 = vsel %vm1019_vm1, %v5046_v23, %v1119_v2  ;;  %v1222_v23 = vld [vmem:[%s6938_s1 + $0x10] sm:$0xff] }
 0x4e6   :  { %v1041_v14 = vpop.permute.xlu0 %1040 }
 0x4e7   :  { %v1045_v62 = vsel %vm1019_vm1, %v5215_v4, %v1041_v14  ;;  %v1226_v4 = vld [vmem:[%s6938_s1 + $0x30] sm:$0xff]  ;;  %v1250_v14 = vpop.permute.xlu1 %1249 }
 0x4ea   :  { %v1215_v0 = vpop.permute.xlu0 %1214 }
 0x4eb   :  { %v1219_v15 = vsel %vm1019_vm1, %v1209_v7, %v1215_v0 }
 0x4ec   :  { %4099 = vmatprep.subr.mxu1 %v1219_v15  ;;  %v1240_v15 = vpop.permute.xlu1 %1239 }
 0x4ed   :  { %4100 = vmatpush3.msra.mxu1 %v1115_v16 }
 0x4ee   :  { %4101 = vmatprep.subr.mxu1 %v1218_v17  ;;  %v1201_v19 = vpop.permute.xlu0 %1200 }
 0x4ef   :  { %4102 = vmatpush3.msra.mxu1 %v1114_v18  ;;  %v1205_v20 = vsel %vm1019_vm1, %v1195_v9, %v1201_v19 }
 0x4f0   :  { %4103 = vmatprep.subr.mxu1 %v1205_v20 }
 0x4f1   :  { %4104 = vmatpush3.msra.mxu1 %v1101_v30 }
 0x4f2   :  { %4105 = vmatprep.subr.mxu1 %v1204_v31  ;;  %v1187_v38 = vpop.permute.xlu0 %1186 }
 0x4f3   :  { %4106 = vmatpush3.msra.mxu1 %v1100_v39  ;;  %v1191_v32 = vsel %vm1019_vm1, %v1181_v12, %v1187_v38 }
 0x4f4   :  { %4107 = vmatprep.subr.mxu1 %v1191_v32 }
 0x4f5   :  { %4108 = vmatpush3.msra.mxu1 %v1087_v42 }
 0x4f6   :  { %4109 = vmatprep.subr.mxu1 %v1190_v44  ;;  %v1173_v40 = vpop.permute.xlu0 %1172  ;;  %v1685_v44 = vld [vmem:[%s6867_s8 + $0x8] sm:$0xff] }
 0x4f7   :  { %4110 = vmatpush3.msra.mxu1 %v1086_v54  ;;  %v1177_v33 = vsel %vm1019_vm1, %v1167_v61, %v1173_v40  ;;  %1797 = vmatprep.mubr.f32.mxu0 %v1685_v44  ;;  %v1686_v40 = vld [vmem:[%s6867_s8 + $0x10] sm:$0xff] }
 0x4f8   :  { %4111 = vmatprep.subr.mxu1 %v1177_v33 }
 0x4f9   :  { %4112 = vmatpush3.msra.mxu1 %v1073_v48 }
 0x4fa   :  { %4113 = vmatprep.subr.mxu1 %v1176_v56  ;;  %v1159_v41 = vpop.permute.xlu0 %1158 }
 0x4fb   :  { %4114 = vmatpush3.msra.mxu1 %v1072_v57  ;;  %v1163_v34 = vsel %vm1019_vm1, %v1153_v21, %v1159_v41  ;;  %v1697_v41 = vld [vmem:[%s6868_s9 + $0x8] sm:$0xff] }
 0x4fc   :  { %4115 = vmatprep.subr.mxu1 %v1163_v34  ;;  %v1696_v34 = vld [vmem:[%s6868_s9] sm:$0xff] }
 0x4fd   :  { %4116 = vmatpush3.msra.mxu1 %v1059_v58 }
 0x4fe   :  { %4117 = vmatprep.subr.mxu1 %v1162_v59  ;;  %v1145_v60 = vpop.permute.xlu0 %1144  ;;  %v1699_v59 = vld [vmem:[%s6868_s9 + $0x18] sm:$0xff] }
 0x4ff   :  { %4118 = vmatpush3.msra.mxu1 %v1058_v43  ;;  %v1149_v35 = vsel %vm1019_vm1, %v1139_v47, %v1145_v60  ;;  %v1698_v43 = vld [vmem:[%s6868_s9 + $0x10] sm:$0xff]  ;;  %s4713_s9 = smov 92  }
 0x500   :  { %4119 = vmatprep.subr.mxu1 %v1149_v35 }
 0x501   :  { %4120 = vmatpush3.msra.mxu1 %v1045_v62 }
 0x502   :  { %4121 = vmatprep.subr.mxu1 %v1148_v63  ;;  %v1025_v36 = vpop.permute.xlu0 %1024 }
 0x503   :  { %4122 = vmatpush3.msra.mxu1 %v1044_v46  ;;  %v1030_v37 = vsel %vm1019_vm1, %v1025_v36, %v5104_v26  ;;  %v1220_v26 = vld [vmem:[%s6938_s1] sm:$0xff] }
 0x504   :  { %4123 = vmatprep.subr.mxu1 %v1135_v53 }
 0x505   :  { %4124 = vmatpush3.msra.mxu1 %v1031_v1 }
 0x506   :  { %v1016_v55 = vpop.permute.xlu0 %1015  ;;  %4125 = vmatprep.subr.mxu1 %v1134_v49 }
 0x507   :  { %v1021_v3 = vsel %vm1019_vm1, %v5048_v24, %v1016_v55  ;;  %4126 = vmatpush3.msra.mxu1 %v1030_v37  ;;  %v1223_v24 = vld [vmem:[%s6938_s1 + $0x18] sm:$0xff] }
 0x508   :  { %4127 = vmatprep.subr.mxu1 %v1125_v29 }
 0x509   :  { %4128 = vmatpush3.msra.mxu1 %v1021_v3 }
 0x50a   :  { %v1014_v45 = vpop.permute.xlu0 %1013  ;;  %4129 = vmatprep.subr.mxu1 %v1124_v28 }
 0x50b   :  { %v1020_v27 = vsel %vm1019_vm1, %v5042_v22, %v1014_v45  ;;  %v1224_v22 = vld [vmem:[%s6938_s1 + $0x20] sm:$0xff]  ;;  %s4693_s1 = smov 29  }
 0x50c   :  { %4130 = vmatpush3.msra.mxu1 %v1020_v27 }
 0x50d   :  { %1317 = vmatmul.mubr.f32.vlgmr.msra.gmra.mxu1 %v1220_v26 }
 0x50e   :  { %1321 = vmatprep.mubr.f32.mxu1 %v1223_v24 }
 0x511   :  { %1322 = vmatmul.mubr.f32.gmra.mxu1 %v1222_v23 }
 0x512   :  { %1326 = vmatprep.mubr.f32.mxu1 %v1225_v25 }
 0x515   :  { %1327 = vmatmul.mubr.f32.gmra.mxu1 %v1224_v22 }
 0x516   :  { %1331 = vmatprep.mubr.f32.mxu1 %v1227_v51 }
 0x517   :  { %v1245_v5 = vpop.permute.xlu0 %1244 }
 0x519   :  { %1332 = vmatmul.mubr.f32.gmra.mxu1 %v1226_v4 }
 0x51a   :  { %4426 = vmatprep.mubr.msk.f32.mxu1 %vm1720_vm2, %v1686_v40 }
 0x51b   :  { %v1235_v9 = vpop.permute.xlu0 %1234 }
 0x5cd   :  { %v4131_v6 = vpop.f32.mrf.mxu1 }
 0x5cf   :  { %v4132_v7 = vpop.f32.mrf.mxu1 }
 0x5d0   :  { %v4133_v8 = vadd.f32 %v4132_v7, %v4131_v6 }
 0x5d1   :  { %v4134_v12 = vpop.f32.mrf.mxu1 }
 0x5d2   :  { %v1319_v10 = vadd.f32 %v4133_v8, %v1235_v9 }
 0x5d3   :  { %v4135_v61 = vpop.f32.mrf.mxu1 }
 0x5d4   :  { %v5294_v11 = vmax.f32 %v1319_v10, 0.0  ;;  %v4136_v0 = vadd.f32 %v4135_v61, %v4134_v12 }
 0x5d5   :  { %v4137_v18 = vpop.f32.mrf.mxu1 }
 0x5d6   :  { %1614 = vrot.lane.b32.xlu0 %v5294_v11, %s4690_s26  ;;  %1602 = vrot.lane.b32.xlu1 %v5294_v11, %s4691_s6  ;;  %v1324_v16 = vadd.f32 %v4136_v0, %v1240_v15  ;;  %v4023_v0 = vld [vmem:[#allocation6 + $0x7] ss:$0 sm:$0xff] }
 0x5d7   :  { %v4138_v19 = vpop.f32.mrf.mxu1 }
 0x5d8   :  { %v5320_v17 = vmax.f32 %v1324_v16, 0.0  ;;  %v4139_v20 = vadd.f32 %v4138_v19, %v4137_v18 }
 0x5d9   :  { %v4140_v31 = vpop.f32.mrf.mxu1 }
 0x5da   :  { %1479 = vrot.lane.b32.xlu0 %v5294_v11, %s4680_s27  ;;  %1467 = vrot.lane.b32.xlu1 %v5294_v11, %s4692_s14  ;;  %v1329_v21 = vadd.f32 %v4139_v20, %v1245_v5 }
 0x5db   :  { %v4141_v39 = vpop.f32.mrf.mxu1 }
 0x5dc   :  { %v5350_v30 = vmax.f32 %v1329_v21, 0.0  ;;  %v4142_v38 = vadd.f32 %v4141_v39, %v4140_v31  ;;  %v4019_v21 = vld [vmem:[#allocation6 + $0x3] ss:$0 sm:$0xff] }
 0x5de   :  { %1573 = vrot.lane.b32.xlu0 %v5294_v11, %s4693_s1  ;;  %1561 = vrot.lane.b32.xlu1 %v5294_v11, %s6898_s3  ;;  %v1334_v32 = vadd.f32 %v4142_v38, %v1250_v14 }
 0x5e0   :  { %v5380_v42 = vmax.f32 %v1334_v32, 0.0 }
 0x5e2   :  { %1438 = vrot.lane.b32.xlu0 %v5294_v11, %s6906_s15  ;;  %1426 = vrot.lane.b32.xlu1 %v5294_v11, %s4696_s4 }
 0x5e6   :  { %1532 = vrot.lane.b32.xlu0 %v5294_v11, %s4697_s0  ;;  %1520 = vrot.lane.b32.xlu1 %v5294_v11, %s4698_s10 }
 0x5ea   :  { %1397 = vrot.lane.b32.xlu0 %v5294_v11, %s4699_s28  ;;  %1385 = vrot.lane.b32.xlu1 %v5294_v11, %s4700_s30 }
 0x5ee   :  { %1616 = vrot.lane.b32.xlu0 %v5320_v17, %s4690_s26  ;;  %1604 = vrot.lane.b32.xlu1 %v5320_v17, %s4691_s6 }
 0x5f2   :  { %1481 = vrot.lane.b32.xlu0 %v5320_v17, %s4680_s27  ;;  %1469 = vrot.lane.b32.xlu1 %v5320_v17, %s4692_s14 }
 0x5f6   :  { %1575 = vrot.lane.b32.xlu0 %v5320_v17, %s4693_s1  ;;  %1563 = vrot.lane.b32.xlu1 %v5320_v17, %s6898_s3 }
 0x5fa   :  { %1440 = vrot.lane.b32.xlu0 %v5320_v17, %s6906_s15  ;;  %1428 = vrot.lane.b32.xlu1 %v5320_v17, %s4696_s4 }
 0x5fe   :  { %1534 = vrot.lane.b32.xlu0 %v5320_v17, %s4697_s0  ;;  %1522 = vrot.lane.b32.xlu1 %v5320_v17, %s4698_s10 }
 0x602   :  { %1399 = vrot.lane.b32.xlu0 %v5320_v17, %s4699_s28  ;;  %1387 = vrot.lane.b32.xlu1 %v5320_v17, %s4700_s30 }
 0x606   :  { %1359 = vrot.lane.b32.xlu0 %v5320_v17, %s6900_s25  ;;  %1347 = vrot.lane.b32.xlu1 %v5320_v17, %s4702_s5 }
 0x60a   :  { %1618 = vrot.lane.b32.xlu0 %v5350_v30, %s4690_s26  ;;  %1606 = vrot.lane.b32.xlu1 %v5350_v30, %s4691_s6 }
 0x60e   :  { %1483 = vrot.lane.b32.xlu0 %v5350_v30, %s4680_s27  ;;  %1471 = vrot.lane.b32.xlu1 %v5350_v30, %s4692_s14 }
 0x612   :  { %1577 = vrot.lane.b32.xlu0 %v5350_v30, %s4693_s1  ;;  %1565 = vrot.lane.b32.xlu1 %v5350_v30, %s6898_s3 }
 0x616   :  { %1442 = vrot.lane.b32.xlu0 %v5350_v30, %s6906_s15  ;;  %1430 = vrot.lane.b32.xlu1 %v5350_v30, %s4696_s4 }
 0x61a   :  { %1536 = vrot.lane.b32.xlu0 %v5350_v30, %s4697_s0  ;;  %1524 = vrot.lane.b32.xlu1 %v5350_v30, %s4698_s10 }
 0x61e   :  { %1401 = vrot.lane.b32.xlu0 %v5350_v30, %s4699_s28  ;;  %1389 = vrot.lane.b32.xlu1 %v5350_v30, %s4700_s30 }
 0x622   :  { %1361 = vrot.lane.b32.xlu0 %v5350_v30, %s6900_s25  ;;  %1349 = vrot.lane.b32.xlu1 %v5350_v30, %s4702_s5 }
 0x626   :  { %1620 = vrot.lane.b32.xlu0 %v5380_v42, %s4690_s26  ;;  %1608 = vrot.lane.b32.xlu1 %v5380_v42, %s4691_s6  ;;  %s6917_s26 = smov 104  }
 0x62a   :  { %1485 = vrot.lane.b32.xlu0 %v5380_v42, %s4680_s27  ;;  %1473 = vrot.lane.b32.xlu1 %v5380_v42, %s4692_s14  ;;  %s4709_s14 = smov 84  }
 0x62e   :  { %1579 = vrot.lane.b32.xlu0 %v5380_v42, %s4693_s1  ;;  %1567 = vrot.lane.b32.xlu1 %v5380_v42, %s6898_s3  ;;  %s4703_s1 = smov 27   ;;  %s4707_s3 = smov 68  }
 0x632   :  { %1444 = vrot.lane.b32.xlu0 %v5380_v42, %s6906_s15  ;;  %1432 = vrot.lane.b32.xlu1 %v5380_v42, %s4696_s4  ;;  %s6902_s4 = smov 123   ;;  %s4720_s15 = smov 122  }
 0x636   :  { %1538 = vrot.lane.b32.xlu0 %v5380_v42, %s4697_s0  ;;  %1526 = vrot.lane.b32.xlu1 %v5380_v42, %s4698_s10  ;;  %s4710_s0 = smov 108  }
 0x63a   :  { %1403 = vrot.lane.b32.xlu0 %v5380_v42, %s4699_s28  ;;  %1391 = vrot.lane.b32.xlu1 %v5380_v42, %s4700_s30 }
 0x63e   :  { %1357 = vrot.lane.b32.xlu0 %v5294_v11, %s6900_s25  ;;  %1345 = vrot.lane.b32.xlu1 %v5294_v11, %s4702_s5 }
 0x642   :  { %1363 = vrot.lane.b32.xlu0 %v5380_v42, %s6900_s25  ;;  %1351 = vrot.lane.b32.xlu1 %v5380_v42, %s4702_s5  ;;  %s4706_s25 = smov 116   ;;  %s6921_s5 = smov 88  }
 0x646   :  { %1659 = vrot.lane.b32.xlu0 %v5350_v30, %s4703_s1  ;;  %1647 = vrot.lane.b32.xlu1 %v5350_v30, %s6902_s4 }
 0x648   :  { %v5420_v47 = vpop.permute.xlu0 %1614  ;;  %v5422_v54 = vpop.permute.xlu1 %1602 }
 0x64a   :  { %1661 = vrot.lane.b32.xlu0 %v5380_v42, %s4703_s1  ;;  %1649 = vrot.lane.b32.xlu1 %v5380_v42, %s6902_s4 }
 0x64c   :  { %v5431_v33 = vpop.permute.xlu0 %1479  ;;  %v5433_v48 = vpop.permute.xlu1 %1467 }
 0x64e   :  { %1657 = vrot.lane.b32.xlu0 %v5320_v17, %s4703_s1  ;;  %1645 = vrot.lane.b32.xlu1 %v5320_v17, %s6902_s4 }
 0x650   :  { %v5438_v56 = vpop.permute.xlu0 %1573  ;;  %v5440_v57 = vpop.permute.xlu1 %1561 }
 0x652   :  { %1655 = vrot.lane.b32.xlu0 %v5294_v11, %s4703_s1  ;;  %1643 = vrot.lane.b32.xlu1 %v5294_v11, %s6902_s4  ;;  %s6915_s1 = smov 120   ;;  %s7026_s4 = smov 123  }
 0x654   :  { %v5451_v50 = vpop.permute.xlu0 %1438  ;;  %v5453_v58 = vpop.permute.xlu1 %1426 }
 0x656   :  { %1707 = vperm.xlu0 %4541, %v1697_v41   ;;  %1702 = vperm.xlu1 %4542, %v1696_v34   ;;  %v1627_v41 = vsel %vm1626_vm3, %v5422_v54, %v5420_v47 }
 0x658   :  { %v5461_v60 = vpop.permute.xlu0 %1532  ;;  %v5463_v35 = vpop.permute.xlu1 %1520 }
 0x65a   :  { %1717 = vperm.xlu0 %4541, %v1699_v59   ;;  %1712 = vperm.xlu1 %4542, %v1698_v43  }
 0x65c   :  { %v5465_v52 = vpop.permute.xlu0 %1397  ;;  %v5467_v62 = vpop.permute.xlu1 %1385 }
 0x660   :  { %v1617_v63 = vpop.permute.xlu0 %1616  ;;  %v1605_v46 = vpop.permute.xlu1 %1604 }
 0x661   :  { %v1628_v38 = vsel %vm1626_vm3, %v1605_v46, %v1617_v63 }
 0x664   :  { %v1482_v36 = vpop.permute.xlu0 %1481  ;;  %v1470_v53 = vpop.permute.xlu1 %1469 }
 0x665   :  { %v1493_v44 = vsel %vm1491_vm4, %v1470_v53, %v1482_v36  ;;  %v1639_v36 = vmul.f32 %v4023_v0, %v1627_v41 }
 0x666   :  { %v1505_v63 = vmul.f32 %v4019_v21, %v1493_v44 }
 0x668   :  { %v5469_v1 = vpop.permute.xlu0 %1575  ;;  %v5471_v49 = vpop.permute.xlu1 %1563 }
 0x66c   :  { %v5473_v2 = vpop.permute.xlu0 %1440  ;;  %v5475_v37 = vpop.permute.xlu1 %1428 }
 0x670   :  { %v5477_v55 = vpop.permute.xlu0 %1534  ;;  %v5479_v3 = vpop.permute.xlu1 %1522 }
 0x674   :  { %v5481_v29 = vpop.permute.xlu0 %1399  ;;  %v5483_v28 = vpop.permute.xlu1 %1387 }
 0x678   :  { %v5485_v45 = vpop.permute.xlu0 %1359  ;;  %v5487_v26 = vpop.permute.xlu1 %1347 }
 0x67c   :  { %v1619_v27 = vpop.permute.xlu0 %1618  ;;  %v1607_v24 = vpop.permute.xlu1 %1606 }
 0x67d   :  { %v1629_v18 = vsel %vm1626_vm3, %v1607_v24, %v1619_v27  ;;  %v1492_v27 = vsel %vm1491_vm4, %v5433_v48, %v5431_v33  ;;  %v1640_v24 = vmul.f32 %v4023_v0, %v1628_v38 }
 0x67e   :  { %v1641_v40 = vmul.f32 %v4023_v0, %v1629_v18  ;;  %v1504_v53 = vmul.f32 %v4019_v21, %v1492_v27 }
 0x680   :  { %v1484_v23 = vpop.permute.xlu0 %1483  ;;  %v1472_v25 = vpop.permute.xlu1 %1471 }
 0x681   :  { %v1494_v31 = vsel %vm1491_vm4, %v1472_v25, %v1484_v23  ;;  %v4022_v23 = vld [vmem:[#allocation6 + $0x6] ss:$0 sm:$0xff] }
 0x682   :  { %v1506_v34 = vmul.f32 %v4019_v21, %v1494_v31 }
 0x684   :  { %v1578_v22 = vpop.permute.xlu0 %1577  ;;  %v1566_v51 = vpop.permute.xlu1 %1565 }
 0x685   :  { %v1588_v47 = vsel %vm1585_vm5, %v1566_v51, %v1578_v22  ;;  %v1452_v22 = vsel %vm1450_vm6, %v5475_v37, %v5473_v2 }
 0x686   :  { %v1600_v51 = vmul.f32 %v4022_v23, %v1588_v47 }
 0x688   :  { %v1443_v4 = vpop.permute.xlu0 %1442  ;;  %v1431_v5 = vpop.permute.xlu1 %1430 }
 0x689   :  { %v1453_v33 = vsel %vm1450_vm6, %v1431_v5, %v1443_v4  ;;  %v1586_v4 = vsel %vm1585_vm5, %v5440_v57, %v5438_v56 }
 0x68a   :  { %v1598_v37 = vmul.f32 %v4022_v23, %v1586_v4 }
 0x68c   :  { %v5489_v6 = vpop.permute.xlu0 %1536  ;;  %v5491_v7 = vpop.permute.xlu1 %1524 }
 0x68d   :  { %v1547_v56 = vsel %vm1544_vm7, %v5491_v7, %v5489_v6  ;;  %v1411_v6 = vsel %vm1409_vm8, %v5483_v28, %v5481_v29 }
 0x690   :  { %v5493_v8 = vpop.permute.xlu0 %1401  ;;  %v5495_v9 = vpop.permute.xlu1 %1389 }
 0x694   :  { %v5497_v10 = vpop.permute.xlu0 %1361  ;;  %v5499_v12 = vpop.permute.xlu1 %1349 }
 0x695   :  { %v1372_v27 = vsel %vm1369_vm9, %v5499_v12, %v5497_v10 }
 0x698   :  { %v1621_v14 = vpop.permute.xlu0 %1620  ;;  %v1609_v61 = vpop.permute.xlu1 %1608 }
 0x699   :  { %v1630_v15 = vsel %vm1626_vm3, %v1609_v61, %v1621_v14  ;;  %v4018_v14 = vld [vmem:[#allocation6 + $0x2] ss:$0 sm:$0xff]  ;;  %vm3881_vm3 = vcmask 195584  }
 0x69a   :  { %v1642_v16 = vmul.f32 %v4023_v0, %v1630_v15  ;;  %v1587_v0 = vsel %vm1585_vm5, %v5471_v49, %v5469_v1  ;;  %v1465_v5 = vmul.f32 %v4018_v14, %v1453_v33  ;;  %v1451_v1 = vsel %vm1450_vm6, %v5453_v58, %v5451_v50  ;;  %v4017_v50 = vld [vmem:[#allocation6 + $0x1] ss:$0 sm:$0xff] }
 0x69b   :  { %v1599_v49 = vmul.f32 %v4022_v23, %v1587_v0  ;;  %v1412_v58 = vsel %vm1409_vm8, %v5495_v9, %v5493_v8  ;;  %v1545_v8 = vsel %vm1544_vm7, %v5463_v35, %v5461_v60  ;;  %v4020_v60 = vld [vmem:[#allocation6 + $0x4] ss:$0 sm:$0xff]  ;;  %v4016_v35 = vld [vmem:[#allocation6] ss:$0 sm:$0xff] }
 0x69c   :  { %v1486_v19 = vpop.permute.xlu0 %1485  ;;  %4143 = vmatprep.subr.mxu0 %v1642_v16  ;;  %v1474_v20 = vpop.permute.xlu1 %1473  ;;  %v1424_v9 = vmul.f32 %v4017_v50, %v1412_v58  ;;  %v1517_v12 = vmul.f32 %v4020_v60, %v5320_v17  ;;  %v1688_v17 = vld [vmem:[%s6867_s8 + $0x20] sm:$0xff] }
 0x69d   :  { %v1495_v39 = vsel %vm1491_vm4, %v1474_v20, %v1486_v19  ;;  %v1464_v19 = vmul.f32 %v4018_v14, %v1452_v22  ;;  %v1463_v20 = vmul.f32 %v4018_v14, %v1451_v1 }
 0x69e   :  { %v1507_v32 = vmul.f32 %v4019_v21, %v1495_v39  ;;  %v4021_v21 = vld [vmem:[#allocation6 + $0x5] ss:$0 sm:$0xff] }
 0x69f   :  { %v1559_v7 = vmul.f32 %v4021_v21, %v1547_v56  ;;  %v1916_v56 = vld [vmem:[#allocation7 + $0x8] sm:$0xff] }
 0x6a0   :  { %v1580_v59 = vpop.permute.xlu0 %1579  ;;  %4144 = vmatpush3.msra.mxu0 %v1507_v32  ;;  %v1568_v43 = vpop.permute.xlu1 %1567  ;;  %v1546_v32 = vsel %vm1544_vm7, %v5479_v3, %v5477_v55  ;;  %v1410_v55 = vsel %vm1409_vm8, %v5467_v62, %v5465_v52  ;;  %v1519_v52 = vmul.f32 %v4020_v60, %v5380_v42  ;;  %v1516_v42 = vmul.f32 %v4020_v60, %v5294_v11 }
 0x6a1   :  { %4145 = vmatprep.subr.mxu0 %v1641_v40  ;;  %v1589_v46 = vsel %vm1585_vm5, %v1568_v43, %v1580_v59  ;;  %v1558_v3 = vmul.f32 %v4021_v21, %v1546_v32  ;;  %v1557_v59 = vmul.f32 %v4021_v21, %v1545_v8  ;;  %v1422_v29 = vmul.f32 %v4017_v50, %v1410_v55 }
 0x6a2   :  { %4146 = vmatpush3.msra.mxu0 %v1506_v34  ;;  %v1601_v48 = vmul.f32 %v4022_v23, %v1589_v46  ;;  %v1423_v34 = vmul.f32 %v4017_v50, %v1411_v6  ;;  %v1518_v46 = vmul.f32 %v4020_v60, %v5350_v30  ;;  %v1684_v30 = vld [vmem:[%s6867_s8] sm:$0xff]  ;;  %vm3886_vm5 = vcmask 392192  }
 0x6a3   :  { %4147 = vmatprep.subr.mxu0 %v1640_v24 }
 0x6a4   :  { %v1445_v54 = vpop.permute.xlu0 %1444  ;;  %4148 = vmatpush3.msra.mxu0 %v1505_v63  ;;  %v1433_v25 = vpop.permute.xlu1 %1432  ;;  %v1371_v63 = vsel %vm1369_vm9, %v5487_v26, %v5485_v45 }
 0x6a5   :  { %v1454_v61 = vsel %vm1450_vm6, %v1433_v25, %v1445_v54  ;;  %4149 = vmatprep.subr.mxu0 %v1639_v36  ;;  %v1383_v36 = vmul.f32 %v4016_v35, %v1372_v27  ;;  %v1382_v47 = vmul.f32 %v4016_v35, %v1371_v63  ;;  %v4024_v25 = vld [vmem:[#allocation6 + $0x8] ss:$0 sm:$0xff] }
 0x6a6   :  { %v1466_v15 = vmul.f32 %v4018_v14, %v1454_v61  ;;  %4150 = vmatpush3.msra.mxu0 %v1504_v53 }
 0x6a7   :  { %4151 = vmatprep.subr.mxu0 %v1601_v48 }
 0x6a8   :  { %v1539_v16 = vpop.permute.xlu0 %1538  ;;  %4152 = vmatpush3.msra.mxu0 %v1466_v15  ;;  %v1527_v18 = vpop.permute.xlu1 %1526  ;;  %v1687_v15 = vld [vmem:[%s6867_s8 + $0x18] sm:$0xff] }
 0x6a9   :  { %4153 = vmatprep.subr.mxu0 %v1600_v51  ;;  %v1548_v2 = vsel %vm1544_vm7, %v1527_v18, %v1539_v16  ;;  %v1691_v51 = vld [vmem:[%s6867_s8 + $0x38] sm:$0xff]  ;;  %v1690_v18 = vld [vmem:[%s6867_s8 + $0x30] sm:$0xff]  ;;  %vm3891_vm7 = vcmask 588800  }
 0x6aa   :  { %4154 = vmatpush3.msra.mxu0 %v1465_v5  ;;  %v1560_v39 = vmul.f32 %v4021_v21, %v1548_v2  ;;  %v1689_v2 = vld [vmem:[%s6867_s8 + $0x28] sm:$0xff]  ;;  %v1695_v21 = vld [vmem:[%s6867_s8 + $0x58] sm:$0xff] }
 0x6ab   :  { %4155 = vmatprep.subr.mxu0 %v1599_v49  ;;  %v1694_v49 = vld [vmem:[%s6867_s8 + $0x50] sm:$0xff] }
 0x6ac   :  { %v1404_v57 = vpop.permute.xlu0 %1403  ;;  %4156 = vmatpush3.msra.mxu0 %v1464_v19  ;;  %v1392_v31 = vpop.permute.xlu1 %1391 }
 0x6ad   :  { %v1413_v38 = vsel %vm1409_vm8, %v1392_v31, %v1404_v57  ;;  %4157 = vmatprep.subr.mxu0 %v1598_v37  ;;  %v1693_v37 = vld [vmem:[%s6867_s8 + $0x48] sm:$0xff]  ;;  %v1915_v57 = vld [vmem:[#allocation7] sm:$0xff] }
 0x6ae   :  { %v1425_v44 = vmul.f32 %v4017_v50, %v1413_v38  ;;  %4158 = vmatpush3.msra.mxu0 %v1463_v20  ;;  %v1692_v20 = vld [vmem:[%s6867_s8 + $0x40] sm:$0xff]  ;;  %s4705_s8 = smov 76  }
 0x6af   :  { %4159 = vmatprep.subr.mxu0 %v1560_v39 }
 0x6b0   :  { %v1358_v40 = vpop.permute.xlu0 %1357  ;;  %4160 = vmatpush3.msra.mxu0 %v1425_v44  ;;  %v1346_v41 = vpop.permute.xlu1 %1345 }
 0x6b1   :  { %4161 = vmatprep.subr.mxu0 %v1559_v7  ;;  %v1370_v10 = vsel %vm1369_vm9, %v1346_v41, %v1358_v40 }
 0x6b2   :  { %4162 = vmatpush3.msra.mxu0 %v1424_v9  ;;  %v1381_v54 = vmul.f32 %v4016_v35, %v1370_v10 }
 0x6b3   :  { %4163 = vmatprep.subr.mxu0 %v1558_v3 }
 0x6b4   :  { %v1364_v28 = vpop.permute.xlu0 %1363  ;;  %4164 = vmatpush3.msra.mxu0 %v1423_v34  ;;  %v1352_v43 = vpop.permute.xlu1 %1351 }
 0x6b5   :  { %v1373_v24 = vsel %vm1369_vm9, %v1352_v43, %v1364_v28  ;;  %4165 = vmatprep.subr.mxu0 %v1557_v59 }
 0x6b6   :  { %v1384_v62 = vmul.f32 %v4016_v35, %v1373_v24  ;;  %4166 = vmatpush3.msra.mxu0 %v1422_v29 }
 0x6b7   :  { %4167 = vmatprep.subr.mxu0 %v1519_v52 }
 0x6b8   :  { %v1660_v53 = vpop.permute.xlu0 %1659  ;;  %4168 = vmatpush3.msra.mxu0 %v1384_v62  ;;  %v1648_v23 = vpop.permute.xlu1 %1647 }
 0x6b9   :  { %4169 = vmatprep.subr.mxu0 %v1518_v46  ;;  %v1670_v14 = vsel %vm1667_vm10, %v1648_v23, %v1660_v53 }
 0x6ba   :  { %4170 = vmatpush3.msra.mxu0 %v1383_v36  ;;  %v1682_v11 = vmul.f32 %v4024_v25, %v1670_v14 }
 0x6bb   :  { %4171 = vmatprep.subr.mxu0 %v1517_v12 }
 0x6bc   :  { %v1662_v45 = vpop.permute.xlu0 %1661  ;;  %4172 = vmatpush3.msra.mxu0 %v1382_v47  ;;  %v1650_v26 = vpop.permute.xlu1 %1649 }
 0x6bd   :  { %v1671_v33 = vsel %vm1667_vm10, %v1650_v26, %v1662_v45  ;;  %4173 = vmatprep.subr.mxu0 %v1516_v42 }
 0x6be   :  { %v1683_v48 = vmul.f32 %v4024_v25, %v1671_v33  ;;  %4174 = vmatpush3.msra.mxu0 %v1381_v54 }
 0x6bf   :  { %1798 = vmatmul.mubr.f32.vlgmr.msra.gmra.mxu0 %v1684_v30 }
 0x6c0   :  { %v1658_v61 = vpop.permute.xlu0 %1657  ;;  %4418 = vmatprep.subr.mxu1 %v1683_v48  ;;  %v1646_v0 = vpop.permute.xlu1 %1645  ;;  %1802 = vmatprep.mubr.f32.mxu0 %v1688_v17 }
 0x6c1   :  { %v1669_v22 = vsel %vm1667_vm10, %v1646_v0, %v1658_v61  ;;  %4419 = vmatpush3.msra.mxu1 %v1683_v48 }
 0x6c2   :  { %v1681_v4 = vmul.f32 %v4024_v25, %v1669_v22  ;;  %4420 = vmatprep.subr.mxu1 %v1682_v11 }
 0x6c3   :  { %1803 = vmatmul.mubr.f32.gmra.mxu0 %v1687_v15  ;;  %4421 = vmatpush3.msra.mxu1 %v1682_v11 }
 0x6c4   :  { %v1656_v5 = vpop.permute.xlu0 %1655  ;;  %4422 = vmatprep.subr.mxu1 %v1681_v4  ;;  %v1644_v16 = vpop.permute.xlu1 %1643  ;;  %1807 = vmatprep.mubr.f32.mxu0 %v1691_v51 }
 0x6c5   :  { %v1668_v1 = vsel %vm1667_vm10, %v1644_v16, %v1656_v5  ;;  %4423 = vmatpush3.msra.mxu1 %v1681_v4  ;;  %vm3899_vm10 = vcmask 850944  }
 0x6c6   :  { %v1680_v19 = vmul.f32 %v4024_v25, %v1668_v1 }
 0x6c7   :  { %1808 = vmatmul.mubr.f32.gmra.mxu0 %v1690_v18 }
 0x6c8   :  { %4424 = vmatprep.subr.mxu1 %v1680_v19  ;;  %1812 = vmatprep.mubr.f32.mxu0 %v1694_v49 }
 0x6c9   :  { %4425 = vmatpush3.msra.mxu1 %v1680_v19 }
 0x6ca   :  { %4427 = vmatmul.mubr.msk.f32.vlgmr.msra.gmra.mxu1 %vm1720_vm2, %v1689_v2  ;;  %4432 = vmatprep.subr.mxu1 %v1916_v56 }
 0x6cb   :  { %1813 = vmatmul.mubr.f32.gmra.mxu0 %v1693_v37  ;;  %4429 = vmatprep.mubr.msk.f32.mxu1 %vm1720_vm2, %v1692_v20 }
 0x6cc   :  { %4433 = vmatpush3.msra.mxu1 %v1916_v56 }
 0x6cd   :  { %4434 = vmatprep.subr.mxu1 %v1915_v57 }
 0x6ce   :  { %4430 = vmatmul.mubr.msk.f32.gmra.mxu1 %vm1720_vm2, %v1695_v21 }
 0x6cf   :  { %4435 = vmatpush3.msra.mxu1 %v1915_v57 }
 0x6d1   :  { %v1708_v32 = vpop.permute.xlu0 %1707  ;;  %v1703_v7 = vpop.permute.xlu1 %1702 }
 0x6d5   :  { %v1713_v43 = vpop.permute.xlu1 %1712  ;;  %v1718_v27 = vpop.permute.xlu0 %1717 }
 0x77f   :  { %v4175_v31 = vpop.f32.mrf.mxu0 }
 0x781   :  { %v4176_v50 = vpop.f32.mrf.mxu0 }
 0x782   :  { %v4177_v44 = vadd.f32 %v4176_v50, %v4175_v31 }
 0x783   :  { %v4178_v58 = vpop.f32.mrf.mxu0 }
 0x784   :  { %v1800_v34 = vadd.f32 %v4177_v44, %v1703_v7 }
 0x785   :  { %v4179_v39 = vpop.f32.mrf.mxu0 }
 0x786   :  { %v4180_v38 = vadd.f32 %v4179_v39, %v4178_v58 }
 0x787   :  { %v4181_v6 = vpop.f32.mrf.mxu0 }
 0x788   :  { %v1805_v8 = vadd.f32 %v4180_v38, %v1708_v32 }
 0x789   :  { %v4182_v9 = vpop.f32.mrf.mxu0 }
 0x78a   :  { %v4428_v40 = vpop.f32.mrf.mxu1  ;;  %v4183_v41 = vadd.f32 %v4182_v9, %v4181_v6 }
 0x78b   :  { %v1890_v55 = vadd.f32 %v4428_v40, %v1805_v8  ;;  %v4184_v3 = vpop.f32.mrf.mxu0 }
 0x78c   :  { %v1884_v59 = vpop.f32.mrf.mxu1  ;;  %v1810_v24 = vadd.f32 %v4183_v41, %v1713_v43 }
 0x78d   :  { %v1885_v29 = vadd.f32 %v1884_v59, %v1800_v34  ;;  %v4185_v28 = vpop.f32.mrf.mxu0  ;;  %1909 = vrot.lane.b32.xlu0 %v1890_v55, %s6904_s2 }
 0x78e   :  { %v4186_v60 = vadd.f32 %v4185_v28, %v4184_v3  ;;  %v4431_v35 = vpop.f32.mrf.mxu1 }
 0x78f   :  { %1907 = vrot.lane.b32.xlu1 %v1885_v29, %s6904_s2  ;;  %4436 = vmatprep.mubr.msk.f32.mxu1 %vm1019_vm1, %v1885_v29 }
 0x790   :  { %v1815_v52 = vadd.f32 %v4186_v60, %v1718_v27  ;;  %v1894_v62 = vpop.f32.mrf.mxu1  ;;  %4437 = vmatmul.mubr.msk.f32.vlgmr.msra.gmra.mxu1 %vm1019_vm1, %v1890_v55 }
 0x791   :  { %v1895_v63 = vadd.f32 %v1894_v62, %v1810_v24 }
 0x792   :  { %v1900_v46 = vadd.f32 %v4431_v35, %v1815_v52  ;;  %v2489_v52 = vld [vmem:[%s6871_s12 + $0x18] sm:$0xff] }
 0x793   :  { %1911 = vrot.lane.b32.xlu1 %v1895_v63, %s6904_s2  ;;  %4439 = vmatprep.mubr.msk.f32.mxu1 %vm1019_vm1, %v1895_v63 }
 0x794   :  { %1913 = vrot.lane.b32.xlu0 %v1900_v46, %s6904_s2  ;;  %4440 = vmatmul.mubr.msk.f32.gmra.mxu1 %vm1019_vm1, %v1900_v46  ;;  %v2487_v46 = vld [vmem:[%s6871_s12 + $0x8] sm:$0xff] }
 0x7ff   :  { %v1910_v53 = vpop.permute.xlu0 %1909 }
 0x801   :  { %v1908_v36 = vpop.permute.xlu1 %1907 }
 0x802   :  { %4442 = vmatprep.mubr.msk.f32.mxu1 %vm1019_vm1, %v1908_v36 }
 0x803   :  { %4443 = vmatmul.mubr.msk.f32.gmra.mxu1 %vm1019_vm1, %v1910_v53 }
 0x805   :  { %v1912_v23 = vpop.permute.xlu1 %1911 }
 0x806   :  { %v1914_v10 = vpop.permute.xlu0 %1913  ;;  %4445 = vmatprep.mubr.msk.f32.mxu1 %vm1019_vm1, %v1912_v23 }
 0x807   :  { %4446 = vmatmul.mubr.msk.f32.gmra.mxu1 %vm1019_vm1, %v1914_v10 }
 0x850   :  { %v5610_v12 = vpop.f32.mrf.mxu1 }
 0x851   :  { %6939 = vst [vmem:[#allocation16_spill] sm:$0xff] %v5610_v12  ;;  %2388 = vrot.lane.b32.xlu0 %v5610_v12, %s4705_s8  ;;  %2220 = vrot.lane.b32.xlu1 %v5610_v12, %s4700_s30 }
 0x852   :  { %v5620_v47 = vpop.f32.mrf.mxu1 }
 0x853   :  { %6940 = vst [vmem:[#allocation17_spill] sm:$0xff] %v5620_v47 }
 0x854   :  { %v5642_v42 = vpop.f32.mrf.mxu1 }
 0x855   :  { %2360 = vrot.lane.b32.xlu0 %v5610_v12, %s4688_s29  ;;  %2108 = vrot.lane.b32.xlu1 %v5610_v12, %s4706_s25  ;;  %6941 = vst [vmem:[#allocation18_spill] sm:$0xff] %v5642_v42 }
 0x856   :  { %v5652_v54 = vpop.f32.mrf.mxu1 }
 0x857   :  { %6942 = vst [vmem:[#allocation19_spill] sm:$0xff] %v5652_v54 }
 0x859   :  { %2444 = vrot.lane.b32.xlu1 %v5610_v12, %s4707_s3  ;;  %2302 = vrot.lane.b32.xlu0 %v5620_v47, %s6921_s5 }
 0x85d   :  { %2332 = vrot.lane.b32.xlu1 %v5610_v12, %s4709_s14  ;;  %2162 = vrot.lane.b32.xlu0 %v5620_v47, %s4710_s0 }
 0x861   :  { %2192 = vrot.lane.b32.xlu1 %v5610_v12, %s6917_s26  ;;  %2062 = vrot.lane.b32.xlu0 %v5620_v47, %s4691_s6 }
 0x865   :  { %2080 = vrot.lane.b32.xlu1 %v5610_v12, %s6915_s1  ;;  %2274 = vrot.lane.b32.xlu0 %v5620_v47, %s4713_s9 }
 0x869   :  { %2416 = vrot.lane.b32.xlu1 %v5610_v12, %s4714_s24  ;;  %2134 = vrot.lane.b32.xlu0 %v5620_v47, %s6904_s2 }
 0x86d   :  { %2304 = vrot.lane.b32.xlu1 %v5610_v12, %s6921_s5  ;;  %2392 = vrot.lane.b32.xlu0 %v5642_v42, %s4705_s8 }
 0x871   :  { %2164 = vrot.lane.b32.xlu1 %v5610_v12, %s4710_s0  ;;  %2364 = vrot.lane.b32.xlu0 %v5642_v42, %s4688_s29 }
 0x875   :  { %2064 = vrot.lane.b32.xlu1 %v5610_v12, %s4691_s6  ;;  %2166 = vrot.lane.b32.xlu0 %v5652_v54, %s4710_s0 }
 0x879   :  { %2276 = vrot.lane.b32.xlu1 %v5610_v12, %s4713_s9  ;;  %2066 = vrot.lane.b32.xlu0 %v5652_v54, %s4691_s6 }
 0x87d   :  { %2136 = vrot.lane.b32.xlu1 %v5610_v12, %s6904_s2  ;;  %2278 = vrot.lane.b32.xlu0 %v5652_v54, %s4713_s9 }
 0x881   :  { %2248 = vrot.lane.b32.xlu1 %v5610_v12, %s6919_s7  ;;  %2138 = vrot.lane.b32.xlu0 %v5652_v54, %s6904_s2 }
 0x885   :  { %2218 = vrot.lane.b32.xlu1 %v5620_v47, %s4700_s30  ;;  %2250 = vrot.lane.b32.xlu0 %v5652_v54, %s6919_s7 }
 0x889   :  { %2106 = vrot.lane.b32.xlu1 %v5620_v47, %s4706_s25 }
 0x88d   :  { %2442 = vrot.lane.b32.xlu1 %v5620_v47, %s4707_s3 }
 0x891   :  { %2330 = vrot.lane.b32.xlu1 %v5620_v47, %s4709_s14 }
 0x895   :  { %2190 = vrot.lane.b32.xlu1 %v5620_v47, %s6917_s26 }
 0x899   :  { %2078 = vrot.lane.b32.xlu1 %v5620_v47, %s6915_s1 }
 0x89d   :  { %2414 = vrot.lane.b32.xlu1 %v5620_v47, %s4714_s24 }
 0x8a1   :  { %2386 = vrot.lane.b32.xlu1 %v5620_v47, %s4705_s8 }
 0x8a5   :  { %2358 = vrot.lane.b32.xlu1 %v5620_v47, %s4688_s29 }
 0x8a9   :  { %2224 = vrot.lane.b32.xlu1 %v5642_v42, %s4700_s30 }
 0x8ad   :  { %2112 = vrot.lane.b32.xlu1 %v5642_v42, %s4706_s25 }
 0x8b1   :  { %2448 = vrot.lane.b32.xlu1 %v5642_v42, %s4707_s3 }
 0x8b5   :  { %2336 = vrot.lane.b32.xlu1 %v5642_v42, %s4709_s14 }
 0x8b9   :  { %2196 = vrot.lane.b32.xlu1 %v5642_v42, %s6917_s26 }
 0x8bd   :  { %2084 = vrot.lane.b32.xlu1 %v5642_v42, %s6915_s1 }
 0x8c1   :  { %2420 = vrot.lane.b32.xlu1 %v5642_v42, %s4714_s24 }
 0x8c3   :  { %v5704_v45 = vpop.permute.xlu1 %2220  ;;  %v5706_v26 = vpop.f32.mrf.mxu1 }
 0x8c4   :  { %2232 = vrot.lane.b32.xlu0 %v5706_v26, %s6917_s26  ;;  %v5756_v0 = vpop.permute.xlu0 %2388 }
 0x8c5   :  { %2308 = vrot.lane.b32.xlu1 %v5642_v42, %s6921_s5  ;;  %6944 = vst [vmem:[#allocation21_spill] sm:$0xff] %v5756_v0  ;;  %v5786_v18 = vpop.f32.mrf.mxu1 }
 0x8c6   :  { %6950 = vst [vmem:[#allocation27_spill] sm:$0xff] %v5786_v18 }
 0x8c7   :  { %v5712_v30 = vpop.permute.xlu1 %2108  ;;  %v5854_v44 = vpop.f32.mrf.mxu1 }
 0x8c8   :  { %2120 = vrot.lane.b32.xlu0 %v5706_v26, %s6915_s1  ;;  %v5768_v22 = vpop.permute.xlu0 %2360 }
 0x8c9   :  { %2168 = vrot.lane.b32.xlu1 %v5642_v42, %s4710_s0  ;;  %6945 = vst [vmem:[#allocation22_spill] sm:$0xff] %v5768_v22  ;;  %v5892_v34 = vpop.f32.mrf.mxu1 }
 0x8cb   :  { %v5718_v25 = vpop.permute.xlu1 %2444 }
 0x8cc   :  { %2456 = vrot.lane.b32.xlu0 %v5706_v26, %s4714_s24  ;;  %v5778_v5 = vpop.permute.xlu0 %2302 }
 0x8cd   :  { %2068 = vrot.lane.b32.xlu1 %v5642_v42, %s4691_s6  ;;  %6948 = vst [vmem:[#allocation25_spill] sm:$0xff] %v5778_v5 }
 0x8cf   :  { %v5724_v14 = vpop.permute.xlu1 %2332 }
 0x8d0   :  { %2344 = vrot.lane.b32.xlu0 %v5706_v26, %s6921_s5  ;;  %v5792_v1 = vpop.permute.xlu0 %2162 }
 0x8d1   :  { %2280 = vrot.lane.b32.xlu1 %v5642_v42, %s4713_s9  ;;  %6951 = vst [vmem:[#allocation28_spill] sm:$0xff] %v5792_v1 }
 0x8d3   :  { %v5730_v33 = vpop.permute.xlu1 %2192 }
 0x8d4   :  { %2204 = vrot.lane.b32.xlu0 %v5706_v26, %s4710_s0  ;;  %v5802_v2 = vpop.permute.xlu0 %2062 }
 0x8d5   :  { %2140 = vrot.lane.b32.xlu1 %v5642_v42, %s6904_s2  ;;  %6952 = vst [vmem:[#allocation29_spill] sm:$0xff] %v5802_v2 }
 0x8d7   :  { %v5736_v17 = vpop.permute.xlu1 %2080 }
 0x8d8   :  { %2092 = vrot.lane.b32.xlu0 %v5706_v26, %s4691_s6  ;;  %v5814_v20 = vpop.permute.xlu0 %2274 }
 0x8d9   :  { %2252 = vrot.lane.b32.xlu1 %v5642_v42, %s6919_s7  ;;  %6953 = vst [vmem:[#allocation30_spill] sm:$0xff] %v5814_v20 }
 0x8db   :  { %v5742_v48 = vpop.permute.xlu1 %2416 }
 0x8dc   :  { %2428 = vrot.lane.b32.xlu0 %v5706_v26, %s4705_s8  ;;  %v5824_v57 = vpop.permute.xlu0 %2134 }
 0x8dd   :  { %2222 = vrot.lane.b32.xlu1 %v5652_v54, %s4700_s30  ;;  %6954 = vst [vmem:[#allocation31_spill] sm:$0xff] %v5824_v57 }
 0x8df   :  { %v5748_v11 = vpop.permute.xlu1 %2304 }
 0x8e0   :  { %6943 = vst [vmem:[#allocation20_spill] sm:$0xff] %v5748_v11  ;;  %2316 = vrot.lane.b32.xlu0 %v5706_v26, %s4713_s9  ;;  %v5836_v50 = vpop.permute.xlu0 %2392 }
 0x8e1   :  { %2110 = vrot.lane.b32.xlu1 %v5652_v54, %s4706_s25  ;;  %6955 = vst [vmem:[#allocation32_spill] sm:$0xff] %v5836_v50 }
 0x8e3   :  { %v5754_v61 = vpop.permute.xlu1 %2164 }
 0x8e4   :  { %2176 = vrot.lane.b32.xlu0 %v5706_v26, %s6904_s2  ;;  %v5846_v38 = vpop.permute.xlu0 %2364 }
 0x8e5   :  { %2446 = vrot.lane.b32.xlu1 %v5652_v54, %s4707_s3  ;;  %6958 = vst [vmem:[#allocation35_spill] sm:$0xff] %v5846_v38  ;;  %s4718_s3 = smov 7  }
 0x8e7   :  { %v5762_v15 = vpop.permute.xlu1 %2064 }
 0x8e8   :  { %2288 = vrot.lane.b32.xlu0 %v5706_v26, %s6919_s7  ;;  %v5860_v6 = vpop.permute.xlu0 %2166 }
 0x8e9   :  { %2334 = vrot.lane.b32.xlu1 %v5652_v54, %s4709_s14 }
 0x8eb   :  { %v5770_v51 = vpop.permute.xlu1 %2276 }
 0x8ec   :  { %6946 = vst [vmem:[#allocation23_spill] sm:$0xff] %v5770_v51  ;;  %2148 = vrot.lane.b32.xlu0 %v5706_v26, %s4706_s25  ;;  %v5870_v9 = vpop.permute.xlu0 %2066 }
 0x8ed   :  { %2194 = vrot.lane.b32.xlu1 %v5652_v54, %s6917_s26 }
 0x8ef   :  { %v5776_v4 = vpop.permute.xlu1 %2136 }
 0x8f0   :  { %6947 = vst [vmem:[#allocation24_spill] sm:$0xff] %v5776_v4  ;;  %2260 = vrot.lane.b32.xlu0 %v5706_v26, %s4700_s30  ;;  %v5882_v41 = vpop.permute.xlu0 %2278 }
 0x8f1   :  { %2082 = vrot.lane.b32.xlu1 %v5652_v54, %s6915_s1  ;;  %6960 = vst [vmem:[#allocation37_spill] sm:$0xff] %v5882_v41 }
 0x8f3   :  { %v5784_v16 = vpop.permute.xlu1 %2248 }
 0x8f4   :  { %6949 = vst [vmem:[#allocation26_spill] sm:$0xff] %v5784_v16  ;;  %2230 = vrot.lane.b32.xlu0 %v5786_v18, %s6917_s26  ;;  %v5894_v59 = vpop.permute.xlu0 %2138 }
 0x8f5   :  { %2418 = vrot.lane.b32.xlu1 %v5652_v54, %s4714_s24  ;;  %6961 = vst [vmem:[#allocation38_spill] sm:$0xff] %v5894_v59  ;;  %v2486_v59 = vld [vmem:[%s6871_s12] sm:$0xff] }
 0x8f7   :  { %v5794_v49 = vpop.permute.xlu1 %2218 }
 0x8f8   :  { %2118 = vrot.lane.b32.xlu0 %v5786_v18, %s6915_s1  ;;  %v5906_v28 = vpop.permute.xlu0 %2250 }
 0x8f9   :  { %2306 = vrot.lane.b32.xlu1 %v5652_v54, %s6921_s5  ;;  %6962 = vst [vmem:[#allocation39_spill] sm:$0xff] %v5906_v28 }
 0x8fb   :  { %v5800_v19 = vpop.permute.xlu1 %2106 }
 0x8fc   :  { %2454 = vrot.lane.b32.xlu0 %v5786_v18, %s4714_s24 }
 0x8fd   :  { %2390 = vrot.lane.b32.xlu1 %v5652_v54, %s4705_s8 }
 0x8ff   :  { %v5808_v37 = vpop.permute.xlu1 %2442 }
 0x900   :  { %2342 = vrot.lane.b32.xlu0 %v5786_v18, %s6921_s5 }
 0x901   :  { %2362 = vrot.lane.b32.xlu1 %v5652_v54, %s4688_s29 }
 0x903   :  { %v5816_v21 = vpop.permute.xlu1 %2330 }
 0x904   :  { %2202 = vrot.lane.b32.xlu0 %v5786_v18, %s4710_s0 }
 0x905   :  { %2400 = vrot.lane.b32.xlu1 %v5706_v26, %s4688_s29 }
 0x907   :  { %v5822_v56 = vpop.permute.xlu1 %2190 }
 0x908   :  { %2090 = vrot.lane.b32.xlu0 %v5786_v18, %s4691_s6 }
 0x909   :  { %2044 = vrot.lane.b32.xlu1 %v5706_v26, %s4699_s28 }
 0x90b   :  { %v5830_v31 = vpop.permute.xlu1 %2078 }
 0x90c   :  { %2426 = vrot.lane.b32.xlu0 %v5786_v18, %s4705_s8 }
 0x90d   :  { %2372 = vrot.lane.b32.xlu1 %v5706_v26, %s4709_s14 }
 0x90f   :  { %v5838_v58 = vpop.permute.xlu1 %2414 }
 0x910   :  { %6956 = vst [vmem:[#allocation33_spill] sm:$0xff] %v5838_v58  ;;  %2398 = vrot.lane.b32.xlu0 %v5786_v18, %s4688_s29 }
 0x911   :  { %2314 = vrot.lane.b32.xlu1 %v5786_v18, %s4713_s9 }
 0x913   :  { %v5844_v39 = vpop.permute.xlu1 %2386 }
 0x914   :  { %6957 = vst [vmem:[#allocation34_spill] sm:$0xff] %v5844_v39  ;;  %2042 = vrot.lane.b32.xlu0 %v5786_v18, %s4699_s28  ;;  %v2471_v39 = vld [vmem:[%s6870_s11 + $0x8] sm:$0xff] }
 0x915   :  { %2174 = vrot.lane.b32.xlu1 %v5786_v18, %s6904_s2  ;;  %2574 = vmatprep.mubr.f32.mxu0 %v2471_v39 }
 0x917   :  { %v5852_v32 = vpop.permute.xlu1 %2358 }
 0x918   :  { %6959 = vst [vmem:[#allocation36_spill] sm:$0xff] %v5852_v32  ;;  %2236 = vrot.lane.b32.xlu0 %v5854_v44, %s6917_s26 }
 0x919   :  { %2286 = vrot.lane.b32.xlu1 %v5786_v18, %s6919_s7 }
 0x91b   :  { %v5862_v7 = vpop.permute.xlu1 %2224 }
 0x91c   :  { %2124 = vrot.lane.b32.xlu0 %v5854_v44, %s6915_s1 }
 0x91d   :  { %2146 = vrot.lane.b32.xlu1 %v5786_v18, %s4706_s25 }
 0x91f   :  { %v5868_v8 = vpop.permute.xlu1 %2112 }
 0x920   :  { %2460 = vrot.lane.b32.xlu0 %v5854_v44, %s4714_s24 }
 0x921   :  { %2404 = vrot.lane.b32.xlu1 %v5854_v44, %s4688_s29 }
 0x923   :  { %v5876_v40 = vpop.permute.xlu1 %2448 }
 0x924   :  { %2348 = vrot.lane.b32.xlu0 %v5854_v44, %s6921_s5 }
 0x925   :  { %2048 = vrot.lane.b32.xlu1 %v5854_v44, %s4699_s28 }
 0x927   :  { %v5884_v55 = vpop.permute.xlu1 %2336 }
 0x928   :  { %2208 = vrot.lane.b32.xlu0 %v5854_v44, %s4710_s0 }
 0x929   :  { %2376 = vrot.lane.b32.xlu1 %v5854_v44, %s4709_s14 }
 0x92b   :  { %v5890_v3 = vpop.permute.xlu1 %2196 }
 0x92c   :  { %2096 = vrot.lane.b32.xlu0 %v5854_v44, %s4691_s6 }
 0x92d   :  { %2178 = vrot.lane.b32.xlu1 %v5892_v34, %s6904_s2 }
 0x92f   :  { %v5900_v29 = vpop.permute.xlu1 %2084 }
 0x930   :  { %2432 = vrot.lane.b32.xlu0 %v5854_v44, %s4705_s8 }
 0x931   :  { %2290 = vrot.lane.b32.xlu1 %v5892_v34, %s6919_s7 }
 0x933   :  { %v5908_v43 = vpop.permute.xlu1 %2420 }
 0x934   :  { %2320 = vrot.lane.b32.xlu0 %v5854_v44, %s4713_s9 }
 0x935   :  { %2150 = vrot.lane.b32.xlu1 %v5892_v34, %s4706_s25 }
 0x936   :  { %v5914_v60 = vpop.permute.xlu0 %2232 }
 0x937   :  { %v5916_v35 = vpop.permute.xlu1 %2308 }
 0x938   :  { %2180 = vrot.lane.b32.xlu0 %v5854_v44, %s6904_s2  ;;  %s4719_s2 = smov 2  }
 0x939   :  { %2262 = vrot.lane.b32.xlu1 %v5892_v34, %s4700_s30 }
 0x93a   :  { %v5922_v27 = vpop.permute.xlu0 %2120 }
 0x93b   :  { %v5924_v24 = vpop.permute.xlu1 %2168 }
 0x93c   :  { %2292 = vrot.lane.b32.xlu0 %v5854_v44, %s6919_s7 }
 0x93d   :  { %2246 = vrot.lane.b32.xlu1 %v5620_v47, %s6919_s7  ;;  %s7036_s7 = smov 32  }
 0x93e   :  { %v5933_v62 = vpop.permute.xlu0 %2456 }
 0x93f   :  { %v5935_v63 = vpop.permute.xlu1 %2068 }
 0x940   :  { %2152 = vrot.lane.b32.xlu0 %v5854_v44, %s4706_s25  ;;  %s7038_s25 = smov 112  }
 0x941   :  { %2507 = vperm.xlu1 %4542, %v2489_v52  }
 0x942   :  { %v5942_v36 = vpop.permute.xlu0 %2344 }
 0x943   :  { %v5946_v53 = vpop.permute.xlu1 %2280 }
 0x944   :  { %2264 = vrot.lane.b32.xlu0 %v5854_v44, %s4700_s30  ;;  %6963 = vst [vmem:[#allocation40_spill] sm:$0xff] %v5946_v53 }
 0x945   :  { %2497 = vperm.xlu1 %4542, %v2487_v46  }
 0x946   :  { %v5948_v23 = vpop.permute.xlu0 %2204 }
 0x947   :  { %v5954_v52 = vpop.permute.xlu1 %2140 }
 0x948   :  { %2234 = vrot.lane.b32.xlu0 %v5892_v34, %s6917_s26  ;;  %6964 = vst [vmem:[#allocation41_spill] sm:$0xff] %v5954_v52  ;;  %s7037_s26 = smov 48  }
 0x94a   :  { %v5952_v10 = vpop.permute.xlu0 %2092 }
 0x94b   :  { %v5962_v46 = vpop.permute.xlu1 %2252 }
 0x94c   :  { %2122 = vrot.lane.b32.xlu0 %v5892_v34, %s6915_s1  ;;  %6965 = vst [vmem:[#allocation42_spill] sm:$0xff] %v5962_v46  ;;  %s4724_s1 = smov 56  }
 0x94e   :  { %v5958_v13 = vpop.permute.xlu0 %2428 }
 0x94f   :  { %v5970_v22 = vpop.permute.xlu1 %2222 }
 0x950   :  { %2458 = vrot.lane.b32.xlu0 %v5892_v34, %s4714_s24 }
 0x952   :  { %v5964_v32 = vpop.permute.xlu0 %2316 }
 0x953   :  { %v5978_v38 = vpop.permute.xlu1 %2110 }
 0x954   :  { %2346 = vrot.lane.b32.xlu0 %v5892_v34, %s6921_s5  ;;  %s4723_s5 = smov 40  }
 0x956   :  { %v5968_v16 = vpop.permute.xlu0 %2176 }
 0x957   :  { %v5986_v47 = vpop.permute.xlu1 %2446 }
 0x958   :  { %2206 = vrot.lane.b32.xlu0 %v5892_v34, %s4710_s0  ;;  %s7039_s0 = smov 120  }
 0x95a   :  { %v5974_v28 = vpop.permute.xlu0 %2288 }
 0x95b   :  { %6966 = vst [vmem:[#allocation43_spill] sm:$0xff] %v5974_v28  ;;  %v5997_v12 = vpop.permute.xlu1 %2334 }
 0x95c   :  { %2094 = vrot.lane.b32.xlu0 %v5892_v34, %s4691_s6  ;;  %s7025_s6 = smov 3  }
 0x95e   :  { %v5980_v46 = vpop.permute.xlu0 %2148 }
 0x95f   :  { %6967 = vst [vmem:[#allocation44_spill] sm:$0xff] %v5980_v46  ;;  %v6008_v39 = vpop.permute.xlu1 %2194 }
 0x960   :  { %2430 = vrot.lane.b32.xlu0 %v5892_v34, %s4705_s8  ;;  %s7028_s8 = smov 125  }
 0x962   :  { %v5984_v20 = vpop.permute.xlu0 %2260 }
 0x963   :  { %6968 = vst [vmem:[#allocation45_spill] sm:$0xff] %v5984_v20  ;;  %v2473_v20 = vld [vmem:[%s6870_s11 + $0x18] sm:$0xff]  ;;  %v6016_v4 = vpop.permute.xlu1 %2082 }
 0x964   :  { %2318 = vrot.lane.b32.xlu0 %v5892_v34, %s4713_s9  ;;  %2659 = vmatprep.mubr.f32.mxu1 %v2473_v20  ;;  %v2488_v20 = vld [vmem:[%s6871_s12 + $0x10] sm:$0xff]  ;;  %s4717_s9 = smov 121   ;;  %s7030_s12 = smov 64  }
 0x966   :  { %v5993_v57 = vpop.permute.xlu0 %2230 }
 0x967   :  { %v6027_v41 = vpop.permute.xlu1 %2418 }
 0x968   :  { %2402 = vrot.lane.b32.xlu0 %v5892_v34, %s4688_s29 }
 0x96a   :  { %v5999_v51 = vpop.permute.xlu0 %2118 }
 0x96b   :  { %v6034_v42 = vpop.permute.xlu1 %2306 }
 0x96c   :  { %2046 = vrot.lane.b32.xlu0 %v5892_v34, %s4699_s28  ;;  %s7027_s28 = smov 5  }
 0x96e   :  { %v6006_v28 = vpop.permute.xlu0 %2454 }
 0x96f   :  { %v6040_v5 = vpop.permute.xlu1 %2390 }
 0x970   :  { %2374 = vrot.lane.b32.xlu0 %v5892_v34, %s4709_s14  ;;  %6972 = vst [vmem:[#allocation49_spill] sm:$0xff] %v6040_v5 }
 0x972   :  { %v6012_v0 = vpop.permute.xlu0 %2342 }
 0x974   :  { %2370 = vrot.lane.b32.xlu0 %v5786_v18, %s4709_s14  ;;  %s4715_s14 = smov 6  }
 0x976   :  { %v6018_v46 = vpop.permute.xlu0 %2202 }
 0x978   :  { %2258 = vrot.lane.b32.xlu0 %v5786_v18, %s4700_s30  ;;  %s7032_s30 = smov 96  }
 0x97a   :  { %v6025_v54 = vpop.permute.xlu0 %2090 }
 0x97c   :  { %2502 = vperm.xlu0 %4541, %v2488_v20   ;;  %v6044_v20 = vpop.permute.xlu1 %2362 }
 0x97d   :  { %6973 = vst [vmem:[#allocation50_spill] sm:$0xff] %v6044_v20 }
 0x97e   :  { %v6032_v53 = vpop.permute.xlu0 %2426 }
 0x97f   :  { %6969 = vst [vmem:[#allocation46_spill] sm:$0xff] %v6032_v53 }
 0x980   :  { %2492 = vperm.xlu0 %4541, %v2486_v59   ;;  %v6048_v1 = vpop.permute.xlu1 %2400 }
 0x981   :  { %6974 = vst [vmem:[#allocation51_spill] sm:$0xff] %v6048_v1 }
 0x982   :  { %v6036_v50 = vpop.permute.xlu0 %2398 }
 0x983   :  { %6970 = vst [vmem:[#allocation47_spill] sm:$0xff] %v6036_v50 }
 0x986   :  { %v6038_v52 = vpop.permute.xlu0 %2042 }
 0x987   :  { %6971 = vst [vmem:[#allocation48_spill] sm:$0xff] %v6038_v52 }
 0x98a   :  { %v2237_v2 = vpop.permute.xlu0 %2236 }
 0x98b   :  { %v2245_v18 = vsel %vm1409_vm8, %v5862_v7, %v2237_v2 }
 0x98c   :  { %4205 = vmatprep.subr.mxu0 %v2245_v18  ;;  %v6054_v18 = vpop.permute.xlu1 %2044 }
 0x98d   :  { %6975 = vst [vmem:[#allocation52_spill] sm:$0xff] %v6054_v18 }
 0x98e   :  { %v2125_v58 = vpop.permute.xlu0 %2124 }
 0x98f   :  { %v2133_v53 = vsel %vm1409_vm8, %v5868_v8, %v2125_v58 }
 0x990   :  { %4206 = vmatpush3.msra.mxu0 %v2133_v53  ;;  %v6056_v20 = vpop.permute.xlu1 %2372 }
 0x991   :  { %6976 = vst [vmem:[#allocation53_spill] sm:$0xff] %v6056_v20 }
 0x992   :  { %v2461_v59 = vpop.permute.xlu0 %2460 }
 0x993   :  { %v2469_v52 = vsel %vm1409_vm8, %v5876_v40, %v2461_v59 }
 0x994   :  { %4249 = vmatprep.subr.mxu1 %v2469_v52  ;;  %v6058_v8 = vpop.permute.xlu1 %2314 }
 0x995   :  { %6977 = vst [vmem:[#allocation54_spill] sm:$0xff] %v6058_v8 }
 0x996   :  { %v2349_v50 = vpop.permute.xlu0 %2348 }
 0x997   :  { %v2357_v5 = vsel %vm1409_vm8, %v5884_v55, %v2349_v50 }
 0x998   :  { %4250 = vmatpush3.msra.mxu1 %v2357_v5  ;;  %v6062_v11 = vpop.permute.xlu1 %2174 }
 0x999   :  { %6978 = vst [vmem:[#allocation55_spill] sm:$0xff] %v6062_v11 }
 0x99a   :  { %v2209_v2 = vpop.permute.xlu0 %2208 }
 0x99c   :  { %v6066_v52 = vpop.permute.xlu1 %2286 }
 0x99d   :  { %6979 = vst [vmem:[#allocation56_spill] sm:$0xff] %v6066_v52  ;;  %v2243_v52 = vsel %vm1409_vm8, %v5704_v45, %v5914_v60 }
 0x99e   :  { %v2097_v7 = vpop.permute.xlu0 %2096 }
 0x99f   :  { %v2105_v60 = vsel %vm1409_vm8, %v5900_v29, %v2097_v7  ;;  %v2466_v29 = vsel %vm1409_vm8, %v5808_v37, %v6006_v28 }
 0x9a0   :  { %v6072_v55 = vpop.permute.xlu1 %2146 }
 0x9a1   :  { %6981 = vst [vmem:[#allocation58_spill] sm:$0xff] %v6072_v55 }
 0x9a2   :  { %v2433_v58 = vpop.permute.xlu0 %2432 }
 0x9a4   :  { %v6076_v18 = vpop.permute.xlu1 %2404 }
 0x9a6   :  { %v2321_v53 = vpop.permute.xlu0 %2320 }
 0x9aa   :  { %v6060_v1 = vpop.permute.xlu0 %2180 }
 0x9ae   :  { %v6064_v40 = vpop.permute.xlu0 %2292 }
 0x9b2   :  { %v6068_v50 = vpop.permute.xlu0 %2152 }
 0x9b6   :  { %v6070_v5 = vpop.permute.xlu0 %2264 }
 0x9b7   :  { %6980 = vst [vmem:[#allocation57_spill] sm:$0xff] %v6070_v5  ;;  %v2131_v5 = vsel %vm1409_vm8, %v5712_v30, %v5922_v27  ;;  %v2217_v30 = vsel %vm1409_vm8, %v5890_v3, %v2209_v2  ;;  %v2329_v27 = vsel %vm1409_vm8, %v5916_v35, %v2321_v53  ;;  %v2214_v35 = vsel %vm1409_vm8, %v5822_v56, %v6018_v46  ;;  %v6988_v46 = vld [vmem:[#allocation29_spill] sm:$0xff]  ;;  %v6993_v53 = vld [vmem:[#allocation18_spill] sm:$0xff] }
 0x9b8   :  { %v6991_v2 = vld [vmem:[#allocation41_spill] sm:$0xff] }
 0x9b9   :  { %v2161_v7 = vsel %vm1409_vm8, %v6991_v2, %v6068_v50 }
 0x9ba   :  { %v2235_v59 = vpop.permute.xlu0 %2234 }
 0x9bb   :  { %v2244_v20 = vsel %vm1409_vm8, %v5970_v22, %v2235_v59  ;;  %v2242_v22 = vsel %vm1409_vm8, %v5794_v49, %v5993_v57 }
 0x9bc   :  { %4207 = vmatprep.subr.mxu0 %v2244_v20 }
 0x9be   :  { %v2123_v8 = vpop.permute.xlu0 %2122 }
 0x9bf   :  { %v2132_v11 = vsel %vm1409_vm8, %v5978_v38, %v2123_v8  ;;  %v2130_v38 = vsel %vm1409_vm8, %v5800_v19, %v5999_v51  ;;  %v2467_v19 = vsel %vm1409_vm8, %v5718_v25, %v5933_v62 }
 0x9c0   :  { %4208 = vmatpush3.msra.mxu0 %v2132_v11  ;;  %v6092_v11 = vpop.permute.xlu1 %2048 }
 0x9c1   :  { %4209 = vmatprep.subr.mxu0 %v2243_v52  ;;  %v2057_v52 = vsel %vm1409_vm8, %v6993_v53, %v6092_v11  ;;  %v2472_v53 = vld [vmem:[%s6870_s11 + $0x10] sm:$0xff] }
 0x9c2   :  { %4210 = vmatpush3.msra.mxu0 %v2131_v5  ;;  %v2459_v55 = vpop.permute.xlu0 %2458  ;;  %v6994_v5 = vld [vmem:[#allocation40_spill] sm:$0xff] }
 0x9c3   :  { %4211 = vmatprep.subr.mxu0 %v2242_v22  ;;  %v2468_v45 = vsel %vm1409_vm8, %v5986_v47, %v2459_v55  ;;  %v2355_v47 = vsel %vm1409_vm8, %v5724_v14, %v5942_v36  ;;  %v2441_v14 = vsel %vm1409_vm8, %v5908_v43, %v2433_v58  ;;  %v6992_v58 = vld [vmem:[#allocation32_spill] sm:$0xff]  ;;  %v2301_v55 = vsel %vm1409_vm8, %v6994_v5, %v6064_v40  ;;  %v6995_v22 = vld [vmem:[#allocation38_spill] sm:$0xff] }
 0x9c4   :  { %4212 = vmatpush3.msra.mxu0 %v2130_v38  ;;  %4251 = vmatprep.subr.mxu1 %v2468_v45  ;;  %v6108_v57 = vpop.permute.xlu1 %2376  ;;  %v2413_v8 = vsel %vm1409_vm8, %v6992_v58, %v6076_v18  ;;  %v6996_v38 = vld [vmem:[#allocation49_spill] sm:$0xff]  ;;  %v6999_v40 = vld [vmem:[#allocation44_spill] sm:$0xff] }
 0x9c5   :  { %4213 = vmatprep.subr.mxu0 %v2217_v30  ;;  %v6997_v18 = vld [vmem:[#allocation37_spill] sm:$0xff]  ;;  %v2483_v5 = vld [vmem:[%s6870_s11 + $0x68] sm:$0xff] }
 0x9c6   :  { %4214 = vmatpush3.msra.mxu0 %v2105_v60  ;;  %v2347_v49 = vpop.permute.xlu0 %2346  ;;  %v6998_v60 = vld [vmem:[#allocation19_spill] sm:$0xff] }
 0x9c7   :  { %v2356_v51 = vsel %vm1409_vm8, %v5997_v12, %v2347_v49  ;;  %v2354_v12 = vsel %vm1409_vm8, %v5816_v21, %v6012_v0  ;;  %v2215_v0 = vsel %vm1409_vm8, %v5730_v33, %v5948_v23  ;;  %v2103_v21 = vsel %vm1409_vm8, %v5736_v17, %v5952_v10  ;;  %v6986_v10 = vld [vmem:[#allocation33_spill] sm:$0xff]  ;;  %v7000_v49 = vld [vmem:[#allocation24_spill] sm:$0xff] }
 0x9c8   :  { %4252 = vmatpush3.msra.mxu1 %v2356_v51  ;;  %v2179_v37 = vpop.permute.xlu1 %2178  ;;  %v2189_v33 = vsel %vm1409_vm8, %v5924_v24, %v6060_v1  ;;  %v2077_v17 = vsel %vm1409_vm8, %v5935_v63, %v5854_v44  ;;  %v2187_v1 = vsel %vm1409_vm8, %v5754_v61, %v5968_v16  ;;  %v2439_v44 = vsel %vm1409_vm8, %v5742_v48, %v5958_v13  ;;  %v6983_v24 = vld [vmem:[#allocation55_spill] sm:$0xff]  ;;  %v6984_v63 = vld [vmem:[#allocation28_spill] sm:$0xff]  ;;  %v6985_v16 = vld [vmem:[#allocation46_spill] sm:$0xff] }
 0x9c9   :  { %4253 = vmatprep.subr.mxu1 %v2467_v19  ;;  %v2186_v61 = vsel %vm1409_vm8, %v6984_v63, %v6983_v24  ;;  %v2438_v13 = vsel %vm1409_vm8, %v6986_v10, %v6985_v16  ;;  %v6987_v48 = vld [vmem:[#allocation27_spill] sm:$0xff]  ;;  %v2159_v51 = vsel %vm1409_vm8, %v7000_v49, %v6999_v40  ;;  %v7018_v63 = vld [vmem:[#allocation50_spill] sm:$0xff] }
 0x9ca   :  { %4254 = vmatpush3.msra.mxu1 %v2355_v47  ;;  %v2207_v3 = vpop.permute.xlu0 %2206  ;;  %v7001_v19 = vld [vmem:[#allocation51_spill] sm:$0xff]  ;;  %v7002_v47 = vld [vmem:[#allocation21_spill] sm:$0xff] }
 0x9cb   :  { %4255 = vmatprep.subr.mxu1 %v2466_v29  ;;  %v2216_v25 = vsel %vm1409_vm8, %v6008_v39, %v2207_v3  ;;  %v6990_v39 = vld [vmem:[#allocation25_spill] sm:$0xff]  ;;  %v2411_v3 = vsel %vm1409_vm8, %v7002_v47, %v7001_v19  ;;  %v7003_v29 = vld [vmem:[#allocation43_spill] sm:$0xff] }
 0x9cc   :  { %4215 = vmatprep.subr.mxu0 %v2216_v25  ;;  %4256 = vmatpush3.msra.mxu1 %v2354_v12  ;;  %v2291_v23 = vpop.permute.xlu1 %2290  ;;  %v7004_v12 = vld [vmem:[#allocation23_spill] sm:$0xff] }
 0x9cd   :  { %4257 = vmatprep.subr.mxu1 %v2441_v14  ;;  %v2300_v30 = vsel %vm1409_vm8, %v6997_v18, %v2291_v23  ;;  %v2299_v25 = vsel %vm1409_vm8, %v7004_v12, %v7003_v29  ;;  %v7005_v14 = vld [vmem:[#allocation52_spill] sm:$0xff]  ;;  %v2474_v16 = vld [vmem:[%s6870_s11 + $0x20] sm:$0xff] }
 0x9ce   :  { %4258 = vmatpush3.msra.mxu1 %v2329_v27  ;;  %v2095_v62 = vpop.permute.xlu0 %2094  ;;  %v7006_v27 = vld [vmem:[#allocation16_spill] sm:$0xff]  ;;  %v7019_v10 = vld [vmem:[#allocation39_spill] sm:$0xff] }
 0x9cf   :  { %v2104_v28 = vsel %vm1409_vm8, %v6016_v4, %v2095_v62  ;;  %v2102_v4 = vsel %vm1409_vm8, %v5830_v31, %v6025_v54  ;;  %v2188_v54 = vsel %vm1409_vm8, %v5860_v6, %v2179_v37  ;;  %v2076_v31 = vsel %vm1409_vm8, %v5870_v9, %v5892_v34  ;;  %v6982_v9 = vld [vmem:[#allocation20_spill] sm:$0xff] }
 0x9d0   :  { %4216 = vmatpush3.msra.mxu0 %v2104_v28  ;;  %v2075_v6 = vsel %vm1409_vm8, %v5762_v15, %v5706_v26  ;;  %v2327_v34 = vsel %vm1409_vm8, %v6982_v9, %v5964_v32  ;;  %v2074_v26 = vsel %vm1409_vm8, %v6988_v46, %v6987_v48  ;;  %v6989_v15 = vld [vmem:[#allocation54_spill] sm:$0xff]  ;;  %v2151_v20 = vpop.permute.xlu1 %2150  ;;  %v2055_v62 = vsel %vm1409_vm8, %v7006_v27, %v7005_v14  ;;  %v7016_v9 = vld [vmem:[#allocation57_spill] sm:$0xff] }
 0x9d1   :  { %4217 = vmatprep.subr.mxu0 %v2215_v0  ;;  %v2326_v32 = vsel %vm1409_vm8, %v6990_v39, %v6989_v15  ;;  %v2160_v50 = vsel %vm1409_vm8, %v6995_v22, %v2151_v20  ;;  %v7007_v28 = vld [vmem:[#allocation58_spill] sm:$0xff]  ;;  %v7008_v0 = vld [vmem:[#allocation31_spill] sm:$0xff]  ;;  %v7020_v48 = vld [vmem:[#allocation53_spill] sm:$0xff] }
 0x9d2   :  { %4218 = vmatpush3.msra.mxu0 %v2103_v21  ;;  %v2431_v43 = vpop.permute.xlu0 %2430  ;;  %v2158_v21 = vsel %vm1409_vm8, %v7008_v0, %v7007_v28  ;;  %v7021_v46 = vld [vmem:[#allocation22_spill] sm:$0xff]  ;;  %v7022_v15 = vld [vmem:[#allocation45_spill] sm:$0xff] }
 0x9d3   :  { %4219 = vmatprep.subr.mxu0 %v2214_v35  ;;  %v2440_v36 = vsel %vm1409_vm8, %v6027_v41, %v2431_v43  ;;  %v7009_v43 = vld [vmem:[#allocation47_spill] sm:$0xff]  ;;  %v7010_v35 = vld [vmem:[#allocation34_spill] sm:$0xff]  ;;  %v2476_v22 = vld [vmem:[%s6870_s11 + $0x30] sm:$0xff] }
 0x9d4   :  { %4220 = vmatpush3.msra.mxu0 %v2102_v4  ;;  %4259 = vmatprep.subr.mxu1 %v2440_v36  ;;  %v2410_v4 = vsel %vm1409_vm8, %v7010_v35, %v7009_v43  ;;  %v2470_v36 = vld [vmem:[%s6870_s11] sm:$0xff]  ;;  %v2484_v18 = vld [vmem:[%s6870_s11 + $0x70] sm:$0xff] }
 0x9d5   :  { %4221 = vmatprep.subr.mxu0 %v2189_v33  ;;  %v7011_v33 = vld [vmem:[#allocation48_spill] sm:$0xff]  ;;  %v7023_v39 = vld [vmem:[#allocation26_spill] sm:$0xff] }
 0x9d6   :  { %4222 = vmatpush3.msra.mxu0 %v2077_v17  ;;  %v2319_v56 = vpop.permute.xlu0 %2318  ;;  %v7012_v17 = vld [vmem:[#allocation17_spill] sm:$0xff] }
 0x9d7   :  { %v2328_v41 = vsel %vm1409_vm8, %v6034_v42, %v2319_v56  ;;  %4223 = vmatprep.subr.mxu0 %v2188_v54  ;;  %v2054_v23 = vsel %vm1409_vm8, %v7012_v17, %v7011_v33  ;;  %v7013_v56 = vld [vmem:[#allocation56_spill] sm:$0xff]  ;;  %v7014_v54 = vld [vmem:[#allocation30_spill] sm:$0xff] }
 0x9d8   :  { %4224 = vmatpush3.msra.mxu0 %v2076_v31  ;;  %4260 = vmatpush3.msra.mxu1 %v2328_v41  ;;  %v2298_v31 = vsel %vm1409_vm8, %v7014_v54, %v7013_v56  ;;  %v2475_v41 = vld [vmem:[%s6870_s11 + $0x28] sm:$0xff] }
 0x9d9   :  { %4225 = vmatprep.subr.mxu0 %v2187_v1  ;;  %4261 = vmatprep.subr.mxu1 %v2439_v44  ;;  %v2263_v1 = vpop.permute.xlu1 %2262  ;;  %v7015_v44 = vld [vmem:[#allocation35_spill] sm:$0xff] }
 0x9da   :  { %4262 = vmatpush3.msra.mxu1 %v2327_v34  ;;  %v2403_v42 = vpop.permute.xlu0 %2402  ;;  %4226 = vmatpush3.msra.mxu0 %v2075_v6  ;;  %v2385_v6 = vsel %vm1409_vm8, %v7015_v44, %v6108_v57  ;;  %v7017_v34 = vld [vmem:[#allocation42_spill] sm:$0xff]  ;;  %v2479_v57 = vld [vmem:[%s6870_s11 + $0x48] sm:$0xff] }
 0x9db   :  { %4227 = vmatprep.subr.mxu0 %v2186_v61  ;;  %4263 = vmatprep.subr.mxu1 %v2438_v13  ;;  %v2412_v45 = vsel %vm1409_vm8, %v6996_v38, %v2403_v42  ;;  %v2273_v42 = vsel %vm1409_vm8, %v7017_v34, %v7016_v9  ;;  %v2272_v13 = vsel %vm1409_vm8, %v7019_v10, %v2263_v1  ;;  %v2480_v38 = vld [vmem:[%s6870_s11 + $0x50] sm:$0xff] }
 0x9dc   :  { %4228 = vmatpush3.msra.mxu0 %v2074_v26  ;;  %4264 = vmatpush3.msra.mxu1 %v2326_v32  ;;  %v2383_v26 = vsel %vm1409_vm8, %v7021_v46, %v7020_v48  ;;  %v2271_v32 = vsel %vm1409_vm8, %v7023_v39, %v7022_v15  ;;  %v2967_v10 = vld [vmem:[#allocation9 + $0x8] sm:$0xff]  ;;  %v3124_v48 = vld [vmem:[%s6876_s17 + $0x8] sm:$0xff] }
 0x9dd   :  { %4229 = vmatprep.subr.mxu0 %v2161_v7  ;;  %4265 = vmatprep.subr.mxu1 %v2413_v8  ;;  %v2247_v20 = vpop.permute.xlu1 %2246  ;;  %v7024_v7 = vld [vmem:[#allocation36_spill] sm:$0xff]  ;;  %v2478_v8 = vld [vmem:[%s6870_s11 + $0x40] sm:$0xff] }
 0x9de   :  { %4266 = vmatpush3.msra.mxu1 %v2301_v55  ;;  %v2047_v59 = vpop.permute.xlu0 %2046  ;;  %4230 = vmatpush3.msra.mxu0 %v2057_v52  ;;  %v2477_v55 = vld [vmem:[%s6870_s11 + $0x38] sm:$0xff]  ;;  %v3125_v46 = vld [vmem:[%s6876_s17 + $0x10] sm:$0xff] }
 0x9df   :  { %v2056_v11 = vsel %vm1409_vm8, %v6998_v60, %v2047_v59  ;;  %4231 = vmatprep.subr.mxu0 %v2160_v50  ;;  %4267 = vmatprep.subr.mxu1 %v2412_v45  ;;  %v2482_v59 = vld [vmem:[%s6870_s11 + $0x60] sm:$0xff]  ;;  %v2481_v50 = vld [vmem:[%s6870_s11 + $0x58] sm:$0xff] }
 0x9e0   :  { %4232 = vmatpush3.msra.mxu0 %v2056_v11  ;;  %4268 = vmatpush3.msra.mxu1 %v2300_v30  ;;  %v2485_v45 = vld [vmem:[%s6870_s11 + $0x78] sm:$0xff]  ;;  %s4716_s11 = smov 126  }
 0x9e1   :  { %4233 = vmatprep.subr.mxu0 %v2159_v51  ;;  %4269 = vmatprep.subr.mxu1 %v2411_v3  ;;  %v2508_v27 = vpop.permute.xlu1 %2507 }
 0x9e2   :  { %4270 = vmatpush3.msra.mxu1 %v2299_v25  ;;  %v2375_v37 = vpop.permute.xlu0 %2374  ;;  %4234 = vmatpush3.msra.mxu0 %v2055_v62 }
 0x9e3   :  { %4235 = vmatprep.subr.mxu0 %v2158_v21  ;;  %4271 = vmatprep.subr.mxu1 %v2410_v4  ;;  %v2384_v61 = vsel %vm1409_vm8, %v7018_v63, %v2375_v37 }
 0x9e4   :  { %4236 = vmatpush3.msra.mxu0 %v2054_v23  ;;  %4272 = vmatpush3.msra.mxu1 %v2298_v31 }
 0x9e5   :  { %2575 = vmatmul.mubr.f32.vlgmr.msra.gmra.mxu0 %v2470_v36  ;;  %4273 = vmatprep.subr.mxu1 %v2385_v6  ;;  %v2498_v21 = vpop.permute.xlu1 %2497 }
 0x9e6   :  { %4274 = vmatpush3.msra.mxu1 %v2273_v42  ;;  %v2371_v24 = vpop.permute.xlu0 %2370  ;;  %2579 = vmatprep.mubr.f32.mxu0 %v2475_v41 }
 0x9e7   :  { %4275 = vmatprep.subr.mxu1 %v2384_v61  ;;  %v2382_v58 = vsel %vm1409_vm8, %v7024_v7, %v2371_v24 }
 0x9e8   :  { %4276 = vmatpush3.msra.mxu1 %v2272_v13  ;;  %v3126_v13 = vld [vmem:[%s6876_s17 + $0x18] sm:$0xff] }
 0x9e9   :  { %2580 = vmatmul.mubr.f32.gmra.mxu0 %v2474_v16  ;;  %4277 = vmatprep.subr.mxu1 %v2383_v26  ;;  %v3123_v26 = vld [vmem:[%s6876_s17] sm:$0xff]  ;;  %s4722_s17 = smov 24  }
 0x9ea   :  { %4278 = vmatpush3.msra.mxu1 %v2271_v32  ;;  %v2259_v2 = vpop.permute.xlu0 %2258  ;;  %2584 = vmatprep.mubr.f32.mxu0 %v2479_v57  ;;  %v2969_v57 = vld [vmem:[#allocation10] sm:$0xff] }
 0x9eb   :  { %v2270_v52 = vsel %vm1409_vm8, %v2247_v20, %v2259_v2  ;;  %4279 = vmatprep.subr.mxu1 %v2382_v58  ;;  %vm3893_vm8 = vcmask 654336  }
 0x9ec   :  { %4280 = vmatpush3.msra.mxu1 %v2270_v52 }
 0x9ed   :  { %2585 = vmatmul.mubr.f32.gmra.mxu0 %v2478_v8  ;;  %2660 = vmatmul.mubr.f32.vlgmr.msra.gmra.mxu1 %v2472_v53 }
 0x9ee   :  { %2589 = vmatprep.mubr.f32.mxu0 %v2483_v5  ;;  %2664 = vmatprep.mubr.f32.mxu1 %v2477_v55 }
 0x9f1   :  { %2590 = vmatmul.mubr.f32.gmra.mxu0 %v2482_v59  ;;  %2665 = vmatmul.mubr.f32.gmra.mxu1 %v2476_v22 }
 0x9f2   :  { %2669 = vmatprep.mubr.f32.mxu1 %v2481_v50  ;;  %3042 = vmatprep.mubr.f32.mxu0 %v2967_v10  ;;  %v4049_v10 = vld [vmem:[%s6872_s13 + $0x6] ss:$0 sm:$0xff] }
 0x9f5   :  { %2670 = vmatmul.mubr.f32.gmra.mxu1 %v2480_v38 }
 0x9f6   :  { %2674 = vmatprep.mubr.f32.mxu1 %v2485_v45 }
 0x9f7   :  { %v2503_v60 = vpop.permute.xlu0 %2502 }
 0x9f9   :  { %2675 = vmatmul.mubr.f32.gmra.mxu1 %v2484_v18 }
 0x9fb   :  { %v2493_v51 = vpop.permute.xlu0 %2492 }
 0xaa5   :  { %v4237_v30 = vpop.f32.mrf.mxu0 }
 0xaa7   :  { %v4238_v11 = vpop.f32.mrf.mxu0 }
 0xaa8   :  { %v4239_v40 = vadd.f32 %v4238_v11, %v4237_v30 }
 0xaa9   :  { %v4240_v12 = vpop.f32.mrf.mxu0 }
 0xaaa   :  { %v2577_v47 = vadd.f32 %v4239_v40, %v2493_v51 }
 0xaab   :  { %v4241_v62 = vpop.f32.mrf.mxu0 }
 0xaac   :  { %v4242_v28 = vadd.f32 %v4241_v62, %v4240_v12 }
 0xaad   :  { %v4281_v49 = vpop.f32.mrf.mxu1  ;;  %v4243_v4 = vpop.f32.mrf.mxu0 }
 0xaae   :  { %v2582_v43 = vadd.f32 %v4242_v28, %v2498_v21  ;;  %v4043_v28 = vld [vmem:[%s6872_s13 + $0x3] ss:$0 sm:$0xff] }
 0xaaf   :  { %v4282_v19 = vpop.f32.mrf.mxu1  ;;  %v4244_v17 = vpop.f32.mrf.mxu0 }
 0xab0   :  { %v4283_v3 = vadd.f32 %v4282_v19, %v4281_v49  ;;  %v4245_v56 = vadd.f32 %v4244_v17, %v4243_v4 }
 0xab1   :  { %v4284_v14 = vpop.f32.mrf.mxu1  ;;  %v4246_v1 = vpop.f32.mrf.mxu0 }
 0xab2   :  { %v6280_v29 = vadd.f32 %v4283_v3, %v2577_v47  ;;  %v2587_v31 = vadd.f32 %v4245_v56, %v2503_v60  ;;  %v4051_v3 = vld [vmem:[%s6872_s13 + $0x7] ss:$0 sm:$0xff] }
 0xab3   :  { %v4285_v37 = vpop.f32.mrf.mxu1  ;;  %v4247_v9 = vpop.f32.mrf.mxu0 }
 0xab4   :  { %v6283_v25 = vmax.f32 %v6280_v29, 0.0  ;;  %v4286_v0 = vadd.f32 %v4285_v37, %v4284_v14  ;;  %v4248_v42 = vadd.f32 %v4247_v9, %v4246_v1 }
 0xab5   :  { %v4287_v33 = vpop.f32.mrf.mxu1 }
 0xab6   :  { %2897 = vrot.lane.b32.xlu0 %v6283_v25, %s4715_s14  ;;  %2885 = vrot.lane.b32.xlu1 %v6283_v25, %s4716_s11  ;;  %v6297_v35 = vadd.f32 %v4286_v0, %v2582_v43  ;;  %v2592_v63 = vadd.f32 %v4248_v42, %v2508_v27 }
 0xab7   :  { %v4288_v23 = vpop.f32.mrf.mxu1 }
 0xab8   :  { %v6304_v36 = vmax.f32 %v6297_v35, 0.0  ;;  %v4289_v54 = vadd.f32 %v4288_v23, %v4287_v33 }
 0xab9   :  { %v4290_v6 = vpop.f32.mrf.mxu1 }
 0xaba   :  { %2780 = vrot.lane.b32.xlu0 %v6283_v25, %s4680_s27  ;;  %2768 = vrot.lane.b32.xlu1 %v6283_v25, %s4717_s9  ;;  %v6318_v41 = vadd.f32 %v4289_v54, %v2587_v31 }
 0xabb   :  { %v4291_v34 = vpop.f32.mrf.mxu1 }
 0xabc   :  { %v6325_v44 = vmax.f32 %v6318_v41, 0.0  ;;  %v4292_v24 = vadd.f32 %v4291_v34, %v4290_v6 }
 0xabe   :  { %2844 = vrot.lane.b32.xlu0 %v6283_v25, %s4718_s3  ;;  %2832 = vrot.lane.b32.xlu1 %v6283_v25, %s4698_s10  ;;  %v6339_v61 = vadd.f32 %v4292_v24, %v2592_v63 }
 0xac0   :  { %v6346_v16 = vmax.f32 %v6339_v61, 0.0 }
 0xac2   :  { %2739 = vrot.lane.b32.xlu0 %v6283_v25, %s4719_s2  ;;  %2727 = vrot.lane.b32.xlu1 %v6283_v25, %s4720_s15 }
 0xac6   :  { %2899 = vrot.lane.b32.xlu0 %v6304_v36, %s4715_s14  ;;  %2887 = vrot.lane.b32.xlu1 %v6304_v36, %s4716_s11 }
 0xaca   :  { %2782 = vrot.lane.b32.xlu0 %v6304_v36, %s4680_s27  ;;  %2770 = vrot.lane.b32.xlu1 %v6304_v36, %s4717_s9 }
 0xace   :  { %2846 = vrot.lane.b32.xlu0 %v6304_v36, %s4718_s3  ;;  %2834 = vrot.lane.b32.xlu1 %v6304_v36, %s4698_s10 }
 0xad2   :  { %2741 = vrot.lane.b32.xlu0 %v6304_v36, %s4719_s2  ;;  %2729 = vrot.lane.b32.xlu1 %v6304_v36, %s4720_s15 }
 0xad6   :  { %2901 = vrot.lane.b32.xlu0 %v6325_v44, %s4715_s14  ;;  %2889 = vrot.lane.b32.xlu1 %v6325_v44, %s4716_s11 }
 0xada   :  { %2784 = vrot.lane.b32.xlu0 %v6325_v44, %s4680_s27  ;;  %2772 = vrot.lane.b32.xlu1 %v6325_v44, %s4717_s9 }
 0xade   :  { %2848 = vrot.lane.b32.xlu0 %v6325_v44, %s4718_s3  ;;  %2836 = vrot.lane.b32.xlu1 %v6325_v44, %s4698_s10 }
 0xae2   :  { %2743 = vrot.lane.b32.xlu0 %v6325_v44, %s4719_s2  ;;  %2731 = vrot.lane.b32.xlu1 %v6325_v44, %s4720_s15 }
 0xae6   :  { %2903 = vrot.lane.b32.xlu0 %v6346_v16, %s4715_s14  ;;  %2891 = vrot.lane.b32.xlu1 %v6346_v16, %s4716_s11 }
 0xaea   :  { %2786 = vrot.lane.b32.xlu0 %v6346_v16, %s4680_s27  ;;  %2774 = vrot.lane.b32.xlu1 %v6346_v16, %s4717_s9 }
 0xaee   :  { %2704 = vrot.lane.b32.xlu0 %v6325_v44, %s7025_s6  ;;  %2692 = vrot.lane.b32.xlu1 %v6325_v44, %s7026_s4 }
 0xaf2   :  { %2850 = vrot.lane.b32.xlu0 %v6346_v16, %s4718_s3  ;;  %2838 = vrot.lane.b32.xlu1 %v6346_v16, %s4698_s10 }
 0xaf6   :  { %2702 = vrot.lane.b32.xlu0 %v6304_v36, %s7025_s6  ;;  %2690 = vrot.lane.b32.xlu1 %v6304_v36, %s7026_s4 }
 0xafa   :  { %2745 = vrot.lane.b32.xlu0 %v6346_v16, %s4719_s2  ;;  %2733 = vrot.lane.b32.xlu1 %v6346_v16, %s4720_s15 }
 0xafe   :  { %2700 = vrot.lane.b32.xlu0 %v6283_v25, %s7025_s6  ;;  %2688 = vrot.lane.b32.xlu1 %v6283_v25, %s7026_s4 }
 0xb02   :  { %2706 = vrot.lane.b32.xlu0 %v6346_v16, %s7025_s6  ;;  %2694 = vrot.lane.b32.xlu1 %v6346_v16, %s7026_s4 }
 0xb06   :  { %2942 = vrot.lane.b32.xlu0 %v6325_v44, %s7027_s28  ;;  %2930 = vrot.lane.b32.xlu1 %v6325_v44, %s7028_s8 }
 0xb0a   :  { %2944 = vrot.lane.b32.xlu0 %v6346_v16, %s7027_s28  ;;  %2932 = vrot.lane.b32.xlu1 %v6346_v16, %s7028_s8 }
 0xb0e   :  { %2940 = vrot.lane.b32.xlu0 %v6304_v36, %s7027_s28  ;;  %2928 = vrot.lane.b32.xlu1 %v6304_v36, %s7028_s8 }
 0xb12   :  { %2938 = vrot.lane.b32.xlu0 %v6283_v25, %s7027_s28  ;;  %2926 = vrot.lane.b32.xlu1 %v6283_v25, %s7028_s8 }
 0xb16   :  { %3144 = vperm.xlu0 %4541, %v3126_v13   ;;  %2972 = vperm.xlu1 %4542, %v2969_v57  }
 0xb1a   :  { %3134 = vperm.xlu0 %4541, %v3124_v48   ;;  %3139 = vperm.xlu1 %4542, %v3125_v46   ;;  %v4041_v48 = vld [vmem:[%s6872_s13 + $0x2] ss:$0 sm:$0xff] }
 0xb1e   :  { %3129 = vperm.xlu1 %4542, %v3123_v26  }
 0xb28   :  { %v2898_v15 = vpop.permute.xlu0 %2897  ;;  %v2886_v39 = vpop.permute.xlu1 %2885 }
 0xb29   :  { %v2910_v23 = vsel %vm2909_vm11, %v2886_v39, %v2898_v15 }
 0xb2a   :  { %v2922_v34 = vmul.f32 %v4051_v3, %v2910_v23 }
 0xb2c   :  { %v2781_v32 = vpop.permute.xlu0 %2780  ;;  %v2769_v20 = vpop.permute.xlu1 %2768 }
 0xb2d   :  { %v2792_v1 = vsel %vm1491_vm4, %v2769_v20, %v2781_v32 }
 0xb2e   :  { %v2816_v42 = vmul.f32 %v4043_v28, %v2792_v1 }
 0xb30   :  { %v6408_v2 = vpop.permute.xlu0 %2844  ;;  %v6410_v7 = vpop.permute.xlu1 %2832 }
 0xb34   :  { %v6412_v58 = vpop.permute.xlu0 %2739  ;;  %v6414_v8 = vpop.permute.xlu1 %2727 }
 0xb38   :  { %v2900_v53 = vpop.permute.xlu0 %2899  ;;  %v2888_v52 = vpop.permute.xlu1 %2887 }
 0xb39   :  { %v2911_v43 = vsel %vm2909_vm11, %v2888_v52, %v2900_v53  ;;  %v2857_v53 = vsel %vm2856_vm12, %v6410_v7, %v6408_v2  ;;  %v4039_v2 = vld [vmem:[%s6872_s13 + $0x1] ss:$0 sm:$0xff] }
 0xb3a   :  { %v2923_v6 = vmul.f32 %v4051_v3, %v2911_v43 }
 0xb3c   :  { %v2783_v5 = vpop.permute.xlu0 %2782  ;;  %v2771_v55 = vpop.permute.xlu1 %2770 }
 0xb3d   :  { %v2793_v33 = vsel %vm1491_vm4, %v2771_v55, %v2783_v5 }
 0xb3e   :  { %v2817_v9 = vmul.f32 %v4043_v28, %v2793_v33  ;;  %v2805_v55 = vmul.f32 %v4041_v48, %v2793_v33 }
 0xb40   :  { %v2847_v59 = vpop.permute.xlu0 %2846  ;;  %v2835_v22 = vpop.permute.xlu1 %2834 }
 0xb41   :  { %v2858_v26 = vsel %vm2856_vm12, %v2835_v22, %v2847_v59  ;;  %v2804_v22 = vmul.f32 %v4041_v48, %v2792_v1 }
 0xb42   :  { %v2882_v5 = vmul.f32 %v4049_v10, %v2858_v26 }
 0xb44   :  { %v6416_v50 = vpop.permute.xlu0 %2741  ;;  %v6418_v38 = vpop.permute.xlu1 %2729 }
 0xb48   :  { %v2902_v45 = vpop.permute.xlu0 %2901  ;;  %v2890_v18 = vpop.permute.xlu1 %2889 }
 0xb49   :  { %v2912_v27 = vsel %vm2909_vm11, %v2890_v18, %v2902_v45  ;;  %v2881_v45 = vmul.f32 %v4049_v10, %v2857_v53 }
 0xb4a   :  { %v2924_v17 = vmul.f32 %v4051_v3, %v2912_v27  ;;  %v2752_v27 = vsel %vm2751_vm13, %v6414_v8, %v6412_v58  ;;  %v4045_v58 = vld [vmem:[%s6872_s13 + $0x4] ss:$0 sm:$0xff] }
 0xb4b   :  { %v2831_v43 = vmul.f32 %v4045_v58, %v6346_v16  ;;  %v2830_v23 = vmul.f32 %v4045_v58, %v6325_v44 }
 0xb4c   :  { %v2785_v30 = vpop.permute.xlu0 %2784  ;;  %v2773_v60 = vpop.permute.xlu1 %2772 }
 0xb4d   :  { %v2794_v0 = vsel %vm1491_vm4, %v2773_v60, %v2785_v30  ;;  %v4047_v30 = vld [vmem:[%s6872_s13 + $0x5] ss:$0 sm:$0xff] }
 0xb4e   :  { %v2818_v56 = vmul.f32 %v4043_v28, %v2794_v0  ;;  %v2806_v52 = vmul.f32 %v4041_v48, %v2794_v0  ;;  %v2764_v0 = vmul.f32 %v4039_v2, %v2752_v27 }
 0xb50   :  { %v2849_v11 = vpop.permute.xlu0 %2848  ;;  %v2837_v40 = vpop.permute.xlu1 %2836 }
 0xb51   :  { %v2859_v13 = vsel %vm2856_vm12, %v2837_v40, %v2849_v11 }
 0xb52   :  { %v2883_v39 = vmul.f32 %v4049_v10, %v2859_v13 }
 0xb54   :  { %v6420_v49 = vpop.permute.xlu0 %2743  ;;  %v6422_v51 = vpop.permute.xlu1 %2731 }
 0xb55   :  { %v2754_v60 = vsel %vm2751_vm13, %v6422_v51, %v6420_v49  ;;  %v2869_v51 = vmul.f32 %v4047_v30, %v2857_v53  ;;  %v3119_v53 = vld [vmem:[%s6875_s16] sm:$0xff] }
 0xb56   :  { %4461 = vmatprep.mubr.msk.f32.mxu1 %vm3147_vm15, %v3119_v53 }
 0xb58   :  { %v2904_v19 = vpop.permute.xlu0 %2903  ;;  %v2892_v47 = vpop.permute.xlu1 %2891 }
 0xb59   :  { %v2913_v12 = vsel %vm2909_vm11, %v2892_v47, %v2904_v19  ;;  %v2753_v19 = vsel %vm2751_vm13, %v6418_v38, %v6416_v50  ;;  %v2871_v47 = vmul.f32 %v4047_v30, %v2859_v13  ;;  %v4037_v50 = vld [vmem:[%s6872_s13] ss:$0 sm:$0xff] }
 0xb5a   :  { %v2925_v14 = vmul.f32 %v4051_v3, %v2913_v12  ;;  %v2765_v49 = vmul.f32 %v4039_v2, %v2753_v19 }
 0xb5c   :  { %v2787_v62 = vpop.permute.xlu0 %2786  ;;  %4293 = vmatprep.subr.mxu0 %v2925_v14  ;;  %v2775_v37 = vpop.permute.xlu1 %2774  ;;  %v2766_v14 = vmul.f32 %v4039_v2, %v2754_v60  ;;  %v3121_v60 = vld [vmem:[%s6875_s16 + $0x10] sm:$0xff] }
 0xb5d   :  { %v2795_v21 = vsel %vm1491_vm4, %v2775_v37, %v2787_v62  ;;  %v2870_v62 = vmul.f32 %v4047_v30, %v2858_v26 }
 0xb5e   :  { %v2819_v4 = vmul.f32 %v4043_v28, %v2795_v21  ;;  %v2807_v15 = vmul.f32 %v4041_v48, %v2795_v21 }
 0xb60   :  { %v6437_v54 = vpop.permute.xlu0 %2704  ;;  %4294 = vmatpush3.msra.mxu0 %v2819_v4  ;;  %v6439_v31 = vpop.permute.xlu1 %2692 }
 0xb61   :  { %4295 = vmatprep.subr.mxu0 %v2924_v17  ;;  %v2714_v8 = vsel %vm1450_vm6, %v6439_v31, %v6437_v54 }
 0xb62   :  { %4296 = vmatpush3.msra.mxu0 %v2818_v56  ;;  %v2725_v56 = vmul.f32 %v4037_v50, %v2714_v8 }
 0xb63   :  { %4297 = vmatprep.subr.mxu0 %v2923_v6  ;;  %v2829_v6 = vmul.f32 %v4045_v58, %v6304_v36 }
 0xb64   :  { %v2851_v24 = vpop.permute.xlu0 %2850  ;;  %4298 = vmatpush3.msra.mxu0 %v2817_v9  ;;  %v2839_v63 = vpop.permute.xlu1 %2838  ;;  %v2828_v9 = vmul.f32 %v4045_v58, %v6283_v25 }
 0xb65   :  { %v2860_v57 = vsel %vm2856_vm12, %v2839_v63, %v2851_v24  ;;  %4299 = vmatprep.subr.mxu0 %v2922_v34  ;;  %v2966_v24 = vld [vmem:[#allocation9] sm:$0xff] }
 0xb66   :  { %v2884_v46 = vmul.f32 %v4049_v10, %v2860_v57  ;;  %4300 = vmatpush3.msra.mxu0 %v2816_v42  ;;  %v2872_v11 = vmul.f32 %v4047_v30, %v2860_v57  ;;  %v4053_v42 = vld [vmem:[%s6872_s13 + $0x8] ss:$0 sm:$0xff]  ;;  %v7029_v57 = vmov 0.0   ;;  %s7035_s13 = smov 16  }
 0xb68   :  { %v2703_v32 = vpop.permute.xlu0 %2702  ;;  %4301 = vmatprep.subr.mxu0 %v2884_v46  ;;  %v2691_v20 = vpop.permute.xlu1 %2690 }
 0xb69   :  { %4302 = vmatpush3.msra.mxu0 %v2807_v15  ;;  %v2713_v4 = vsel %vm1450_vm6, %v2691_v20, %v2703_v32  ;;  %v2968_v20 = vld [vmem:[#allocation9 + $0x10] sm:$0xff] }
 0xb6a   :  { %4303 = vmatprep.subr.mxu0 %v2883_v39  ;;  %v2724_v54 = vmul.f32 %v4037_v50, %v2713_v4  ;;  %v3690_v4 = vld [vmem:[%s6881_s22 + $0x8] sm:$0xff] }
 0xb6b   :  { %4304 = vmatpush3.msra.mxu0 %v2806_v52 }
 0xb6c   :  { %v2746_v18 = vpop.permute.xlu0 %2745  ;;  %4305 = vmatprep.subr.mxu0 %v2882_v5  ;;  %v2734_v59 = vpop.permute.xlu1 %2733 }
 0xb6d   :  { %v2755_v7 = vsel %vm2751_vm13, %v2734_v59, %v2746_v18  ;;  %4306 = vmatpush3.msra.mxu0 %v2805_v55 }
 0xb6e   :  { %v2767_v40 = vmul.f32 %v4039_v2, %v2755_v7  ;;  %4307 = vmatprep.subr.mxu0 %v2881_v45  ;;  %v3120_v7 = vld [vmem:[%s6875_s16 + $0x8] sm:$0xff] }
 0xb6f   :  { %4308 = vmatpush3.msra.mxu0 %v2804_v22 }
 0xb70   :  { %v2701_v3 = vpop.permute.xlu0 %2700  ;;  %4309 = vmatprep.subr.mxu0 %v2872_v11  ;;  %v2689_v12 = vpop.permute.xlu1 %2688  ;;  %v3122_v11 = vld [vmem:[%s6875_s16 + $0x18] sm:$0xff] }
 0xb71   :  { %4310 = vmatpush3.msra.mxu0 %v2767_v40  ;;  %v2712_v1 = vsel %vm1450_vm6, %v2689_v12, %v2701_v3 }
 0xb72   :  { %4311 = vmatprep.subr.mxu0 %v2871_v47  ;;  %v2723_v34 = vmul.f32 %v4037_v50, %v2712_v1 }
 0xb73   :  { %4312 = vmatpush3.msra.mxu0 %v2766_v14 }
 0xb74   :  { %v2707_v37 = vpop.permute.xlu0 %2706  ;;  %4313 = vmatprep.subr.mxu0 %v2870_v62  ;;  %v2695_v28 = vpop.permute.xlu1 %2694 }
 0xb75   :  { %v2715_v38 = vsel %vm1450_vm6, %v2695_v28, %v2707_v37  ;;  %4314 = vmatpush3.msra.mxu0 %v2765_v49 }
 0xb76   :  { %v2726_v21 = vmul.f32 %v4037_v50, %v2715_v38  ;;  %4315 = vmatprep.subr.mxu0 %v2869_v51 }
 0xb77   :  { %4316 = vmatpush3.msra.mxu0 %v2764_v0 }
 0xb78   :  { %v2943_v33 = vpop.permute.xlu0 %2942  ;;  %4317 = vmatprep.subr.mxu0 %v2831_v43  ;;  %v2931_v17 = vpop.permute.xlu1 %2930  ;;  %v3535_v43 = vld [vmem:[%s6879_s20] sm:$0xff] }
 0xb79   :  { %4318 = vmatpush3.msra.mxu0 %v2726_v21  ;;  %v2952_v63 = vsel %vm1369_vm9, %v2931_v17, %v2943_v33  ;;  %v3689_v21 = vld [vmem:[%s6881_s22] sm:$0xff]  ;;  %v3691_v33 = vld [vmem:[%s6881_s22 + $0x10] sm:$0xff]  ;;  %v3692_v17 = vld [vmem:[%s6881_s22 + $0x18] sm:$0xff] }
 0xb7a   :  { %4319 = vmatprep.subr.mxu0 %v2830_v23  ;;  %v2964_v25 = vmul.f32 %v4053_v42, %v2952_v63 }
 0xb7b   :  { %4320 = vmatpush3.msra.mxu0 %v2725_v56 }
 0xb7c   :  { %v2945_v31 = vpop.permute.xlu0 %2944  ;;  %4321 = vmatprep.subr.mxu0 %v2829_v6  ;;  %v2933_v16 = vpop.permute.xlu1 %2932 }
 0xb7d   :  { %v2953_v44 = vsel %vm1369_vm9, %v2933_v16, %v2945_v31  ;;  %4322 = vmatpush3.msra.mxu0 %v2724_v54 }
 0xb7e   :  { %v2965_v10 = vmul.f32 %v4053_v42, %v2953_v44  ;;  %4323 = vmatprep.subr.mxu0 %v2828_v9 }
 0xb7f   :  { %4324 = vmatpush3.msra.mxu0 %v2723_v34 }
 0xb80   :  { %v2941_v36 = vpop.permute.xlu0 %2940  ;;  %v2929_v13 = vpop.permute.xlu1 %2928  ;;  %3043 = vmatmul.mubr.f32.vlgmr.msra.gmra.mxu0 %v2966_v24  ;;  %4448 = vmatprep.subr.mxu0 %v7029_v57 }
 0xb81   :  { %v2951_v48 = vsel %vm1369_vm9, %v2929_v13, %v2941_v36  ;;  %4449 = vmatpush3.msra.mxu0 %v2965_v10  ;;  %4456 = vmatprep.mubr.msk.f32.mxu0 %vm4721_vm14, %v7029_v57 }
 0xb82   :  { %v2963_v46 = vmul.f32 %v4053_v42, %v2951_v48  ;;  %4450 = vmatprep.subr.mxu0 %v7029_v57 }
 0xb83   :  { %4451 = vmatpush3.msra.mxu0 %v2964_v25 }
 0xb84   :  { %v2939_v26 = vpop.permute.xlu0 %2938  ;;  %v2927_v15 = vpop.permute.xlu1 %2926  ;;  %4452 = vmatprep.subr.mxu0 %v7029_v57 }
 0xb85   :  { %v2950_v39 = vsel %vm1369_vm9, %v2927_v15, %v2939_v26  ;;  %4453 = vmatpush3.msra.mxu0 %v2963_v46  ;;  %v4073_v46 = vld [vmem:[%s6877_s18 + $0x7] ss:$0 sm:$0xff] }
 0xb86   :  { %v2962_v32 = vmul.f32 %v4053_v42, %v2950_v39  ;;  %4454 = vmatprep.subr.mxu0 %v7029_v57 }
 0xb88   :  { %4455 = vmatpush3.msra.mxu0 %v2962_v32 }
 0xb89   :  { %4457 = vmatmul.mubr.msk.f32.vlgmr.msra.gmra.mxu0 %vm1720_vm2, %v2968_v20  ;;  %4467 = vmatprep.subr.mxu0 %v7029_v57  ;;  %v4065_v20 = vld [vmem:[%s6877_s18 + $0x3] ss:$0 sm:$0xff] }
 0xb8a   :  { %4475 = vmatprep.mubr.msk.f32.mxu0 %vm4721_vm14, %v7029_v57 }
 0xb91   :  { %v2973_v45 = vpop.permute.xlu1 %2972  ;;  %v3145_v40 = vpop.permute.xlu0 %3144 }
 0xb95   :  { %v3135_v19 = vpop.permute.xlu0 %3134  ;;  %v3140_v27 = vpop.permute.xlu1 %3139 }
 0xb99   :  { %v3130_v49 = vpop.permute.xlu1 %3129 }
 0xc40   :  { %v4325_v52 = vpop.f32.mrf.mxu0 }
 0xc42   :  { %v4326_v5 = vpop.f32.mrf.mxu0 }
 0xc43   :  { %v4327_v55 = vadd.f32 %v4326_v5, %v4325_v52 }
 0xc45   :  { %v3045_v18 = vadd.f32 %v4327_v55, %v2973_v45 }
 0xc49   :  { %v3114_v59 = vpop.f32.mrf.mxu0 }
 0xc4a   :  { %v3115_v22 = vadd.f32 %v3114_v59, %v3045_v18 }
 0xc4b   :  { %v4458_v30 = vpop.f32.mrf.mxu0 }
 0xc4c   :  { %v3118_v2 = vmax.f32 %v3115_v22, 0.0 }
 0xc4e   :  { %4459 = vmatprep.subr.mxu1 %v3118_v2 }
 0xc4f   :  { %4460 = vmatpush3.msra.mxu1 %v3118_v2 }
 0xc50   :  { %4462 = vmatmul.mubr.msk.f32.vlgmr.msra.gmra.mxu1 %vm3147_vm15, %v3120_v7 }
 0xc51   :  { %4464 = vmatprep.mubr.msk.f32.mxu1 %vm3147_vm15, %v3121_v60 }
 0xc54   :  { %4465 = vmatmul.mubr.msk.f32.gmra.mxu1 %vm3147_vm15, %v3122_v11 }
 0xd10   :  { %v4463_v47 = vpop.f32.mrf.mxu1 }
 0xd11   :  { %v3232_v3 = vadd.f32 %v4463_v47, %v3135_v19 }
 0xd12   :  { %v3226_v62 = vpop.f32.mrf.mxu1 }
 0xd13   :  { %v6520_v12 = vadd.f32 %v3232_v3, %v6297_v35  ;;  %v3227_v35 = vadd.f32 %v3226_v62, %v3130_v49 }
 0xd14   :  { %v4466_v28 = vpop.f32.mrf.mxu1 }
 0xd15   :  { %v6523_v14 = vmax.f32 %v6520_v12, 0.0  ;;  %v6538_v51 = vadd.f32 %v3227_v35, %v6280_v29  ;;  %v3242_v29 = vadd.f32 %v4466_v28, %v3145_v40 }
 0xd17   :  { %3466 = vrot.lane.b32.xlu1 %v6523_v14, %s4715_s14  ;;  %3454 = vrot.lane.b32.xlu0 %v6523_v14, %s4716_s11  ;;  %v6545_v37 = vmax.f32 %v6538_v51, 0.0  ;;  %v6560_v0 = vadd.f32 %v3242_v29, %v6339_v61  ;;  %v3236_v61 = vpop.f32.mrf.mxu1 }
 0xd18   :  { %v3237_v38 = vadd.f32 %v3236_v61, %v3140_v27 }
 0xd19   :  { %v6567_v50 = vmax.f32 %v6560_v0, 0.0 }
 0xd1a   :  { %v6586_v58 = vadd.f32 %v3237_v38, %v6318_v41  ;;  %v3533_v41 = vld [vmem:[%s6878_s19 + $0x8] sm:$0xff] }
 0xd1b   :  { %3350 = vrot.lane.b32.xlu1 %v6523_v14, %s4680_s27  ;;  %3338 = vrot.lane.b32.xlu0 %v6523_v14, %s4717_s9 }
 0xd1c   :  { %v6593_v8 = vmax.f32 %v6586_v58, 0.0  ;;  %3608 = vmatprep.mubr.f32.mxu1 %v3533_v41 }
 0xd1f   :  { %3414 = vrot.lane.b32.xlu1 %v6523_v14, %s4718_s3  ;;  %3402 = vrot.lane.b32.xlu0 %v6523_v14, %s4698_s10 }
 0xd23   :  { %3310 = vrot.lane.b32.xlu1 %v6523_v14, %s4719_s2  ;;  %3298 = vrot.lane.b32.xlu0 %v6523_v14, %s4720_s15 }
 0xd27   :  { %3464 = vrot.lane.b32.xlu1 %v6545_v37, %s4715_s14  ;;  %3452 = vrot.lane.b32.xlu0 %v6545_v37, %s4716_s11 }
 0xd2b   :  { %3348 = vrot.lane.b32.xlu1 %v6545_v37, %s4680_s27  ;;  %3336 = vrot.lane.b32.xlu0 %v6545_v37, %s4717_s9 }
 0xd2f   :  { %3412 = vrot.lane.b32.xlu1 %v6545_v37, %s4718_s3  ;;  %3400 = vrot.lane.b32.xlu0 %v6545_v37, %s4698_s10 }
 0xd33   :  { %3308 = vrot.lane.b32.xlu1 %v6545_v37, %s4719_s2  ;;  %3296 = vrot.lane.b32.xlu0 %v6545_v37, %s4720_s15 }
 0xd37   :  { %3470 = vrot.lane.b32.xlu1 %v6567_v50, %s4715_s14  ;;  %3458 = vrot.lane.b32.xlu0 %v6567_v50, %s4716_s11 }
 0xd3b   :  { %3354 = vrot.lane.b32.xlu1 %v6567_v50, %s4680_s27  ;;  %3342 = vrot.lane.b32.xlu0 %v6567_v50, %s4717_s9 }
 0xd3f   :  { %3418 = vrot.lane.b32.xlu1 %v6567_v50, %s4718_s3  ;;  %3406 = vrot.lane.b32.xlu0 %v6567_v50, %s4698_s10 }
 0xd43   :  { %3314 = vrot.lane.b32.xlu1 %v6567_v50, %s4719_s2  ;;  %3302 = vrot.lane.b32.xlu0 %v6567_v50, %s4720_s15 }
 0xd47   :  { %3275 = vrot.lane.b32.xlu1 %v6567_v50, %s7025_s6  ;;  %3263 = vrot.lane.b32.xlu0 %v6567_v50, %s7026_s4 }
 0xd4b   :  { %3468 = vrot.lane.b32.xlu1 %v6593_v8, %s4715_s14  ;;  %3456 = vrot.lane.b32.xlu0 %v6593_v8, %s4716_s11 }
 0xd4f   :  { %3352 = vrot.lane.b32.xlu1 %v6593_v8, %s4680_s27  ;;  %3340 = vrot.lane.b32.xlu0 %v6593_v8, %s4717_s9 }
 0xd53   :  { %3271 = vrot.lane.b32.xlu1 %v6523_v14, %s7025_s6  ;;  %3259 = vrot.lane.b32.xlu0 %v6523_v14, %s7026_s4 }
 0xd57   :  { %3416 = vrot.lane.b32.xlu1 %v6593_v8, %s4718_s3  ;;  %3404 = vrot.lane.b32.xlu0 %v6593_v8, %s4698_s10 }
 0xd5b   :  { %3269 = vrot.lane.b32.xlu1 %v6545_v37, %s7025_s6  ;;  %3257 = vrot.lane.b32.xlu0 %v6545_v37, %s7026_s4 }
 0xd5f   :  { %3312 = vrot.lane.b32.xlu1 %v6593_v8, %s4719_s2  ;;  %3300 = vrot.lane.b32.xlu0 %v6593_v8, %s4720_s15 }
 0xd63   :  { %3510 = vrot.lane.b32.xlu1 %v6567_v50, %s7027_s28  ;;  %3498 = vrot.lane.b32.xlu0 %v6567_v50, %s7028_s8 }
 0xd67   :  { %3273 = vrot.lane.b32.xlu1 %v6593_v8, %s7025_s6  ;;  %3261 = vrot.lane.b32.xlu0 %v6593_v8, %s7026_s4 }
 0xd6b   :  { %3506 = vrot.lane.b32.xlu1 %v6523_v14, %s7027_s28  ;;  %3494 = vrot.lane.b32.xlu0 %v6523_v14, %s7028_s8 }
 0xd6f   :  { %3508 = vrot.lane.b32.xlu1 %v6593_v8, %s7027_s28  ;;  %3496 = vrot.lane.b32.xlu0 %v6593_v8, %s7028_s8 }
 0xd73   :  { %3504 = vrot.lane.b32.xlu1 %v6545_v37, %s7027_s28  ;;  %3492 = vrot.lane.b32.xlu0 %v6545_v37, %s7028_s8 }
 0xd77   :  { %3695 = vperm.xlu1 %4542, %v3689_v21   ;;  %3538 = vperm.xlu0 %4541, %v3535_v43   ;;  %v4071_v21 = vld [vmem:[%s6877_s18 + $0x6] ss:$0 sm:$0xff] }
 0xd7b   :  { %3700 = vperm.xlu1 %4542, %v3690_v4   ;;  %3705 = vperm.xlu0 %4541, %v3691_v33   ;;  %v4063_v4 = vld [vmem:[%s6877_s18 + $0x2] ss:$0 sm:$0xff] }
 0xd7f   :  { %3710 = vperm.xlu0 %4541, %v3692_v17  }
 0xd89   :  { %v3467_v23 = vpop.permute.xlu1 %3466  ;;  %v3455_v56 = vpop.permute.xlu0 %3454 }
 0xd8a   :  { %v3477_v11 = vsel %vm2909_vm11, %v3455_v56, %v3467_v23 }
 0xd8b   :  { %v3489_v49 = vmul.f32 %v4073_v46, %v3477_v11 }
 0xd8d   :  { %v3351_v1 = vpop.permute.xlu1 %3350  ;;  %v3339_v6 = vpop.permute.xlu0 %3338 }
 0xd8e   :  { %v3361_v47 = vsel %vm1491_vm4, %v3339_v6, %v3351_v1 }
 0xd8f   :  { %v3385_v28 = vmul.f32 %v4065_v20, %v3361_v47 }
 0xd91   :  { %v3415_v54 = vpop.permute.xlu1 %3414  ;;  %v3403_v31 = vpop.permute.xlu0 %3402 }
 0xd92   :  { %v3425_v1 = vsel %vm2856_vm12, %v3403_v31, %v3415_v54  ;;  %v4069_v54 = vld [vmem:[%s6877_s18 + $0x5] ss:$0 sm:$0xff] }
 0xd95   :  { %v6657_v16 = vpop.permute.xlu1 %3310  ;;  %v6659_v9 = vpop.permute.xlu0 %3298 }
 0xd99   :  { %v3465_v34 = vpop.permute.xlu1 %3464  ;;  %v3453_v42 = vpop.permute.xlu0 %3452 }
 0xd9a   :  { %v3476_v27 = vsel %vm2909_vm11, %v3453_v42, %v3465_v34 }
 0xd9b   :  { %v3488_v41 = vmul.f32 %v4073_v46, %v3476_v27 }
 0xd9d   :  { %v3349_v44 = vpop.permute.xlu1 %3348  ;;  %v3337_v24 = vpop.permute.xlu0 %3336 }
 0xd9e   :  { %v3360_v35 = vsel %vm1491_vm4, %v3337_v24, %v3349_v44  ;;  %v3449_v24 = vmul.f32 %v4071_v21, %v3425_v1 }
 0xd9f   :  { %v3384_v43 = vmul.f32 %v4065_v20, %v3360_v35  ;;  %v3372_v31 = vmul.f32 %v4063_v4, %v3360_v35 }
 0xda1   :  { %v3413_v63 = vpop.permute.xlu1 %3412  ;;  %v3401_v10 = vpop.permute.xlu0 %3400 }
 0xda2   :  { %v3424_v42 = vsel %vm2856_vm12, %v3401_v10, %v3413_v63  ;;  %v4061_v63 = vld [vmem:[%s6877_s18 + $0x1] ss:$0 sm:$0xff] }
 0xda5   :  { %v6661_v36 = vpop.permute.xlu1 %3308  ;;  %v6663_v13 = vpop.permute.xlu0 %3296 }
 0xda9   :  { %v3471_v25 = vpop.permute.xlu1 %3470  ;;  %v3459_v48 = vpop.permute.xlu0 %3458 }
 0xdaa   :  { %v3479_v26 = vsel %vm2909_vm11, %v3459_v48, %v3471_v25 }
 0xdab   :  { %v3491_v15 = vmul.f32 %v4073_v46, %v3479_v26  ;;  %v3448_v26 = vmul.f32 %v4071_v21, %v3424_v42 }
 0xdad   :  { %v3355_v39 = vpop.permute.xlu1 %3354  ;;  %4338 = vmatprep.subr.mxu1 %v3491_v15  ;;  %v3343_v32 = vpop.permute.xlu0 %3342 }
 0xdae   :  { %v3363_v53 = vsel %vm1491_vm4, %v3343_v32, %v3355_v39 }
 0xdaf   :  { %v3387_v52 = vmul.f32 %v4065_v20, %v3363_v53  ;;  %v3375_v17 = vmul.f32 %v4063_v4, %v3363_v53 }
 0xdb1   :  { %v3419_v5 = vpop.permute.xlu1 %3418  ;;  %4339 = vmatpush3.msra.mxu1 %v3387_v52  ;;  %v3407_v55 = vpop.permute.xlu0 %3406  ;;  %v3321_v52 = vsel %vm2751_vm13, %v6659_v9, %v6657_v16  ;;  %v3436_v16 = vmul.f32 %v4069_v54, %v3424_v42  ;;  %v4059_v9 = vld [vmem:[%s6877_s18] ss:$0 sm:$0xff] }
 0xdb2   :  { %v3427_v29 = vsel %vm2856_vm12, %v3407_v55, %v3419_v5  ;;  %v3685_v42 = vld [vmem:[%s6880_s21] sm:$0xff] }
 0xdb3   :  { %v3451_v33 = vmul.f32 %v4071_v21, %v3427_v29  ;;  %v3439_v10 = vmul.f32 %v4069_v54, %v3427_v29 }
 0xdb5   :  { %v3315_v45 = vpop.permute.xlu1 %3314  ;;  %v3303_v18 = vpop.permute.xlu0 %3302 }
 0xdb6   :  { %v3323_v15 = vsel %vm2751_vm13, %v3303_v18, %v3315_v45  ;;  %v4075_v45 = vld [vmem:[%s6877_s18 + $0x8] ss:$0 sm:$0xff]  ;;  %v3437_v18 = vmul.f32 %v4069_v54, %v3425_v1 }
 0xdb9   :  { %v6673_v59 = vpop.permute.xlu1 %3275  ;;  %v6675_v22 = vpop.permute.xlu0 %3263 }
 0xdbd   :  { %v3469_v30 = vpop.permute.xlu1 %3468  ;;  %v3457_v2 = vpop.permute.xlu0 %3456 }
 0xdbe   :  { %v3478_v7 = vsel %vm2909_vm11, %v3457_v2, %v3469_v30  ;;  %v3320_v30 = vsel %vm2751_vm13, %v6663_v13, %v6661_v36  ;;  %v4067_v36 = vld [vmem:[%s6877_s18 + $0x4] ss:$0 sm:$0xff]  ;;  %vm3903_vm11 = vcmask 982016  }
 0xdbf   :  { %v3490_v60 = vmul.f32 %v4073_v46, %v3478_v7  ;;  %v3373_v46 = vmul.f32 %v4063_v4, %v3361_v47  ;;  %v3332_v47 = vmul.f32 %v4061_v63, %v3320_v30  ;;  %v3399_v27 = vmul.f32 %v4067_v36, %v6567_v50 }
 0xdc0   :  { %v3398_v35 = vmul.f32 %v4067_v36, %v6593_v8 }
 0xdc1   :  { %v3353_v40 = vpop.permute.xlu1 %3352  ;;  %4340 = vmatprep.subr.mxu1 %v3490_v60  ;;  %v3341_v19 = vpop.permute.xlu0 %3340  ;;  %v3333_v60 = vmul.f32 %v4061_v63, %v3321_v52 }
 0xdc2   :  { %v3362_v3 = vsel %vm1491_vm4, %v3341_v19, %v3353_v40  ;;  %v3284_v40 = vsel %vm1450_vm6, %v6675_v22, %v6673_v59  ;;  %vm3884_vm4 = vcmask 326656  }
 0xdc3   :  { %v3386_v62 = vmul.f32 %v4065_v20, %v3362_v3  ;;  %v3374_v44 = vmul.f32 %v4063_v4, %v3362_v3  ;;  %v3335_v20 = vmul.f32 %v4061_v63, %v3323_v15 }
 0xdc5   :  { %v6684_v61 = vpop.permute.xlu1 %3271  ;;  %4341 = vmatpush3.msra.mxu1 %v3386_v62  ;;  %v6686_v38 = vpop.permute.xlu0 %3259  ;;  %v3295_v62 = vmul.f32 %v4059_v9, %v3284_v40 }
 0xdc6   :  { %4342 = vmatprep.subr.mxu1 %v3489_v49  ;;  %v3282_v59 = vsel %vm1450_vm6, %v6686_v38, %v6684_v61  ;;  %v3532_v61 = vld [vmem:[%s6878_s19] sm:$0xff] }
 0xdc7   :  { %4343 = vmatpush3.msra.mxu1 %v3385_v28 }
 0xdc8   :  { %4344 = vmatprep.subr.mxu1 %v3488_v41  ;;  %v3397_v41 = vmul.f32 %v4067_v36, %v6523_v14 }
 0xdc9   :  { %v3417_v23 = vpop.permute.xlu1 %3416  ;;  %4345 = vmatpush3.msra.mxu1 %v3384_v43  ;;  %v3405_v56 = vpop.permute.xlu0 %3404  ;;  %v3396_v43 = vmul.f32 %v4067_v36, %v6545_v37 }
 0xdca   :  { %v3426_v6 = vsel %vm2856_vm12, %v3405_v56, %v3417_v23  ;;  %4346 = vmatprep.subr.mxu1 %v3451_v33 }
 0xdcb   :  { %v3450_v34 = vmul.f32 %v4071_v21, %v3426_v6  ;;  %4347 = vmatpush3.msra.mxu1 %v3375_v17  ;;  %v3438_v5 = vmul.f32 %v4069_v54, %v3426_v6  ;;  %v3293_v21 = vmul.f32 %v4059_v9, %v3282_v59 }
 0xdcd   :  { %v3270_v25 = vpop.permute.xlu1 %3269  ;;  %4348 = vmatprep.subr.mxu1 %v3450_v34  ;;  %v3258_v48 = vpop.permute.xlu0 %3257  ;;  %v3534_v34 = vld [vmem:[%s6878_s19 + $0x10] sm:$0xff] }
 0xdce   :  { %4349 = vmatpush3.msra.mxu1 %v3374_v44  ;;  %v3281_v28 = vsel %vm1450_vm6, %v3258_v48, %v3270_v25 }
 0xdcf   :  { %4350 = vmatprep.subr.mxu1 %v3449_v24  ;;  %v3292_v4 = vmul.f32 %v4059_v9, %v3281_v28 }
 0xdd0   :  { %4351 = vmatpush3.msra.mxu1 %v3373_v46 }
 0xdd1   :  { %v3313_v39 = vpop.permute.xlu1 %3312  ;;  %4352 = vmatprep.subr.mxu1 %v3448_v26  ;;  %v3301_v32 = vpop.permute.xlu0 %3300 }
 0xdd2   :  { %v3322_v53 = vsel %vm2751_vm13, %v3301_v32, %v3313_v39  ;;  %4353 = vmatpush3.msra.mxu1 %v3372_v31 }
 0xdd3   :  { %v3334_v55 = vmul.f32 %v4061_v63, %v3322_v53  ;;  %4354 = vmatprep.subr.mxu1 %v3439_v10  ;;  %v3687_v63 = vld [vmem:[%s6880_s21 + $0x10] sm:$0xff]  ;;  %v3688_v10 = vld [vmem:[%s6880_s21 + $0x18] sm:$0xff] }
 0xdd4   :  { %4355 = vmatpush3.msra.mxu1 %v3335_v20 }
 0xdd5   :  { %v3511_v2 = vpop.permute.xlu1 %3510  ;;  %4356 = vmatprep.subr.mxu1 %v3438_v5  ;;  %v3499_v7 = vpop.permute.xlu0 %3498 }
 0xdd6   :  { %v3519_v11 = vsel %vm1369_vm9, %v3499_v7, %v3511_v2  ;;  %4357 = vmatpush3.msra.mxu1 %v3334_v55 }
 0xdd7   :  { %v3531_v19 = vmul.f32 %v4075_v45, %v3519_v11  ;;  %4358 = vmatprep.subr.mxu1 %v3437_v18 }
 0xdd8   :  { %4359 = vmatpush3.msra.mxu1 %v3333_v60 }
 0xdd9   :  { %v3274_v13 = vpop.permute.xlu1 %3273  ;;  %4360 = vmatprep.subr.mxu1 %v3436_v16  ;;  %4468 = vmatpush3.msra.mxu0 %v3531_v19  ;;  %v3262_v3 = vpop.permute.xlu0 %3261 }
 0xdda   :  { %v3283_v49 = vsel %vm1450_vm6, %v3262_v3, %v3274_v13  ;;  %4361 = vmatpush3.msra.mxu1 %v3332_v47  ;;  %4469 = vmatprep.subr.mxu0 %v7029_v57  ;;  %vm3888_vm6 = vcmask 457728  }
 0xddb   :  { %v3294_v22 = vmul.f32 %v4059_v9, %v3283_v49  ;;  %4362 = vmatprep.subr.mxu1 %v3399_v27 }
 0xddc   :  { %4363 = vmatpush3.msra.mxu1 %v3295_v62 }
 0xddd   :  { %v3507_v29 = vpop.permute.xlu1 %3506  ;;  %4364 = vmatprep.subr.mxu1 %v3398_v35  ;;  %v3495_v50 = vpop.permute.xlu0 %3494 }
 0xdde   :  { %4365 = vmatpush3.msra.mxu1 %v3294_v22  ;;  %v3517_v33 = vsel %vm1369_vm9, %v3495_v50, %v3507_v29 }
 0xddf   :  { %4366 = vmatprep.subr.mxu1 %v3397_v41  ;;  %v3529_v23 = vmul.f32 %v4075_v45, %v3517_v33 }
 0xde0   :  { %4367 = vmatpush3.msra.mxu1 %v3293_v21 }
 0xde1   :  { %v3509_v8 = vpop.permute.xlu1 %3508  ;;  %v3497_v38 = vpop.permute.xlu0 %3496  ;;  %4368 = vmatprep.subr.mxu1 %v3396_v43 }
 0xde2   :  { %v3518_v17 = vsel %vm1369_vm9, %v3497_v38, %v3509_v8  ;;  %4369 = vmatpush3.msra.mxu1 %v3292_v4 }
 0xde3   :  { %v3530_v14 = vmul.f32 %v4075_v45, %v3518_v17  ;;  %3609 = vmatmul.mubr.f32.vlgmr.msra.gmra.mxu1 %v3532_v61 }
 0xde5   :  { %v3505_v56 = vpop.permute.xlu1 %3504  ;;  %4470 = vmatpush3.msra.mxu0 %v3530_v14  ;;  %v3493_v37 = vpop.permute.xlu0 %3492 }
 0xde6   :  { %v3516_v1 = vsel %vm1369_vm9, %v3493_v37, %v3505_v56  ;;  %4471 = vmatprep.subr.mxu0 %v7029_v57  ;;  %vm3895_vm9 = vcmask 719872  }
 0xde7   :  { %v3528_v6 = vmul.f32 %v4075_v45, %v3516_v1  ;;  %4472 = vmatpush3.msra.mxu0 %v3529_v23 }
 0xde8   :  { %4473 = vmatprep.subr.mxu0 %v7029_v57  ;;  %v3686_v57 = vld [vmem:[%s6880_s21 + $0x8] sm:$0xff]  ;;  %s7031_s21 = smov 88  }
 0xde9   :  { %4474 = vmatpush3.msra.mxu0 %v3528_v6 }
 0xdea   :  { %4476 = vmatmul.mubr.msk.f32.vlgmr.msra.gmra.mxu0 %vm1720_vm2, %v3534_v34 }
 0xdeb   :  { %4480 = vmatprep.mubr.msk.f32.mxu0 %vm3147_vm15, %v3685_v42 }
 0xdf2   :  { %v3539_v48 = vpop.permute.xlu0 %3538  ;;  %v3696_v39 = vpop.permute.xlu1 %3695 }
 0xdf6   :  { %v3706_v32 = vpop.permute.xlu0 %3705  ;;  %v3701_v20 = vpop.permute.xlu1 %3700 }
 0xdfa   :  { %v3711_v45 = vpop.permute.xlu0 %3710 }
 0xea3   :  { %v4370_v44 = vpop.f32.mrf.mxu1 }
 0xea5   :  { %v4371_v24 = vpop.f32.mrf.mxu1 }
 0xea6   :  { %v4372_v25 = vadd.f32 %v4371_v24, %v4370_v44 }
 0xea8   :  { %v3611_v46 = vadd.f32 %v4372_v25, %v3539_v48 }
 0xeaa   :  { %v3680_v26 = vpop.f32.mrf.mxu0 }
 0xeab   :  { %v3681_v15 = vadd.f32 %v3680_v26, %v3611_v46 }
 0xeac   :  { %v4477_v54 = vpop.f32.mrf.mxu0 }
 0xead   :  { %v3684_v31 = vmax.f32 %v3681_v15, 0.0 }
 0xeaf   :  { %4478 = vmatprep.subr.mxu0 %v3684_v31 }
 0xeb0   :  { %4479 = vmatpush3.msra.mxu0 %v3684_v31 }
 0xeb1   :  { %4481 = vmatmul.mubr.msk.f32.vlgmr.msra.gmra.mxu0 %vm3147_vm15, %v3686_v57 }
 0xeb2   :  { %4483 = vmatprep.mubr.msk.f32.mxu0 %vm3147_vm15, %v3687_v63 }
 0xeb5   :  { %4484 = vmatmul.mubr.msk.f32.gmra.mxu0 %vm3147_vm15, %v3688_v10 }
 0xf71   :  { %v4482_v53 = vpop.f32.mrf.mxu0 }
 0xf72   :  { %v3797_v52 = vadd.f32 %v4482_v53, %v3701_v20 }
 0xf73   :  { %v3791_v5 = vpop.f32.mrf.mxu0 }
 0xf74   :  { %v3811_v55 = vadd.f32 %v3797_v52, %v6520_v12 }
 0xf75   :  { %v4485_v18 = vpop.f32.mrf.mxu0 }
 0xf76   :  { %v6763_v30 = vmax.f32 %v3811_v55, 0.0  ;;  %v3807_v2 = vadd.f32 %v4485_v18, %v3711_v45 }
 0xf77   :  { %v3801_v19 = vpop.f32.mrf.mxu0 }
 0xf78   :  { %v3813_v7 = vadd.f32 %v3807_v2, %v6560_v0  ;;  %3848 = vrot.lane.b32.xlu1 %v6763_v30, %s7030_s12  ;;  %v3851_v11 = vrot.slane %v6763_v30, 1  ;;  %v3855_v12 = vrot.slane %v6763_v30, 2  ;;  %v3792_v0 = vadd.f32 %v3791_v5, %v3696_v39 }
 0xf79   :  { %v3859_v9 = vrot.slane %v6763_v30, 3  ;;  %v3802_v36 = vadd.f32 %v3801_v19, %v3706_v32  ;;  %v3863_v13 = vrot.slane %v6763_v30, 4  ;;  %v3867_v49 = vrot.slane %v6763_v30, 5 }
 0xf7a   :  { %v6768_v60 = vmax.f32 %v3813_v7, 0.0  ;;  %v3810_v47 = vadd.f32 %v3792_v0, %v6538_v51  ;;  %v3871_v14 = vrot.slane %v6763_v30, 6  ;;  %v3875_v56 = vrot.slane %v6763_v30, 7 }
 0xf7b   :  { %v3812_v62 = vadd.f32 %v3802_v36, %v6586_v58 }
 0xf7c   :  { %3852 = vrot.lane.b32.xlu1 %v3851_v11, %s4714_s24  ;;  %3935 = vrot.lane.b32.xlu0 %v6768_v60, %s7030_s12  ;;  %v3938_v16 = vrot.slane %v6768_v60, 1  ;;  %v3942_v40 = vrot.slane %v6768_v60, 2  ;;  %v3946_v3 = vrot.slane %v6768_v60, 3  ;;  %v6787_v27 = vmax.f32 %v3810_v47, 0.0 }
 0xf7d   :  { %v3950_v59 = vrot.slane %v6768_v60, 4  ;;  %v6794_v51 = vmax.f32 %v3812_v62, 0.0  ;;  %v3954_v22 = vrot.slane %v6768_v60, 5  ;;  %v3958_v23 = vrot.slane %v6768_v60, 6 }
 0xf7e   :  { %v3819_v35 = vrot.slane %v6787_v27, 1  ;;  %v3823_v28 = vrot.slane %v6787_v27, 2  ;;  %v3827_v50 = vrot.slane %v6787_v27, 3  ;;  %v3831_v21 = vrot.slane %v6787_v27, 4 }
 0xf7f   :  { %v3906_v58 = vrot.slane %v6794_v51, 1  ;;  %v3910_v29 = vrot.slane %v6794_v51, 2  ;;  %v3914_v41 = vrot.slane %v6794_v51, 3  ;;  %v3918_v43 = vrot.slane %v6794_v51, 4 }
 0xf80   :  { %3856 = vrot.lane.b32.xlu1 %v3855_v12, %s4688_s29  ;;  %3939 = vrot.lane.b32.xlu0 %v3938_v16, %s4714_s24  ;;  %s7034_s24 = smov 8   ;;  %v3835_v4 = vrot.slane %v6787_v27, 5  ;;  %v3922_v61 = vrot.slane %v6794_v51, 5  ;;  %v3839_v8 = vrot.slane %v6787_v27, 6  ;;  %v3926_v38 = vrot.slane %v6794_v51, 6 }
 0xf81   :  { %v3843_v33 = vrot.slane %v6787_v27, 7  ;;  %v3930_v17 = vrot.slane %v6794_v51, 7  ;;  %v3962_v37 = vrot.slane %v6768_v60, 7 }
 0xf84   :  { %3860 = vrot.lane.b32.xlu1 %v3859_v9, %s7031_s21  ;;  %3943 = vrot.lane.b32.xlu0 %v3942_v40, %s4688_s29  ;;  %s7033_s29 = smov 104  }
 0xf88   :  { %3864 = vrot.lane.b32.xlu1 %v3863_v13, %s7032_s30  ;;  %3947 = vrot.lane.b32.xlu0 %v3946_v3, %s7031_s21 }
 0xf8c   :  { %3868 = vrot.lane.b32.xlu1 %v3867_v49, %s7033_s29  ;;  %3951 = vrot.lane.b32.xlu0 %v3950_v59, %s7032_s30  ;;  %v4725_v59 = vmov 1966171168  }
 0xf90   :  { %3955 = vrot.lane.b32.xlu0 %v3954_v22, %s7033_s29  ;;  %3820 = vrot.lane.b32.xlu1 %v3819_v35, %s7034_s24  ;;  %v3987_v22 = vlaneseq }
 0xf94   :  { %3907 = vrot.lane.b32.xlu0 %v3906_v58, %s7034_s24  ;;  %3824 = vrot.lane.b32.xlu1 %v3823_v28, %s7035_s13 }
 0xf98   :  { %3911 = vrot.lane.b32.xlu0 %v3910_v29, %s7035_s13  ;;  %3828 = vrot.lane.b32.xlu1 %v3827_v50, %s4722_s17 }
 0xf9c   :  { %3915 = vrot.lane.b32.xlu0 %v3914_v41, %s4722_s17  ;;  %3832 = vrot.lane.b32.xlu1 %v3831_v21, %s7036_s7 }
 0xfa0   :  { %3919 = vrot.lane.b32.xlu0 %v3918_v43, %s7036_s7  ;;  %3836 = vrot.lane.b32.xlu1 %v3835_v4, %s4723_s5 }
 0xfa4   :  { %3923 = vrot.lane.b32.xlu0 %v3922_v61, %s4723_s5  ;;  %3840 = vrot.lane.b32.xlu1 %v3839_v8, %s7037_s26  ;;  %v3988_v61 = vshrl.u32 %v3987_v22, 7 }
 0xfa8   :  { %3927 = vrot.lane.b32.xlu0 %v3926_v38, %s7037_s26  ;;  %3844 = vrot.lane.b32.xlu1 %v3843_v33, %s4724_s1 }
 0xfac   :  { %3931 = vrot.lane.b32.xlu0 %v3930_v17, %s4724_s1  ;;  %3872 = vrot.lane.b32.xlu1 %v3871_v14, %s7038_s25 }
 0xfb0   :  { %3959 = vrot.lane.b32.xlu0 %v3958_v23, %s7038_s25  ;;  %3876 = vrot.lane.b32.xlu1 %v3875_v56, %s7039_s0 }
 0xfb4   :  { %3963 = vrot.lane.b32.xlu0 %v3962_v37, %s7039_s0 }
 0xfea   :  { %v3849_v1 = vpop.permute.xlu1 %3848 }
 0xfee   :  { %v3853_v6 = vpop.permute.xlu1 %3852  ;;  %v3936_v34 = vpop.permute.xlu0 %3935 }
 0xff2   :  { %v3857_v42 = vpop.permute.xlu1 %3856  ;;  %v3940_v44 = vpop.permute.xlu0 %3939 }
 0xff6   :  { %v3861_v24 = vpop.permute.xlu1 %3860  ;;  %v3944_v25 = vpop.permute.xlu0 %3943 }
 0xffa   :  { %v3865_v48 = vpop.permute.xlu1 %3864  ;;  %v3948_v46 = vpop.permute.xlu0 %3947 }
 0xffe   :  { %v3869_v26 = vpop.permute.xlu1 %3868  ;;  %v3952_v15 = vpop.permute.xlu0 %3951 }
0x1002   :  { %v3956_v54 = vpop.permute.xlu0 %3955  ;;  %v3821_v31 = vpop.permute.xlu1 %3820 }
0x1003   :  { %v3879_v5 = vsel %vm3147_vm15, %v6787_v27, %v3821_v31 }
0x1006   :  { %v3908_v57 = vpop.permute.xlu0 %3907  ;;  %v3825_v63 = vpop.permute.xlu1 %3824 }
0x1007   :  { %v3880_v55 = vsel %vm1019_vm1, %v3879_v5, %v3825_v63  ;;  %v3966_v7 = vsel %vm3147_vm15, %v6794_v51, %v3908_v57  ;;  %v3985_v51 = vunpack.c.l.s4 %v4725_v59 }
0x1009   :  { %v3986_v4 = vunpack.c.0.s8 %v3985_v51 }
0x100a   :  { %v3912_v10 = vpop.permute.xlu0 %3911  ;;  %v3829_v39 = vpop.permute.xlu1 %3828 }
0x100b   :  { %v3882_v30 = vsel %vm3881_vm3, %v3880_v55, %v3829_v39  ;;  %v3967_v11 = vsel %vm1019_vm1, %v3966_v7, %v3912_v10  ;;  %vm3897_vm1 = vcmask 785408   ;;  %v3989_v56 = vsub.s32 %v3986_v4, %v3988_v61 }
0x100e   :  { %v3916_v32 = vpop.permute.xlu0 %3915  ;;  %v3833_v20 = vpop.permute.xlu1 %3832 }
0x100f   :  { %v3883_v2 = vsel %vm1720_vm2, %v3882_v30, %v3833_v20  ;;  %v3968_v9 = vsel %vm3881_vm3, %v3967_v11, %v3916_v32 }
0x1012   :  { %v3920_v53 = vpop.permute.xlu0 %3919  ;;  %v3837_v52 = vpop.permute.xlu1 %3836 }
0x1013   :  { %v3885_v60 = vsel %vm3884_vm4, %v3883_v2, %v3837_v52  ;;  %v3969_v19 = vsel %vm1720_vm2, %v3968_v9, %v3920_v53  ;;  %vm3901_vm2 = vcmask 916480  }
0x1016   :  { %v3924_v45 = vpop.permute.xlu0 %3923  ;;  %v3841_v18 = vpop.permute.xlu1 %3840 }
0x1017   :  { %v3887_v12 = vsel %vm3886_vm5, %v3885_v60, %v3841_v18  ;;  %v3970_v36 = vsel %vm3884_vm4, %v3969_v19, %v3924_v45 }
0x101a   :  { %v3928_v16 = vpop.permute.xlu0 %3927  ;;  %v3845_v0 = vpop.permute.xlu1 %3844 }
0x101b   :  { %v3889_v40 = vsel %vm3888_vm6, %v3887_v12, %v3845_v0  ;;  %v3971_v3 = vsel %vm3886_vm5, %v3970_v36, %v3928_v16 }
0x101c   :  { %v3890_v47 = vsel %vm724_vm0, %v3889_v40, %v3849_v1 }
0x101d   :  { %v3892_v13 = vsel %vm3891_vm7, %v3890_v47, %v3853_v6 }
0x101e   :  { %v3894_v27 = vsel %vm3893_vm8, %v3892_v13, %v3857_v42  ;;  %v3932_v62 = vpop.permute.xlu0 %3931  ;;  %v3873_v49 = vpop.permute.xlu1 %3872 }
0x101f   :  { %v3972_v35 = vsel %vm3888_vm6, %v3971_v3, %v3932_v62  ;;  %v3896_v58 = vsel %vm3895_vm9, %v3894_v27, %v3861_v24 }
0x1020   :  { %v3973_v28 = vsel %vm724_vm0, %v3972_v35, %v3936_v34  ;;  %v3898_v29 = vsel %vm3897_vm1, %v3896_v58, %v3865_v48  ;;  %vm4001_vm0 = vcmp.lt.s32.totalorder %v3987_v22, 256 }
0x1021   :  { %v3974_v50 = vsel %vm3891_vm7, %v3973_v28, %v3940_v44  ;;  %v3900_v41 = vsel %vm3899_vm10, %v3898_v29, %v3869_v26 }
0x1022   :  { %v3975_v21 = vsel %vm3893_vm8, %v3974_v50, %v3944_v25  ;;  %v3960_v43 = vpop.permute.xlu0 %3959  ;;  %v3902_v38 = vsel %vm3901_vm2, %v3900_v41, %v3873_v49  ;;  %v3877_v17 = vpop.permute.xlu1 %3876 }
0x1023   :  { %v3976_v8 = vsel %vm3895_vm9, %v3975_v21, %v3948_v46  ;;  %v3904_v1 = vsel %vm3903_vm11, %v3902_v38, %v3877_v17 }
0x1024   :  { %v3977_v33 = vsel %vm3897_vm1, %v3976_v8, %v3952_v15 }
0x1025   :  { %v3978_v14 = vsel %vm3899_vm10, %v3977_v33, %v3956_v54 }
0x1026   :  { %v3979_v23 = vsel %vm3901_vm2, %v3978_v14, %v3960_v43  ;;  %v3964_v37 = vpop.permute.xlu0 %3963 }
0x1027   :  { %v3980_v6 = vsel %vm3903_vm11, %v3979_v23, %v3964_v37 }
0x1028   :  { %v3983_v34 = vcombine.low %v3904_v1, %v3980_v6 }
0x102a   :  { %v3990_v42 = vrot.slane %v3983_v34, %v3989_v56 }
0x102c   :  { %v3997_v44 = vrot.slane %v3990_v42, %v3989_v56 }
0x102e   :  { %4003 = vst.msk [vmem:[%s6882_s23] sm:$0x3] %vm4001_vm0, %v3997_v44 }
0x102f   :  { %4008 = vsyncpa [#allocation3], 1 }
0x1030   :  { %4009 = vsyncpa [#allocation5], 1 }
0x1031   :  { %4010 = vsyncpa [#allocation8], 1 }
0x1032   :  { %4011 = vsyncpa [#allocation11], 1 }

</bundles_post_ra>
